<compile_context>
chip_gen: v6e
topology: v6e:2x2x1
jax: 0.10.0
libtpu: 0.0.40
codegen_flags: <defaults>
</compile_context>

<pallas_src>
import jax
import jax.numpy as jnp
from jax import lax
from jax.experimental import pallas as pl
from jax.experimental.pallas import tpu as pltpu
import numpy as np

EPS = 1e-5  # PyTorch InstanceNorm2d default (affine=False, biased variance)


# --------------------------------------------------------------------------
# Helpers
# --------------------------------------------------------------------------
def _vmem_capacity_bytes():
    """Per-generation physical VMEM (falls back to the smallest, v7x)."""
    try:
        info = pltpu.get_tpu_info()
        cap = int(getattr(info, "vmem_capacity_bytes", 0) or 0)
        if cap > 0:
            return cap
    except Exception:
        pass
    return 64 * 1024 * 1024


def _fold_weight(w, cdt):
    """(3, 3, Cin, Cout) HWIO -> (3[dw], 3*Cin, Cout) in the compute dtype."""
    kh, kw, ci, co = w.shape
    return jnp.transpose(w, (1, 0, 2, 3)).reshape(kw, kh * ci, co).astype(cdt)


def _instance_norm(y, inv_n):
    """y: (HW, C) f32.  One-pass stats: mean=E[y], var=E[y^2]-E[y]^2 (>=0)."""
    s = jnp.sum(y, axis=0, keepdims=True)
    ss = jnp.sum(y * y, axis=0, keepdims=True)
    mean = s * inv_n
    var = jnp.maximum(ss * inv_n - mean * mean, 0.0)
    return (y - mean) * lax.rsqrt(var + EPS)


def _conv3x3_rows(zh, w_ref, rows, W, C):
    """3x3 conv on H-prepadded rows, reflection-padded in W inside.

    zh: (rows+2, W, C) activation rows (already includes the 1-row H halo),
        in the MXU compute dtype.
    w_ref: (3, 3C, C) folded weight ref (compute dtype).
    Returns (rows*W, C) float32 accumulator.

    The three dh taps per dw are fused into one K=3C matmul (3 dots total).
    """
    # Width-shifted slabs with reflection: slabs[dw][:, j] == xpad[:, j + dw].
    left = jnp.concatenate([zh[:, 1:2], zh[:, :W - 1]], axis=1)      # dw = 0
    right = jnp.concatenate([zh[:, 1:W], zh[:, W - 2:W - 1]], axis=1)  # dw = 2
    slabs = (left, zh, right)
    acc = None
    for dw in range(3):
        s = slabs[dw]
        # Concat the 3 H-shifted patches along the channel (lane) axis;
        # H-axis slices are on the untiled/major axis (cheap) and the reshape
        # is layout-preserving because W % sublane_pack == 0 (asserted).
        p = jnp.concatenate([s[0:rows], s[1:rows + 1], s[2:rows + 2]],
                            axis=-1).reshape(rows * W, 3 * C)
        d = jnp.dot(p, w_ref[dw], preferred_element_type=jnp.float32)
        acc = d if acc is None else acc + d
    return acc


# --------------------------------------------------------------------------
# Fused whole-image kernel (used when the working set fits VMEM)
# --------------------------------------------------------------------------
def _resblock_fused_kernel(x_ref, w1_ref, w2_ref, o_ref):
    _, H, W, C = x_ref.shape
    inv_n = 1.0 / float(H * W)
    cdt = w1_ref.dtype                       # compute dtype (weights pre-cast)
    x = x_ref[0]                             # (H, W, C) input dtype
    xc = x.astype(cdt)

    # Stage 1: reflect-pad (H in-kernel, W inside conv) -> conv -> IN -> ReLU.
    zh = jnp.concatenate([xc[1:2], xc, xc[H - 2:H - 1]], axis=0)   # (H+2, W, C)
    y = _conv3x3_rows(zh, w1_ref, H, W, C)                         # (HW, C) f32
    # Fused epilogue: normalize + relu + cast + reshape in one expression.
    y = jnp.maximum(_instance_norm(y, inv_n), 0.0).astype(cdt).reshape(H, W, C)

    # Stage 2: reflect-pad -> conv -> IN.
    zh2 = jnp.concatenate([y[1:2], y, y[H - 2:H - 1]], axis=0)
    y2 = _instance_norm(_conv3x3_rows(zh2, w2_ref, H, W, C), inv_n)

    o_ref[0] = (x.astype(jnp.float32) + y2.reshape(H, W, C)).astype(o_ref.dtype)


# --------------------------------------------------------------------------
# H-tiled two-pass kernels (VMEM-bounded shapes / 2nd parallel axis for v7x)
# --------------------------------------------------------------------------
def _halo_rows(hbm_ref, halo, sem, n, t, TH, H, T):
    """DMA the 1-row top/bottom halos (with image-boundary reflection)."""
    top = jnp.where(t == 0, 1, t * TH - 1)
    bot = jnp.where(t == T - 1, H - 2, (t + 1) * TH)
    cp_t = pltpu.make_async_copy(hbm_ref.at[n, top], halo.at[0], sem.at[0])
    cp_b = pltpu.make_async_copy(hbm_ref.at[n, bot], halo.at[1], sem.at[1])
    cp_t.start()
    cp_b.start()
    cp_t.wait()
    cp_b.wait()


def _conv_stats_kernel(x_ref, x_hbm, w_ref, y_ref, st_ref, halo, sem):
    """Pass A: conv3x3(reflect-pad(x)) -> raw output tile + partial IN stats."""
    _, TH, W, C = x_ref.shape
    H = x_hbm.shape[1]
    n, t, T = pl.program_id(0), pl.program_id(1), pl.num_programs(1)
    _halo_rows(x_hbm, halo, sem, n, t, TH, H, T)
    cdt = w_ref.dtype
    zh = jnp.concatenate([halo[0:1].astype(cdt),
                          x_ref[0].astype(cdt),
                          halo[1:2].astype(cdt)], axis=0)          # (TH+2, W, C)
    acc = _conv3x3_rows(zh, w_ref, TH, W, C)                       # (TH*W, C) f32
    y_ref[0] = acc.reshape(TH, W, C)
    st_ref[0, 0] = jnp.concatenate(
        [jnp.sum(acc, axis=0, keepdims=True),
         jnp.sum(acc * acc, axis=0, keepdims=True)], axis=0)       # (2, C)


def _norm_relu_conv_stats_kernel(y1_ref, y1_hbm, st1_ref, w_ref,
                                 y2_ref, st2_ref, halo, sem):
    """Pass B: IN(global stats)+ReLU on loaded rows, conv3x3, partial stats."""
    _, TH, W, C = y1_ref.shape
    H = y1_hbm.shape[1]
    n, t, T = pl.program_id(0), pl.program_id(1), pl.num_programs(1)
    _halo_rows(y1_hbm, halo, sem, n, t, TH, H, T)
    cdt = w_ref.dtype
    mean = st1_ref[0, 0]                                           # (C,)
    inv = st1_ref[0, 1]                                            # (C,)

    def prep(v):  # normalize with global stats + ReLU + cast (pointwise,
        return jnp.maximum((v - mean) * inv, 0.0).astype(cdt)      # so it
        # commutes with reflection padding)

    zh = jnp.concatenate([prep(halo[0:1]), prep(y1_ref[0]), prep(halo[1:2])],
                         axis=0)
    acc = _conv3x3_rows(zh, w_ref, TH, W, C)
    y2_ref[0] = acc.reshape(TH, W, C)
    st2_ref[0, 0] = jnp.concatenate(
        [jnp.sum(acc, axis=0, keepdims=True),
         jnp.sum(acc * acc, axis=0, keepdims=True)], axis=0)


def _finalize_stats(partial, count):
    """(N, T, 2, C) partial sums -> per-image (mean, inv_std), each (N, C)."""
    tot = jnp.sum(partial, axis=1)
    mean = tot[:, 0] / count
    var = jnp.maximum(tot[:, 1] / count - mean * mean, 0.0)
    return mean, lax.rsqrt(var + EPS)


def _residual_block_tiled(x, w1f, w2f, tile_h, vmem_limit):
    N, H, W, C = x.shape
    T = H // tile_h
    conv_flops = 2 * 9 * H * W * C * C * N

    def run(kernel, ins, in_specs, halo_dtype, bytes_accessed):
        return pl.pallas_call(
            kernel,
            out_shape=(jax.ShapeDtypeStruct((N, H, W, C), jnp.float32),
                       jax.ShapeDtypeStruct((N, T, 2, C), jnp.float32)),
            grid_spec=pltpu.PrefetchScalarGridSpec(
                num_scalar_prefetch=0,
                grid=(N, T),
                in_specs=in_specs,
                out_specs=[
                    pl.BlockSpec((1, tile_h, W, C), lambda n, t: (n, t, 0, 0)),
                    pl.BlockSpec((1, 1, 2, C), lambda n, t: (n, t, 0, 0)),
                ],
                scratch_shapes=[pltpu.VMEM((2, W, C), halo_dtype),
                                pltpu.SemaphoreType.DMA((2,))],
            ),
            compiler_params=pltpu.CompilerParams(
                dimension_semantics=("parallel", "parallel"),
                vmem_limit_bytes=vmem_limit),
            cost_estimate=pl.CostEstimate(
                flops=conv_flops, transcendentals=0,
                bytes_accessed=int(bytes_accessed)),
        )(*ins)

    # Pass A: conv1 + partial stats.
    in_specs_a = [
        pl.BlockSpec((1, tile_h, W, C), lambda n, t: (n, t, 0, 0)),
        pl.BlockSpec(memory_space=pl.ANY),          # same x, for halo-row DMAs
        pl.BlockSpec((3, 3 * C, C), lambda n, t: (0, 0, 0)),
    ]
    xb = x.size * x.dtype.itemsize
    y1, st1p = run(_conv_stats_kernel, (x, x, w1f), in_specs_a, x.dtype,
                   2 * xb + w1f.size * w1f.dtype.itemsize)

    mean1, inv1 = _finalize_stats(st1p, float(H * W))
    stats1 = jnp.stack([mean1, inv1], axis=1)       # (N, 2, C)

    # Pass B: IN1+ReLU -> conv2 + partial stats.
    in_specs_b = [
        pl.BlockSpec((1, tile_h, W, C), lambda n, t: (n, t, 0, 0)),
        pl.BlockSpec(memory_space=pl.ANY),
        pl.BlockSpec((1, 2, C), lambda n, t: (n, 0, 0)),
        pl.BlockSpec((3, 3 * C, C), lambda n, t: (0, 0, 0)),
    ]
    y1b = y1.size * 4
    y2, st2p = run(_norm_relu_conv_stats_kernel, (y1, y1, stats1, w2f),
                   in_specs_b, jnp.float32,
                   2 * y1b + w2f.size * w2f.dtype.itemsize)

    # Final IN2 + residual: plain-JAX elementwise epilogue (fuses in XLA).
    mean2, inv2 = _finalize_stats(st2p, float(H * W))
    out = (x.astype(jnp.float32)
           + (y2 - mean2[:, None, None, :]) * inv2[:, None, None, :])
    return out.astype(x.dtype)


# --------------------------------------------------------------------------
# Public wrapper
# --------------------------------------------------------------------------
def residual_block(x, w1, b1, w2, b2, *, compute_dtype=None, tile_h=None):
    """x: (N, H, W, C) NHWC; w*: (3, 3, C, C) HWIO; b*: (C,).

    Biases are accepted for API parity but unused: a per-channel constant
    added before an affine-free InstanceNorm (computed over the full H*W
    extent, which both paths preserve) cancels exactly.

    compute_dtype: MXU operand dtype (default: x.dtype).  Pass jnp.bfloat16
    for full MXU throughput (accumulation and IN stats stay f32).
    tile_h: force the H-tiled two-pass path with this tile height (must
    divide H); by default it is selected automatically from the VMEM budget.
    """
    del b1, b2
    N, H, W, C = x.shape
    assert H >= 2 and W >= 2, "ReflectionPad2d(1) needs H, W >= 2"
    cdt = jnp.dtype(compute_dtype) if compute_dtype is not None else jnp.dtype(x.dtype)
    # Layout precondition (dtype-aware): merging (H, W) -> H*W on the sublane
    # axis is only relayout-free when W is a multiple of the sublane pack.
    pack = 8 * max(1, 4 // jnp.dtype(cdt).itemsize)
    assert W % pack == 0, (
        f"W={W} must be a multiple of {pack} for compute dtype {cdt}")
    # NOTE: C sits on the lane axis -> best MXU/lane utilization when
    # C % 128 == 0 (real CycleGAN uses C=256).  Smaller C is correct but padded.

    isize = jnp.dtype(x.dtype).itemsize
    csize = jnp.dtype(cdt).itemsize
    cap = _vmem_capacity_bytes()

    def step_bytes(rows):
        blk = rows * W * C
        return int(4 * blk * isize             # in/out blocks, double-buffered
                   + 10 * blk * csize          # padded rows + K=3C operands
                   + 6 * blk * 4               # f32 accumulators / IN temps
                   + 4 * 9 * C * C * csize)    # both folded weights, dbl-buf

    w1f = _fold_weight(w1, cdt)
    w2f = _fold_weight(w2, cdt)

    if tile_h is None and step_bytes(H) <= int(0.55 * cap):
        # Whole-image fused path: single HBM round trip, one-pass IN stats.
        vmem_limit = int(min(0.75 * cap,
                             max(1.5 * step_bytes(H), 32 * 1024 * 1024)))
        return pl.pallas_call(
            _resblock_fused_kernel,
            out_shape=jax.ShapeDtypeStruct((N, H, W, C), x.dtype),
            grid_spec=pltpu.PrefetchScalarGridSpec(
                num_scalar_prefetch=0,
                grid=(N,),
                in_specs=[
                    pl.BlockSpec((1, H, W, C), lambda n: (n, 0, 0, 0)),
                    pl.BlockSpec((3, 3 * C, C), lambda n: (0, 0, 0)),
                    pl.BlockSpec((3, 3 * C, C), lambda n: (0, 0, 0)),
                ],
                out_specs=pl.BlockSpec((1, H, W, C), lambda n: (n, 0, 0, 0)),
            ),
            compiler_params=pltpu.CompilerParams(
                dimension_semantics=("parallel",),
                vmem_limit_bytes=vmem_limit),
            cost_estimate=pl.CostEstimate(
                flops=2 * 2 * 9 * H * W * C * C * N,
                transcendentals=4 * N * C,
                bytes_accessed=int(2 * x.size * isize + 2 * 9 * C * C * csize)),
        )(x, w1f, w2f)

    # H-tiled two-pass path: bounded VMEM + (N, H/tile_h) parallel grid so
    # both v7x TensorCores have work even at batch 1.
    if tile_h is None:
        tile_h = 1
        for d in range(H, 0, -1):
            if H % d == 0 and step_bytes(d) <= int(0.45 * cap):
                tile_h = d
                break
    assert H % tile_h == 0, "tile_h must divide H"
    vmem_limit = int(min(0.75 * cap,
                         max(1.5 * step_bytes(tile_h), 32 * 1024 * 1024)))
    return _residual_block_tiled(x, w1f, w2f, tile_h, vmem_limit)


# --------------------------------------------------------------------------
# Pure-JAX reference (PyTorch semantics, NHWC, biases included)
# --------------------------------------------------------------------------
def residual_block_ref(x, w1, b1, w2, b2):
    def conv(z, w, b):
        zp = jnp.pad(z, ((0, 0), (1, 1), (1, 1), (0, 0)), mode="reflect")
        y = lax.conv_general_dilated(
            zp, w, (1, 1), "VALID",
            dimension_numbers=("NHWC", "HWIO", "NHWC"))
        return y + b.reshape(1, 1, 1, -1)

    def inorm(y):
        mean = jnp.mean(y, axis=(1, 2), keepdims=True)
        var = jnp.mean(jnp.square(y - mean), axis=(1, 2), keepdims=True)
        return (y - mean) / jnp.sqrt(var + EPS)

    y = jnp.maximum(inorm(conv(x, w1, b1)), 0.0)
    y = inorm(conv(y, w2, b2))
    return x + y


if __name__ == "__main__":
    N, C, H, W = 2, 4, 16, 16  # PyTorch module input would be (N, C, H, W)
    key = jax.random.PRNGKey(0)
    kx, kw1, kb1, kw2, kb2 = jax.random.split(key, 5)

    # Input built in NCHW (PyTorch convention), transposed to NHWC for the kernel.
    x_nchw = jax.random.normal(kx, (N, C, H, W), dtype=jnp.float32)
    x = jnp.transpose(x_nchw, (0, 2, 3, 1))  # NHWC

    fan_in = C * 3 * 3
    bound = 1.0 / np.sqrt(fan_in)
    w1 = jax.random.uniform(kw1, (3, 3, C, C), jnp.float32, -bound, bound)
    b1 = jax.random.uniform(kb1, (C,), jnp.float32, -bound, bound)
    w2 = jax.random.uniform(kw2, (3, 3, C, C), jnp.float32, -bound, bound)
    b2 = jax.random.uniform(kb2, (C,), jnp.float32, -bound, bound)

    ref = jax.block_until_ready(residual_block_ref(x, w1, b1, w2, b2))

    # 1) Fused whole-image path (f32 compute) — tight tolerance.
    out = jax.block_until_ready(residual_block(x, w1, b1, w2, b2))
    np.testing.assert_allclose(np.asarray(out), np.asarray(ref),
                               rtol=2e-4, atol=2e-4)

    # 2) H-tiled two-pass path (forced) — same math via per-tile partial stats.
    out_t = jax.block_until_ready(residual_block(x, w1, b1, w2, b2, tile_h=4))
    np.testing.assert_allclose(np.asarray(out_t), np.asarray(ref),
                               rtol=2e-4, atol=2e-4)

    # 3) bf16 MXU path (f32 accumulation / stats) — loose smoke-test tolerance.
    out_bf = jax.block_until_ready(
        residual_block(x, w1, b1, w2, b2, compute_dtype=jnp.bfloat16))
    np.testing.assert_allclose(np.asarray(out_bf), np.asarray(ref),
                               rtol=0.1, atol=0.25)

    # Back to NCHW if the caller needs PyTorch layout:
    _ = jnp.transpose(out, (0, 3, 1, 2))

    print("KERNEL_OK")
</pallas_src>

<mosaic_0001>
module attributes {stable_mosaic.version = 11 : i64} {
  func.func @_resblock_fused_kernel(%arg0: i32, %arg1: memref<1x16x16x4xf32, #tpu.memory_space<vmem>>, %arg2: memref<3x12x4xf32, #tpu.memory_space<vmem>>, %arg3: memref<3x12x4xf32, #tpu.memory_space<vmem>>, %arg4: memref<1x16x16x4xf32, #tpu.memory_space<vmem>>) attributes {dimension_semantics = [#tpu.dimension_semantics<parallel>], iteration_bounds = array<i64: 2>, scalar_prefetch = 0 : i64, scratch_operands = 0 : i64, tpu.core_type = #tpu.core_type<tc>, window_params = [{transform_indices = @transform_0, window_bounds = array<i64: 1, 16, 16, 4>}, {pipeline_mode = #tpu.pipeline_mode<synchronous>, transform_indices = @transform_1, window_bounds = array<i64: 3, 12, 4>}, {pipeline_mode = #tpu.pipeline_mode<synchronous>, transform_indices = @transform_2, window_bounds = array<i64: 3, 12, 4>}, {transform_indices = @transform_3, window_bounds = array<i64: 1, 16, 16, 4>}]} {
    %c0 = arith.constant 0 : index
    %c0_0 = arith.constant 0 : index
    %c0_1 = arith.constant 0 : index
    %c0_2 = arith.constant 0 : index
    %0 = vector.load %arg1[%c0, %c0_0, %c0_1, %c0_2] : memref<1x16x16x4xf32, #tpu.memory_space<vmem>>, vector<1x16x16x4xf32>
    %1 = vector.shape_cast %0 : vector<1x16x16x4xf32> to vector<16x16x4xf32>
    %2 = vector.extract_strided_slice %1 {offsets = [1, 0, 0], sizes = [1, 16, 4], strides = [1, 1, 1]} : vector<16x16x4xf32> to vector<1x16x4xf32>
    %3 = vector.extract_strided_slice %1 {offsets = [14, 0, 0], sizes = [1, 16, 4], strides = [1, 1, 1]} : vector<16x16x4xf32> to vector<1x16x4xf32>
    %4 = tpu.concatenate %2, %1, %3 in 0 : vector<1x16x4xf32>, vector<16x16x4xf32>, vector<1x16x4xf32> -> vector<18x16x4xf32>
    %5 = vector.extract_strided_slice %4 {offsets = [0, 1, 0], sizes = [18, 1, 4], strides = [1, 1, 1]} : vector<18x16x4xf32> to vector<18x1x4xf32>
    %6 = vector.extract_strided_slice %4 {offsets = [0, 0, 0], sizes = [18, 15, 4], strides = [1, 1, 1]} : vector<18x16x4xf32> to vector<18x15x4xf32>
    %7 = tpu.concatenate %5, %6 in 1 : vector<18x1x4xf32>, vector<18x15x4xf32> -> vector<18x16x4xf32>
    %8 = vector.extract_strided_slice %4 {offsets = [0, 1, 0], sizes = [18, 15, 4], strides = [1, 1, 1]} : vector<18x16x4xf32> to vector<18x15x4xf32>
    %9 = vector.extract_strided_slice %4 {offsets = [0, 14, 0], sizes = [18, 1, 4], strides = [1, 1, 1]} : vector<18x16x4xf32> to vector<18x1x4xf32>
    %10 = tpu.concatenate %8, %9 in 1 : vector<18x15x4xf32>, vector<18x1x4xf32> -> vector<18x16x4xf32>
    %11 = vector.extract_strided_slice %7 {offsets = [0, 0, 0], sizes = [16, 16, 4], strides = [1, 1, 1]} : vector<18x16x4xf32> to vector<16x16x4xf32>
    %12 = vector.extract_strided_slice %7 {offsets = [1, 0, 0], sizes = [16, 16, 4], strides = [1, 1, 1]} : vector<18x16x4xf32> to vector<16x16x4xf32>
    %13 = vector.extract_strided_slice %7 {offsets = [2, 0, 0], sizes = [16, 16, 4], strides = [1, 1, 1]} : vector<18x16x4xf32> to vector<16x16x4xf32>
    %14 = tpu.concatenate %11, %12, %13 in 2 : vector<16x16x4xf32>, vector<16x16x4xf32>, vector<16x16x4xf32> -> vector<16x16x12xf32>
    %15 = vector.shape_cast %14 : vector<16x16x12xf32> to vector<256x12xf32>
    %c0_3 = arith.constant 0 : index
    %c0_4 = arith.constant 0 : index
    %c0_5 = arith.constant 0 : index
    %16 = vector.load %arg2[%c0_3, %c0_4, %c0_5] : memref<3x12x4xf32, #tpu.memory_space<vmem>>, vector<1x12x4xf32>
    %17 = vector.shape_cast %16 : vector<1x12x4xf32> to vector<12x4xf32>
    %cst = arith.constant dense<0.000000e+00> : vector<256x4xf32>
    %18 = tpu.matmul %15, %17, %cst {dimension_numbers = #tpu.dot_dimension_numbers<[1], [0], [0], [1], [0, 0, 1, 1], [], []>} : vector<256x12xf32>, vector<12x4xf32>, vector<256x4xf32> -> vector<256x4xf32>
    %19 = vector.extract_strided_slice %4 {offsets = [0, 0, 0], sizes = [16, 16, 4], strides = [1, 1, 1]} : vector<18x16x4xf32> to vector<16x16x4xf32>
    %20 = vector.extract_strided_slice %4 {offsets = [1, 0, 0], sizes = [16, 16, 4], strides = [1, 1, 1]} : vector<18x16x4xf32> to vector<16x16x4xf32>
    %21 = vector.extract_strided_slice %4 {offsets = [2, 0, 0], sizes = [16, 16, 4], strides = [1, 1, 1]} : vector<18x16x4xf32> to vector<16x16x4xf32>
    %22 = tpu.concatenate %19, %20, %21 in 2 : vector<16x16x4xf32>, vector<16x16x4xf32>, vector<16x16x4xf32> -> vector<16x16x12xf32>
    %23 = vector.shape_cast %22 : vector<16x16x12xf32> to vector<256x12xf32>
    %c1 = arith.constant 1 : index
    %c0_6 = arith.constant 0 : index
    %c0_7 = arith.constant 0 : index
    %24 = vector.load %arg2[%c1, %c0_6, %c0_7] : memref<3x12x4xf32, #tpu.memory_space<vmem>>, vector<1x12x4xf32>
    %25 = vector.shape_cast %24 : vector<1x12x4xf32> to vector<12x4xf32>
    %cst_8 = arith.constant dense<0.000000e+00> : vector<256x4xf32>
    %26 = tpu.matmul %23, %25, %cst_8 {dimension_numbers = #tpu.dot_dimension_numbers<[1], [0], [0], [1], [0, 0, 1, 1], [], []>} : vector<256x12xf32>, vector<12x4xf32>, vector<256x4xf32> -> vector<256x4xf32>
    %27 = arith.addf %18, %26 : vector<256x4xf32>
    %28 = vector.extract_strided_slice %10 {offsets = [0, 0, 0], sizes = [16, 16, 4], strides = [1, 1, 1]} : vector<18x16x4xf32> to vector<16x16x4xf32>
    %29 = vector.extract_strided_slice %10 {offsets = [1, 0, 0], sizes = [16, 16, 4], strides = [1, 1, 1]} : vector<18x16x4xf32> to vector<16x16x4xf32>
    %30 = vector.extract_strided_slice %10 {offsets = [2, 0, 0], sizes = [16, 16, 4], strides = [1, 1, 1]} : vector<18x16x4xf32> to vector<16x16x4xf32>
    %31 = tpu.concatenate %28, %29, %30 in 2 : vector<16x16x4xf32>, vector<16x16x4xf32>, vector<16x16x4xf32> -> vector<16x16x12xf32>
    %32 = vector.shape_cast %31 : vector<16x16x12xf32> to vector<256x12xf32>
    %c2 = arith.constant 2 : index
    %c0_9 = arith.constant 0 : index
    %c0_10 = arith.constant 0 : index
    %33 = vector.load %arg2[%c2, %c0_9, %c0_10] : memref<3x12x4xf32, #tpu.memory_space<vmem>>, vector<1x12x4xf32>
    %34 = vector.shape_cast %33 : vector<1x12x4xf32> to vector<12x4xf32>
    %cst_11 = arith.constant dense<0.000000e+00> : vector<256x4xf32>
    %35 = tpu.matmul %32, %34, %cst_11 {dimension_numbers = #tpu.dot_dimension_numbers<[1], [0], [0], [1], [0, 0, 1, 1], [], []>} : vector<256x12xf32>, vector<12x4xf32>, vector<256x4xf32> -> vector<256x4xf32>
    %36 = arith.addf %27, %35 : vector<256x4xf32>
    %cst_12 = arith.constant dense<0.000000e+00> : vector<4xf32>
    %37 = vector.multi_reduction <add>, %36, %cst_12 [0] : vector<256x4xf32> to vector<4xf32>
    %38 = vector.shape_cast %37 : vector<4xf32> to vector<1x4xf32>
    %39 = arith.mulf %36, %36 : vector<256x4xf32>
    %cst_13 = arith.constant dense<0.000000e+00> : vector<4xf32>
    %40 = vector.multi_reduction <add>, %39, %cst_13 [0] : vector<256x4xf32> to vector<4xf32>
    %41 = vector.shape_cast %40 : vector<4xf32> to vector<1x4xf32>
    %cst_14 = arith.constant 3.906250e-03 : f32
    %42 = vector.broadcast %cst_14 : f32 to vector<1x4xf32>
    %43 = arith.mulf %38, %42 : vector<1x4xf32>
    %cst_15 = arith.constant 3.906250e-03 : f32
    %44 = vector.broadcast %cst_15 : f32 to vector<1x4xf32>
    %45 = arith.mulf %41, %44 : vector<1x4xf32>
    %46 = arith.mulf %43, %43 : vector<1x4xf32>
    %47 = arith.subf %45, %46 : vector<1x4xf32>
    %cst_16 = arith.constant 0.000000e+00 : f32
    %48 = vector.broadcast %cst_16 : f32 to vector<1x4xf32>
    %49 = arith.maximumf %47, %48 : vector<1x4xf32>
    %50 = vector.broadcast %43 : vector<1x4xf32> to vector<256x4xf32>
    %51 = arith.subf %36, %50 : vector<256x4xf32>
    %cst_17 = arith.constant 9.99999974E-6 : f32
    %52 = vector.broadcast %cst_17 : f32 to vector<1x4xf32>
    %53 = arith.addf %49, %52 : vector<1x4xf32>
    %54 = math.rsqrt %53 : vector<1x4xf32>
    %55 = vector.broadcast %54 : vector<1x4xf32> to vector<256x4xf32>
    %56 = arith.mulf %51, %55 : vector<256x4xf32>
    %cst_18 = arith.constant 0.000000e+00 : f32
    %57 = vector.broadcast %cst_18 : f32 to vector<256x4xf32>
    %58 = arith.maximumf %56, %57 : vector<256x4xf32>
    %59 = vector.shape_cast %58 : vector<256x4xf32> to vector<16x16x4xf32>
    %60 = vector.extract_strided_slice %59 {offsets = [1, 0, 0], sizes = [1, 16, 4], strides = [1, 1, 1]} : vector<16x16x4xf32> to vector<1x16x4xf32>
    %61 = vector.extract_strided_slice %59 {offsets = [14, 0, 0], sizes = [1, 16, 4], strides = [1, 1, 1]} : vector<16x16x4xf32> to vector<1x16x4xf32>
    %62 = tpu.concatenate %60, %59, %61 in 0 : vector<1x16x4xf32>, vector<16x16x4xf32>, vector<1x16x4xf32> -> vector<18x16x4xf32>
    %63 = vector.extract_strided_slice %62 {offsets = [0, 1, 0], sizes = [18, 1, 4], strides = [1, 1, 1]} : vector<18x16x4xf32> to vector<18x1x4xf32>
    %64 = vector.extract_strided_slice %62 {offsets = [0, 0, 0], sizes = [18, 15, 4], strides = [1, 1, 1]} : vector<18x16x4xf32> to vector<18x15x4xf32>
    %65 = tpu.concatenate %63, %64 in 1 : vector<18x1x4xf32>, vector<18x15x4xf32> -> vector<18x16x4xf32>
    %66 = vector.extract_strided_slice %62 {offsets = [0, 1, 0], sizes = [18, 15, 4], strides = [1, 1, 1]} : vector<18x16x4xf32> to vector<18x15x4xf32>
    %67 = vector.extract_strided_slice %62 {offsets = [0, 14, 0], sizes = [18, 1, 4], strides = [1, 1, 1]} : vector<18x16x4xf32> to vector<18x1x4xf32>
    %68 = tpu.concatenate %66, %67 in 1 : vector<18x15x4xf32>, vector<18x1x4xf32> -> vector<18x16x4xf32>
    %69 = vector.extract_strided_slice %65 {offsets = [0, 0, 0], sizes = [16, 16, 4], strides = [1, 1, 1]} : vector<18x16x4xf32> to vector<16x16x4xf32>
    %70 = vector.extract_strided_slice %65 {offsets = [1, 0, 0], sizes = [16, 16, 4], strides = [1, 1, 1]} : vector<18x16x4xf32> to vector<16x16x4xf32>
    %71 = vector.extract_strided_slice %65 {offsets = [2, 0, 0], sizes = [16, 16, 4], strides = [1, 1, 1]} : vector<18x16x4xf32> to vector<16x16x4xf32>
    %72 = tpu.concatenate %69, %70, %71 in 2 : vector<16x16x4xf32>, vector<16x16x4xf32>, vector<16x16x4xf32> -> vector<16x16x12xf32>
    %73 = vector.shape_cast %72 : vector<16x16x12xf32> to vector<256x12xf32>
    %c0_19 = arith.constant 0 : index
    %c0_20 = arith.constant 0 : index
    %c0_21 = arith.constant 0 : index
    %74 = vector.load %arg3[%c0_19, %c0_20, %c0_21] : memref<3x12x4xf32, #tpu.memory_space<vmem>>, vector<1x12x4xf32>
    %75 = vector.shape_cast %74 : vector<1x12x4xf32> to vector<12x4xf32>
    %cst_22 = arith.constant dense<0.000000e+00> : vector<256x4xf32>
    %76 = tpu.matmul %73, %75, %cst_22 {dimension_numbers = #tpu.dot_dimension_numbers<[1], [0], [0], [1], [0, 0, 1, 1], [], []>} : vector<256x12xf32>, vector<12x4xf32>, vector<256x4xf32> -> vector<256x4xf32>
    %77 = vector.extract_strided_slice %62 {offsets = [0, 0, 0], sizes = [16, 16, 4], strides = [1, 1, 1]} : vector<18x16x4xf32> to vector<16x16x4xf32>
    %78 = vector.extract_strided_slice %62 {offsets = [1, 0, 0], sizes = [16, 16, 4], strides = [1, 1, 1]} : vector<18x16x4xf32> to vector<16x16x4xf32>
    %79 = vector.extract_strided_slice %62 {offsets = [2, 0, 0], sizes = [16, 16, 4], strides = [1, 1, 1]} : vector<18x16x4xf32> to vector<16x16x4xf32>
    %80 = tpu.concatenate %77, %78, %79 in 2 : vector<16x16x4xf32>, vector<16x16x4xf32>, vector<16x16x4xf32> -> vector<16x16x12xf32>
    %81 = vector.shape_cast %80 : vector<16x16x12xf32> to vector<256x12xf32>
    %c1_23 = arith.constant 1 : index
    %c0_24 = arith.constant 0 : index
    %c0_25 = arith.constant 0 : index
    %82 = vector.load %arg3[%c1_23, %c0_24, %c0_25] : memref<3x12x4xf32, #tpu.memory_space<vmem>>, vector<1x12x4xf32>
    %83 = vector.shape_cast %82 : vector<1x12x4xf32> to vector<12x4xf32>
    %cst_26 = arith.constant dense<0.000000e+00> : vector<256x4xf32>
    %84 = tpu.matmul %81, %83, %cst_26 {dimension_numbers = #tpu.dot_dimension_numbers<[1], [0], [0], [1], [0, 0, 1, 1], [], []>} : vector<256x12xf32>, vector<12x4xf32>, vector<256x4xf32> -> vector<256x4xf32>
    %85 = arith.addf %76, %84 : vector<256x4xf32>
    %86 = vector.extract_strided_slice %68 {offsets = [0, 0, 0], sizes = [16, 16, 4], strides = [1, 1, 1]} : vector<18x16x4xf32> to vector<16x16x4xf32>
    %87 = vector.extract_strided_slice %68 {offsets = [1, 0, 0], sizes = [16, 16, 4], strides = [1, 1, 1]} : vector<18x16x4xf32> to vector<16x16x4xf32>
    %88 = vector.extract_strided_slice %68 {offsets = [2, 0, 0], sizes = [16, 16, 4], strides = [1, 1, 1]} : vector<18x16x4xf32> to vector<16x16x4xf32>
    %89 = tpu.concatenate %86, %87, %88 in 2 : vector<16x16x4xf32>, vector<16x16x4xf32>, vector<16x16x4xf32> -> vector<16x16x12xf32>
    %90 = vector.shape_cast %89 : vector<16x16x12xf32> to vector<256x12xf32>
    %c2_27 = arith.constant 2 : index
    %c0_28 = arith.constant 0 : index
    %c0_29 = arith.constant 0 : index
    %91 = vector.load %arg3[%c2_27, %c0_28, %c0_29] : memref<3x12x4xf32, #tpu.memory_space<vmem>>, vector<1x12x4xf32>
    %92 = vector.shape_cast %91 : vector<1x12x4xf32> to vector<12x4xf32>
    %cst_30 = arith.constant dense<0.000000e+00> : vector<256x4xf32>
    %93 = tpu.matmul %90, %92, %cst_30 {dimension_numbers = #tpu.dot_dimension_numbers<[1], [0], [0], [1], [0, 0, 1, 1], [], []>} : vector<256x12xf32>, vector<12x4xf32>, vector<256x4xf32> -> vector<256x4xf32>
    %94 = arith.addf %85, %93 : vector<256x4xf32>
    %cst_31 = arith.constant dense<0.000000e+00> : vector<4xf32>
    %95 = vector.multi_reduction <add>, %94, %cst_31 [0] : vector<256x4xf32> to vector<4xf32>
    %96 = vector.shape_cast %95 : vector<4xf32> to vector<1x4xf32>
    %97 = arith.mulf %94, %94 : vector<256x4xf32>
    %cst_32 = arith.constant dense<0.000000e+00> : vector<4xf32>
    %98 = vector.multi_reduction <add>, %97, %cst_32 [0] : vector<256x4xf32> to vector<4xf32>
    %99 = vector.shape_cast %98 : vector<4xf32> to vector<1x4xf32>
    %cst_33 = arith.constant 3.906250e-03 : f32
    %100 = vector.broadcast %cst_33 : f32 to vector<1x4xf32>
    %101 = arith.mulf %96, %100 : vector<1x4xf32>
    %cst_34 = arith.constant 3.906250e-03 : f32
    %102 = vector.broadcast %cst_34 : f32 to vector<1x4xf32>
    %103 = arith.mulf %99, %102 : vector<1x4xf32>
    %104 = arith.mulf %101, %101 : vector<1x4xf32>
    %105 = arith.subf %103, %104 : vector<1x4xf32>
    %cst_35 = arith.constant 0.000000e+00 : f32
    %106 = vector.broadcast %cst_35 : f32 to vector<1x4xf32>
    %107 = arith.maximumf %105, %106 : vector<1x4xf32>
    %108 = vector.broadcast %101 : vector<1x4xf32> to vector<256x4xf32>
    %109 = arith.subf %94, %108 : vector<256x4xf32>
    %cst_36 = arith.constant 9.99999974E-6 : f32
    %110 = vector.broadcast %cst_36 : f32 to vector<1x4xf32>
    %111 = arith.addf %107, %110 : vector<1x4xf32>
    %112 = math.rsqrt %111 : vector<1x4xf32>
    %113 = vector.broadcast %112 : vector<1x4xf32> to vector<256x4xf32>
    %114 = arith.mulf %109, %113 : vector<256x4xf32>
    %115 = vector.shape_cast %114 : vector<256x4xf32> to vector<16x16x4xf32>
    %116 = arith.addf %1, %115 : vector<16x16x4xf32>
    %c0_37 = arith.constant 0 : index
    %c0_38 = arith.constant 0 : index
    %c0_39 = arith.constant 0 : index
    %c0_40 = arith.constant 0 : index
    %117 = vector.load %arg4[%c0_37, %c0_38, %c0_39, %c0_40] : memref<1x16x16x4xf32, #tpu.memory_space<vmem>>, vector<1x16x16x4xf32>
    %118 = vector.shape_cast %117 : vector<1x16x16x4xf32> to vector<16x16x4xf32>
    %119 = vector.shape_cast %116 : vector<16x16x4xf32> to vector<1x16x16x4xf32>
    tpu.vector_store %arg4[%c0_37, %c0_38, %c0_39, %c0_40], %119 {strides = array<i32>} : memref<1x16x16x4xf32, #tpu.memory_space<vmem>>, vector<1x16x16x4xf32>,
    return
  }
  func.func @transform_0(%arg0: i32) -> (i32, i32, i32, i32) {
    %c0_i32 = arith.constant 0 : i32
    %c0_i32_0 = arith.constant 0 : i32
    %c0_i32_1 = arith.constant 0 : i32
    %c0_i32_2 = arith.constant 0 : i32
    return %arg0, %c0_i32, %c0_i32_0, %c0_i32_1 : i32, i32, i32, i32
  }
  func.func @transform_1(%arg0: i32) -> (i32, i32, i32) {
    %c0_i32 = arith.constant 0 : i32
    %c0_i32_0 = arith.constant 0 : i32
    %c0_i32_1 = arith.constant 0 : i32
    %c0_i32_2 = arith.constant 0 : i32
    return %c0_i32, %c0_i32_0, %c0_i32_1 : i32, i32, i32
  }
  func.func @transform_2(%arg0: i32) -> (i32, i32, i32) {
    %c0_i32 = arith.constant 0 : i32
    %c0_i32_0 = arith.constant 0 : i32
    %c0_i32_1 = arith.constant 0 : i32
    %c0_i32_2 = arith.constant 0 : i32
    return %c0_i32, %c0_i32_0, %c0_i32_1 : i32, i32, i32
  }
  func.func @transform_3(%arg0: i32) -> (i32, i32, i32, i32) {
    %c0_i32 = arith.constant 0 : i32
    %c0_i32_0 = arith.constant 0 : i32
    %c0_i32_1 = arith.constant 0 : i32
    %c0_i32_2 = arith.constant 0 : i32
    return %arg0, %c0_i32, %c0_i32_0, %c0_i32_1 : i32, i32, i32, i32
  }
}

</mosaic_0001>

<bundles_post_ra>
// kernel: tpu_custom_call.1
= control target key start
LH: loop header
LB: loop body
LE: loop exit
PB: predicated region body
PF: predicated region fallthrough
CT: control target
= control target key end

     0   :  { %s5753_s12 = smov 0   ;;  %s8929_s0 = inlined_call_operand.vmem [shape: f32[2,16,16,4], index: 0, kind: input, shape index: {}]   ;;  %s8930_s1 = inlined_call_operand.vmem [shape: f32[3,12,4], index: 1, kind: input, shape index: {}]   ;;  %s8931_s2 = inlined_call_operand.vmem [shape: f32[3,12,4], index: 2, kind: input, shape index: {}]   ;;  %s8932_s3 = inlined_call_operand.vmem [shape: f32[2,16,16,4], index: 3, kind: output, shape index: {}]  }
   0x1 LB: > { %s4938_s13 = sadd.s32 4294967295, %s5729_s12   ;;  %p4942_p0 = scmp.ge.s32.totalorder %s5729_s12, 1  ;;  %s5729_s12 = sphi %s5753_s12, %s13_s12  }
   0x2   : > { %p137_p1 = scmp.lt.s32.totalorder %s5729_s12, 3 }
   0x4   : > { %p138_p2 = pnand %p4942_p0, %p137_p1 }
   0x5   : > { %p161_p3 = scmp.lt.s32.totalorder (!%p138_p2), %s4938_s13, 1  ;;  %s5731_s22 = smov (!%p138_p2), 8  }
   0x6   : > { %141 = sbr.rel (%p138_p2) target bundleno = 1498 (0x5da), region = 32  ;;  %s5732_s23 = smov (!%p138_p2), 4  }
   0xb   : > { %v4948_v0 = vld [vmem:[%s8930_s1 + $0x18] sm:$0xf]  ;;  %vm1079_vm0 = vcmask 1043456   ;;  %v4947_v1 = vld [vmem:[%s8930_s1 + $0x10] sm:$0xff]  ;;  %s8934_s13 = smov (!%p161_p3, %s4938_s13), 1  ;;  %vm661_vm1 = vcmask 31744  }
   0xc   : > { %5361 = vmatprep.subr.msk.mxu0 %vm1079_vm0, %v4948_v0  ;;  %s5155_s18 = sshll.u32 %s8934_s13, 8  ;;  %vm694_vm2 = vcmask 64512   ;;  %v728_v34 = vld [vmem:[%s8930_s1 + $0x8] sm:$0xf]  ;;  %vm982_vm3 = vcmask 97280   ;;  %v727_v38 = vld [vmem:[%s8930_s1] sm:$0xff] }
   0xd   : > { %5362 = vmatpush3.msk.msra.mxu0 %vm1079_vm0, %v4948_v0  ;;  %s5777_s21 = scalar_lea.vmem %s8929_s0, %s5155_s18  ;;  %5413 = vmatprep.subr.msk.mxu1 %vm1079_vm0, %v728_v34  ;;  %vm267_vm4 = vcmask 1040384   ;;  %v5016_v54 = vld [vmem:[%s8930_s1 + $0x28] sm:$0xf]  ;;  %v5015_v57 = vld [vmem:[%s8930_s1 + $0x20] sm:$0xff]  ;;  %vm363_vm5 = vcmask 1046528  }
   0xe   : > { %5363 = vmatprep.subr.mxu0 %v4947_v1  ;;  %v5780_v2 = vld [vmem:[%s5777_s21 + $0x10] sm:$0xff]  ;;  %v5783_v3 = vld [vmem:[%s5777_s21] sm:$0xff]  ;;  %v5790_v4 = vld [vmem:[%s5777_s21 + $0x18] sm:$0xff]  ;;  %5414 = vmatpush3.msk.msra.mxu1 %vm1079_vm0, %v728_v34 }
   0xf   : > { %5364 = vmatpush3.msra.mxu0 %v4947_v1  ;;  %825 = vrot.lane.b32.xlu1 %v5780_v2, %s5731_s22  ;;  %v5793_v5 = vld [vmem:[%s5777_s21 + $0x8] sm:$0xff]  ;;  %v5807_v7 = vld [vmem:[%s5777_s21 + $0x20] sm:$0xff]  ;;  %v5818_v8 = vld [vmem:[%s5777_s21 + $0x38] sm:$0xff]  ;;  %v271_v40 = vrot.slane %v5783_v3, 7  ;;  %v220_v42 = vrot.slane %v5783_v3, 1  ;;  %v268_v49 = vrot.slane %v5780_v2, 7 }
  0x10   : > { %729 = vrot.lane.b32.xlu0 %v5783_v3, %s5732_s23  ;;  %v5804_v6 = vld [vmem:[%s5777_s21 + $0x28] sm:$0xff]  ;;  %v5821_v9 = vld [vmem:[%s5777_s21 + $0x30] sm:$0xff]  ;;  %v5835_v11 = vld [vmem:[%s5777_s21 + $0x40] sm:$0xff]  ;;  %v272_v41 = vrot.slane %v5793_v5, 7  ;;  %5415 = vmatprep.subr.mxu1 %v727_v38  ;;  %v269_v50 = vrot.slane %v5790_v4, 7  ;;  %v219_v53 = vrot.slane %v5780_v2, 1 }
  0x11   : > { %v5832_v10 = vld [vmem:[%s5777_s21 + $0x48] sm:$0xff]  ;;  %v5846_v12 = vld [vmem:[%s5777_s21 + $0x58] sm:$0xff]  ;;  %v5849_v13 = vld [vmem:[%s5777_s21 + $0x50] sm:$0xff]  ;;  %5416 = vmatpush3.msra.mxu1 %v727_v38  ;;  %v6014_v48 = vsel %vm267_vm4, %v220_v42, %v271_v40  ;;  %v366_v56 = vrot.slane %v5793_v5, 1  ;;  %5465 = vmatprep.subr.msk.mxu0 %vm1079_vm0, %v5016_v54 }
  0x12   : > { %v5860_v14 = vld [vmem:[%s5777_s21 + $0x68] sm:$0xff]  ;;  %v5863_v15 = vld [vmem:[%s5777_s21 + $0x60] sm:$0xff]  ;;  %v5874_v16 = vld [vmem:[%s5777_s21 + $0x78] sm:$0xff]  ;;  %v6011_v47 = vsel %vm267_vm4, %v271_v40, %v272_v41  ;;  %v6027_v55 = vsel %vm267_vm4, %v268_v49, %v269_v50  ;;  %v6039_v62 = vsel %vm267_vm4, %v219_v53, %v268_v49 }
  0x13   : > { %827 = vrot.lane.b32.xlu1 %v5790_v4, %s5731_s22  ;;  %v5877_v17 = vld [vmem:[%s5777_s21 + $0x70] sm:$0xff]  ;;  %v5888_v18 = vld [vmem:[%s5777_s21 + $0x88] sm:$0xff]  ;;  %v5891_v19 = vld [vmem:[%s5777_s21 + $0x80] sm:$0xff]  ;;  %v6051_v1 = vsel %vm363_vm5, %v366_v56, %v272_v41 }
  0x14   : > { %731 = vrot.lane.b32.xlu0 %v5793_v5, %s5732_s23  ;;  %v5902_v20 = vld [vmem:[%s5777_s21 + $0x98] sm:$0xff]  ;;  %v5905_v21 = vld [vmem:[%s5777_s21 + $0x90] sm:$0xff]  ;;  %v5916_v22 = vld [vmem:[%s5777_s21 + $0xa8] sm:$0xff] }
  0x15   : > { %v5919_v23 = vld [vmem:[%s5777_s21 + $0xa0] sm:$0xff]  ;;  %v5930_v24 = vld [vmem:[%s5777_s21 + $0xb8] sm:$0xff]  ;;  %v5933_v25 = vld [vmem:[%s5777_s21 + $0xb0] sm:$0xff] }
  0x16   : > { %v5944_v26 = vld [vmem:[%s5777_s21 + $0xc8] sm:$0xff]  ;;  %v5947_v27 = vld [vmem:[%s5777_s21 + $0xc0] sm:$0xff]  ;;  %v5958_v28 = vld [vmem:[%s5777_s21 + $0xd8] sm:$0xff] }
  0x17   : > { %735 = vrot.lane.b32.xlu1 %v5790_v4, %s5732_s23  ;;  %v5961_v29 = vld [vmem:[%s5777_s21 + $0xd0] sm:$0xff]  ;;  %v5972_v30 = vld [vmem:[%s5777_s21 + $0xe8] sm:$0xff]  ;;  %v5975_v31 = vld [vmem:[%s5777_s21 + $0xe0] sm:$0xff] }
  0x18   : > { %733 = vrot.lane.b32.xlu0 %v5780_v2, %s5732_s23  ;;  %v202_v32 = vld [vmem:[%s5777_s21 + $0xf8] sm:$0xff]  ;;  %v201_v33 = vld [vmem:[%s5777_s21 + $0xf0] sm:$0xff] }
  0x1b   : > { %831 = vrot.lane.b32.xlu1 %v5804_v6, %s5731_s22 }
  0x1c   : > { %829 = vrot.lane.b32.xlu0 %v5807_v7, %s5731_s22 }
  0x1f   : > { %739 = vrot.lane.b32.xlu1 %v5804_v6, %s5732_s23 }
  0x20   : > { %737 = vrot.lane.b32.xlu0 %v5807_v7, %s5732_s23 }
  0x23   : > { %835 = vrot.lane.b32.xlu1 %v5818_v8, %s5731_s22 }
  0x24   : > { %833 = vrot.lane.b32.xlu0 %v5821_v9, %s5731_s22 }
  0x27   : > { %743 = vrot.lane.b32.xlu1 %v5818_v8, %s5732_s23 }
  0x28   : > { %741 = vrot.lane.b32.xlu0 %v5821_v9, %s5732_s23 }
  0x2b   : > { %839 = vrot.lane.b32.xlu1 %v5832_v10, %s5731_s22 }
  0x2c   : > { %837 = vrot.lane.b32.xlu0 %v5835_v11, %s5731_s22 }
  0x2f   : > { %747 = vrot.lane.b32.xlu1 %v5832_v10, %s5732_s23 }
  0x30   : > { %745 = vrot.lane.b32.xlu0 %v5835_v11, %s5732_s23 }
  0x33   : > { %843 = vrot.lane.b32.xlu1 %v5846_v12, %s5731_s22 }
  0x34   : > { %841 = vrot.lane.b32.xlu0 %v5849_v13, %s5731_s22 }
  0x37   : > { %751 = vrot.lane.b32.xlu1 %v5846_v12, %s5732_s23 }
  0x38   : > { %749 = vrot.lane.b32.xlu0 %v5849_v13, %s5732_s23 }
  0x3b   : > { %847 = vrot.lane.b32.xlu1 %v5860_v14, %s5731_s22 }
  0x3c   : > { %845 = vrot.lane.b32.xlu0 %v5863_v15, %s5731_s22 }
  0x3f   : > { %755 = vrot.lane.b32.xlu1 %v5860_v14, %s5732_s23 }
  0x40   : > { %753 = vrot.lane.b32.xlu0 %v5863_v15, %s5732_s23 }
  0x43   : > { %851 = vrot.lane.b32.xlu1 %v5874_v16, %s5731_s22 }
  0x44   : > { %849 = vrot.lane.b32.xlu0 %v5877_v17, %s5731_s22 }
  0x47   : > { %759 = vrot.lane.b32.xlu1 %v5874_v16, %s5732_s23 }
  0x48   : > { %757 = vrot.lane.b32.xlu0 %v5877_v17, %s5732_s23 }
  0x4b   : > { %855 = vrot.lane.b32.xlu1 %v5888_v18, %s5731_s22 }
  0x4c   : > { %853 = vrot.lane.b32.xlu0 %v5891_v19, %s5731_s22 }
  0x4f   : > { %763 = vrot.lane.b32.xlu1 %v5888_v18, %s5732_s23 }
  0x50   : > { %761 = vrot.lane.b32.xlu0 %v5891_v19, %s5732_s23 }
  0x53   : > { %859 = vrot.lane.b32.xlu1 %v5902_v20, %s5731_s22 }
  0x54   : > { %857 = vrot.lane.b32.xlu0 %v5905_v21, %s5731_s22 }
  0x57   : > { %767 = vrot.lane.b32.xlu1 %v5902_v20, %s5732_s23 }
  0x58   : > { %765 = vrot.lane.b32.xlu0 %v5905_v21, %s5732_s23 }
  0x5b   : > { %863 = vrot.lane.b32.xlu1 %v5916_v22, %s5731_s22 }
  0x5c   : > { %861 = vrot.lane.b32.xlu0 %v5919_v23, %s5731_s22 }
  0x5f   : > { %771 = vrot.lane.b32.xlu1 %v5916_v22, %s5732_s23 }
  0x60   : > { %769 = vrot.lane.b32.xlu0 %v5919_v23, %s5732_s23 }
  0x63   : > { %867 = vrot.lane.b32.xlu1 %v5930_v24, %s5731_s22 }
  0x64   : > { %865 = vrot.lane.b32.xlu0 %v5933_v25, %s5731_s22 }
  0x67   : > { %775 = vrot.lane.b32.xlu1 %v5930_v24, %s5732_s23 }
  0x68   : > { %773 = vrot.lane.b32.xlu0 %v5933_v25, %s5732_s23 }
  0x6b   : > { %871 = vrot.lane.b32.xlu1 %v5944_v26, %s5731_s22 }
  0x6c   : > { %869 = vrot.lane.b32.xlu0 %v5947_v27, %s5731_s22 }
  0x6f   : > { %779 = vrot.lane.b32.xlu1 %v5944_v26, %s5732_s23 }
  0x70   : > { %777 = vrot.lane.b32.xlu0 %v5947_v27, %s5732_s23 }
  0x73   : > { %875 = vrot.lane.b32.xlu1 %v5958_v28, %s5731_s22 }
  0x74   : > { %873 = vrot.lane.b32.xlu0 %v5961_v29, %s5731_s22 }
  0x77   : > { %783 = vrot.lane.b32.xlu1 %v5958_v28, %s5732_s23 }
  0x78   : > { %781 = vrot.lane.b32.xlu0 %v5961_v29, %s5732_s23 }
  0x7b   : > { %879 = vrot.lane.b32.xlu1 %v5972_v30, %s5731_s22 }
  0x7c   : > { %877 = vrot.lane.b32.xlu0 %v5975_v31, %s5731_s22 }
  0x7f   : > { %787 = vrot.lane.b32.xlu1 %v5972_v30, %s5732_s23 }
  0x80   : > { %785 = vrot.lane.b32.xlu0 %v5975_v31, %s5732_s23 }
  0x81   : > { %v826_v35 = vpop.permute.xlu1 %825 }
  0x82   : > { %v730_v36 = vpop.permute.xlu0 %729 }
  0x83   : > { %v915_v37 = vsel %vm661_vm1, %v5780_v2, %v730_v36  ;;  %883 = vrot.lane.b32.xlu1 %v202_v32, %s5731_s22 }
  0x84   : > { %881 = vrot.lane.b32.xlu0 %v201_v33, %s5731_s22  ;;  %v947_v39 = vsel %vm694_vm2, %v915_v37, %v826_v35 }
  0x85   : > { %5365 = vmatprep.mubr.msk.f32.mxu0 %vm982_vm3, %v947_v39  ;;  %v828_v43 = vpop.permute.xlu1 %827 }
  0x86   : > { %v732_v44 = vpop.permute.xlu0 %731 }
  0x87   : > { %v916_v45 = vsel %vm661_vm1, %v5790_v4, %v732_v44  ;;  %791 = vrot.lane.b32.xlu1 %v202_v32, %s5732_s23  ;;  %v6054_v32 = vsel %vm363_vm5, %v220_v42, %v366_v56  ;;  %v221_v44 = vrot.slane %v5807_v7, 1 }
  0x88   : > { %789 = vrot.lane.b32.xlu0 %v201_v33, %s5732_s23  ;;  %v948_v46 = vsel %vm694_vm2, %v916_v45, %v828_v43  ;;  %v364_v33 = vrot.slane %v5790_v4, 1 }
  0x89   : > { %5366 = vmatmul.mubr.msk.f32.vlgmr.msra.gmra.mxu0 %vm982_vm3, %v948_v46  ;;  %v736_v51 = vpop.permute.xlu1 %735 }
  0x8a   : > { %v734_v52 = vpop.permute.xlu0 %733  ;;  %v918_v58 = vsel %vm661_vm1, %v5793_v5, %v736_v51  ;;  %5466 = vmatpush3.msk.msra.mxu0 %vm1079_vm0, %v5016_v54  ;;  %v6066_v38 = vsel %vm363_vm5, %v219_v53, %v364_v33  ;;  %v6079_v43 = vsel %vm363_vm5, %v364_v33, %v269_v50 }
  0x8b   : > { %477 = vrot.lane.b32.xlu1 %v6011_v47, %s5732_s23  ;;  %v917_v59 = vsel %vm661_vm1, %v5783_v3, %v734_v52  ;;  %5467 = vmatprep.subr.mxu0 %v5015_v57 }
  0x8c   : > { %475 = vrot.lane.b32.xlu0 %v6014_v48, %s5732_s23  ;;  %5468 = vmatpush3.msra.mxu0 %v5015_v57  ;;  %v368_v57 = vrot.slane %v5804_v6, 1 }
  0x8d   : > { %v832_v60 = vpop.permute.xlu1 %831 }
  0x8e   : > { %v830_v61 = vpop.permute.xlu0 %829  ;;  %v950_v63 = vsel %vm694_vm2, %v918_v58, %v832_v60 }
  0x8f   : > { %v949_v0 = vsel %vm694_vm2, %v917_v59, %v830_v61  ;;  %573 = vrot.lane.b32.xlu1 %v6027_v55, %s5731_s22 }
  0x90   : > { %5368 = vmatprep.mubr.msk.f32.mxu0 %vm982_vm3, %v949_v0  ;;  %571 = vrot.lane.b32.xlu0 %v6039_v62, %s5731_s22 }
  0x91   : > { %5369 = vmatmul.mubr.msk.f32.gmra.mxu0 %vm982_vm3, %v950_v63  ;;  %v740_v3 = vpop.permute.xlu1 %739  ;;  %v6114_v63 = vsel %vm363_vm5, %v221_v44, %v368_v57 }
  0x92   : > { %v738_v5 = vpop.permute.xlu0 %737  ;;  %v920_v34 = vsel %vm661_vm1, %v5790_v4, %v740_v3  ;;  %v275_v4 = vrot.slane %v5804_v6, 7  ;;  %v277_v3 = vrot.slane %v5821_v9, 7 }
  0x93   : > { %1650 = vrot.lane.b32.xlu1 %v6051_v1, %s5732_s23  ;;  %v919_v35 = vsel %vm661_vm1, %v5780_v2, %v738_v5  ;;  %v274_v2 = vrot.slane %v5807_v7, 7  ;;  %v278_v5 = vrot.slane %v5818_v8, 7 }
  0x94   : > { %1648 = vrot.lane.b32.xlu0 %v6054_v32, %s5732_s23 }
  0x95   : > { %v836_v36 = vpop.permute.xlu1 %835  ;;  %v6087_v45 = vsel %vm267_vm4, %v274_v2, %v275_v4  ;;  %v6094_v52 = vsel %vm267_vm4, %v221_v44, %v274_v2 }
  0x96   : > { %v834_v37 = vpop.permute.xlu0 %833  ;;  %v952_v39 = vsel %vm694_vm2, %v920_v34, %v836_v36  ;;  %v222_v36 = vrot.slane %v5821_v9, 1 }
  0x97   : > { %v951_v40 = vsel %vm694_vm2, %v919_v35, %v834_v37  ;;  %479 = vrot.lane.b32.xlu1 %v6039_v62, %s5732_s23  ;;  %v6127_v35 = vsel %vm363_vm5, %v368_v57, %v275_v4  ;;  %v6135_v37 = vsel %vm267_vm4, %v277_v3, %v278_v5  ;;  %v280_v57 = vrot.slane %v5835_v11, 7 }
  0x98   : > { %5371 = vmatprep.mubr.msk.f32.mxu0 %vm982_vm3, %v951_v40  ;;  %1744 = vrot.lane.b32.xlu0 %v6066_v38, %s5731_s22 }
  0x99   : > { %5372 = vmatmul.mubr.msk.f32.gmra.mxu0 %vm982_vm3, %v952_v39  ;;  %v744_v41 = vpop.permute.xlu1 %743 }
  0x9a   : > { %v742_v42 = vpop.permute.xlu0 %741  ;;  %v922_v46 = vsel %vm661_vm1, %v5804_v6, %v744_v41  ;;  %v6142_v41 = vsel %vm267_vm4, %v222_v36, %v277_v3 }
  0x9b   : > { %481 = vrot.lane.b32.xlu1 %v6027_v55, %s5732_s23  ;;  %v921_v49 = vsel %vm661_vm1, %v5807_v7, %v742_v42 }
  0x9c   : > { %1746 = vrot.lane.b32.xlu0 %v6079_v43, %s5731_s22 }
  0x9d   : > { %v840_v51 = vpop.permute.xlu1 %839 }
  0x9e   : > { %v838_v50 = vpop.permute.xlu0 %837  ;;  %v954_v53 = vsel %vm694_vm2, %v922_v46, %v840_v51 }
  0x9f   : > { %v953_v54 = vsel %vm694_vm2, %v921_v49, %v838_v50  ;;  %577 = vrot.lane.b32.xlu1 %v6087_v45, %s5731_s22  ;;  %v370_v49 = vrot.slane %v5818_v8, 1 }
  0xa0   : > { %5374 = vmatprep.mubr.msk.f32.mxu0 %vm982_vm3, %v953_v54  ;;  %575 = vrot.lane.b32.xlu0 %v6094_v52, %s5731_s22 }
  0xa1   : > { %5375 = vmatmul.mubr.msk.f32.gmra.mxu0 %vm982_vm3, %v954_v53  ;;  %v748_v7 = vpop.permute.xlu1 %747 }
  0xa2   : > { %v746_v56 = vpop.permute.xlu0 %745  ;;  %v924_v58 = vsel %vm661_vm1, %v5818_v8, %v748_v7  ;;  %v6162_v7 = vsel %vm363_vm5, %v222_v36, %v370_v49 }
  0xa3   : > { %1654 = vrot.lane.b32.xlu1 %v6079_v43, %s5732_s23  ;;  %v923_v59 = vsel %vm661_vm1, %v5821_v9, %v746_v56 }
  0xa4   : > { %1652 = vrot.lane.b32.xlu0 %v6066_v38, %s5732_s23 }
  0xa5   : > { %v844_v60 = vpop.permute.xlu1 %843 }
  0xa6   : > { %v842_v61 = vpop.permute.xlu0 %841  ;;  %v956_v0 = vsel %vm694_vm2, %v924_v58, %v844_v60  ;;  %v281_v58 = vrot.slane %v5832_v10, 7 }
  0xa7   : > { %v955_v6 = vsel %vm694_vm2, %v923_v59, %v842_v61  ;;  %483 = vrot.lane.b32.xlu1 %v6094_v52, %s5732_s23  ;;  %v6175_v61 = vsel %vm363_vm5, %v370_v49, %v278_v5 }
  0xa8   : > { %5377 = vmatprep.mubr.msk.f32.mxu0 %vm982_vm3, %v955_v6  ;;  %1748 = vrot.lane.b32.xlu0 %v6114_v63, %s5731_s22  ;;  %v6183_v6 = vsel %vm267_vm4, %v280_v57, %v281_v58 }
  0xa9   : > { %5378 = vmatmul.mubr.msk.f32.gmra.mxu0 %vm982_vm3, %v956_v0  ;;  %v752_v33 = vpop.permute.xlu1 %751  ;;  %v223_v0 = vrot.slane %v5835_v11, 1 }
  0xaa   : > { %v750_v34 = vpop.permute.xlu0 %749  ;;  %v926_v39 = vsel %vm661_vm1, %v5832_v10, %v752_v33 }
  0xab   : > { %485 = vrot.lane.b32.xlu1 %v6087_v45, %s5732_s23  ;;  %v925_v40 = vsel %vm661_vm1, %v5835_v11, %v750_v34  ;;  %v6190_v36 = vsel %vm267_vm4, %v223_v0, %v280_v57  ;;  %v224_v57 = vrot.slane %v5849_v13, 1 }
  0xac   : > { %1750 = vrot.lane.b32.xlu0 %v6127_v35, %s5731_s22 }
  0xad   : > { %v848_v2 = vpop.permute.xlu1 %847 }
  0xae   : > { %v846_v4 = vpop.permute.xlu0 %845  ;;  %v958_v9 = vsel %vm694_vm2, %v926_v39, %v848_v2 }
  0xaf   : > { %v957_v42 = vsel %vm694_vm2, %v925_v40, %v846_v4  ;;  %581 = vrot.lane.b32.xlu1 %v6135_v37, %s5731_s22  ;;  %v372_v4 = vrot.slane %v5832_v10, 1 }
  0xb0   : > { %5380 = vmatprep.mubr.msk.f32.mxu0 %vm982_vm3, %v957_v42  ;;  %579 = vrot.lane.b32.xlu0 %v6142_v41, %s5731_s22 }
  0xb1   : > { %5381 = vmatmul.mubr.msk.f32.gmra.mxu0 %vm982_vm3, %v958_v9  ;;  %v756_v44 = vpop.permute.xlu1 %755  ;;  %v6210_v49 = vsel %vm363_vm5, %v223_v0, %v372_v4 }
  0xb2   : > { %v754_v46 = vpop.permute.xlu0 %753  ;;  %v928_v51 = vsel %vm661_vm1, %v5846_v12, %v756_v44 }
  0xb3   : > { %1658 = vrot.lane.b32.xlu1 %v6127_v35, %s5732_s23  ;;  %v927_v50 = vsel %vm661_vm1, %v5849_v13, %v754_v46 }
  0xb4   : > { %1656 = vrot.lane.b32.xlu0 %v6114_v63, %s5732_s23 }
  0xb5   : > { %v852_v53 = vpop.permute.xlu1 %851 }
  0xb6   : > { %v850_v54 = vpop.permute.xlu0 %849  ;;  %v960_v56 = vsel %vm694_vm2, %v928_v51, %v852_v53  ;;  %v284_v53 = vrot.slane %v5846_v12, 7 }
  0xb7   : > { %v959_v8 = vsel %vm694_vm2, %v927_v50, %v850_v54  ;;  %487 = vrot.lane.b32.xlu1 %v6142_v41, %s5732_s23  ;;  %v283_v50 = vrot.slane %v5849_v13, 7 }
  0xb8   : > { %5383 = vmatprep.mubr.msk.f32.mxu0 %vm982_vm3, %v959_v8  ;;  %1752 = vrot.lane.b32.xlu0 %v6162_v7, %s5731_s22  ;;  %v6223_v8 = vsel %vm363_vm5, %v372_v4, %v281_v58 }
  0xb9   : > { %5384 = vmatmul.mubr.msk.f32.gmra.mxu0 %vm982_vm3, %v960_v56  ;;  %v760_v59 = vpop.permute.xlu1 %759 }
  0xba   : > { %v758_v60 = vpop.permute.xlu0 %757  ;;  %v930_v3 = vsel %vm661_vm1, %v5860_v14, %v760_v59  ;;  %v6231_v59 = vsel %vm267_vm4, %v283_v50, %v284_v53 }
  0xbb   : > { %489 = vrot.lane.b32.xlu1 %v6135_v37, %s5732_s23  ;;  %v929_v33 = vsel %vm661_vm1, %v5863_v15, %v758_v60 }
  0xbc   : > { %1754 = vrot.lane.b32.xlu0 %v6175_v61, %s5731_s22 }
  0xbd   : > { %v856_v34 = vpop.permute.xlu1 %855 }
  0xbe   : > { %v854_v5 = vpop.permute.xlu0 %853  ;;  %v962_v11 = vsel %vm694_vm2, %v930_v3, %v856_v34 }
  0xbf   : > { %v961_v39 = vsel %vm694_vm2, %v929_v33, %v854_v5  ;;  %585 = vrot.lane.b32.xlu1 %v6183_v6, %s5731_s22  ;;  %v6238_v33 = vsel %vm267_vm4, %v224_v57, %v283_v50 }
  0xc0   : > { %5386 = vmatprep.mubr.msk.f32.mxu0 %vm982_vm3, %v961_v39  ;;  %583 = vrot.lane.b32.xlu0 %v6190_v36, %s5731_s22  ;;  %v374_v39 = vrot.slane %v5846_v12, 1 }
  0xc1   : > { %5387 = vmatmul.mubr.msk.f32.gmra.mxu0 %vm982_vm3, %v962_v11  ;;  %v764_v40 = vpop.permute.xlu1 %763 }
  0xc2   : > { %v762_v2 = vpop.permute.xlu0 %761  ;;  %v932_v9 = vsel %vm661_vm1, %v5874_v16, %v764_v40 }
  0xc3   : > { %1662 = vrot.lane.b32.xlu1 %v6175_v61, %s5732_s23  ;;  %v931_v42 = vsel %vm661_vm1, %v5877_v17, %v762_v2 }
  0xc4   : > { %1660 = vrot.lane.b32.xlu0 %v6162_v7, %s5732_s23 }
  0xc5   : > { %v860_v44 = vpop.permute.xlu1 %859 }
  0xc6   : > { %v858_v46 = vpop.permute.xlu0 %857  ;;  %v964_v51 = vsel %vm694_vm2, %v932_v9, %v860_v44 }
  0xc7   : > { %v963_v10 = vsel %vm694_vm2, %v931_v42, %v858_v46  ;;  %491 = vrot.lane.b32.xlu1 %v6190_v36, %s5732_s23  ;;  %v6258_v42 = vsel %vm363_vm5, %v224_v57, %v374_v39  ;;  %v286_v46 = vrot.slane %v5863_v15, 7 }
  0xc8   : > { %5389 = vmatprep.mubr.msk.f32.mxu0 %vm982_vm3, %v963_v10  ;;  %1756 = vrot.lane.b32.xlu0 %v6210_v49, %s5731_s22 }
  0xc9   : > { %5390 = vmatmul.mubr.msk.f32.gmra.mxu0 %vm982_vm3, %v964_v51  ;;  %v768_v54 = vpop.permute.xlu1 %767  ;;  %v287_v51 = vrot.slane %v5860_v14, 7 }
  0xca   : > { %v766_v56 = vpop.permute.xlu0 %765  ;;  %v934_v60 = vsel %vm661_vm1, %v5888_v18, %v768_v54  ;;  %v6271_v54 = vsel %vm363_vm5, %v374_v39, %v284_v53 }
  0xcb   : > { %493 = vrot.lane.b32.xlu1 %v6183_v6, %s5732_s23  ;;  %v933_v0 = vsel %vm661_vm1, %v5891_v19, %v766_v56  ;;  %v225_v56 = vrot.slane %v5863_v15, 1  ;;  %v6279_v57 = vsel %vm267_vm4, %v286_v46, %v287_v51 }
  0xcc   : > { %1758 = vrot.lane.b32.xlu0 %v6223_v8, %s5731_s22 }
  0xcd   : > { %v864_v3 = vpop.permute.xlu1 %863 }
  0xce   : > { %v862_v58 = vpop.permute.xlu0 %861  ;;  %v966_v13 = vsel %vm694_vm2, %v934_v60, %v864_v3 }
  0xcf   : > { %v965_v34 = vsel %vm694_vm2, %v933_v0, %v862_v58  ;;  %589 = vrot.lane.b32.xlu1 %v6231_v59, %s5731_s22  ;;  %v6286_v58 = vsel %vm267_vm4, %v225_v56, %v286_v46  ;;  %v290_v46 = vrot.slane %v5874_v16, 7 }
  0xd0   : > { %5392 = vmatprep.mubr.msk.f32.mxu0 %vm982_vm3, %v965_v34  ;;  %587 = vrot.lane.b32.xlu0 %v6238_v33, %s5731_s22 }
  0xd1   : > { %5393 = vmatmul.mubr.msk.f32.gmra.mxu0 %vm982_vm3, %v966_v13  ;;  %v772_v5 = vpop.permute.xlu1 %771 }
  0xd2   : > { %v770_v11 = vpop.permute.xlu0 %769  ;;  %v936_v40 = vsel %vm661_vm1, %v5902_v20, %v772_v5 }
  0xd3   : > { %1666 = vrot.lane.b32.xlu1 %v6223_v8, %s5732_s23  ;;  %v935_v2 = vsel %vm661_vm1, %v5905_v21, %v770_v11  ;;  %v376_v11 = vrot.slane %v5860_v14, 1 }
  0xd4   : > { %1664 = vrot.lane.b32.xlu0 %v6210_v49, %s5732_s23 }
  0xd5   : > { %v868_v4 = vpop.permute.xlu1 %867 }
  0xd6   : > { %v866_v9 = vpop.permute.xlu0 %865  ;;  %v968_v44 = vsel %vm694_vm2, %v936_v40, %v868_v4 }
  0xd7   : > { %v967_v12 = vsel %vm694_vm2, %v935_v2, %v866_v9  ;;  %495 = vrot.lane.b32.xlu1 %v6238_v33, %s5732_s23  ;;  %v6306_v9 = vsel %vm363_vm5, %v225_v56, %v376_v11  ;;  %v6319_v56 = vsel %vm363_vm5, %v376_v11, %v287_v51 }
  0xd8   : > { %5395 = vmatprep.mubr.msk.f32.mxu0 %vm982_vm3, %v967_v12  ;;  %1760 = vrot.lane.b32.xlu0 %v6258_v42, %s5731_s22  ;;  %v289_v12 = vrot.slane %v5877_v17, 7 }
  0xd9   : > { %5396 = vmatmul.mubr.msk.f32.gmra.mxu0 %vm982_vm3, %v968_v44  ;;  %v776_v10 = vpop.permute.xlu1 %775 }
  0xda   : > { %v774_v50 = vpop.permute.xlu0 %773  ;;  %v938_v60 = vsel %vm661_vm1, %v5916_v22, %v776_v10 }
  0xdb   : > { %497 = vrot.lane.b32.xlu1 %v6231_v59, %s5732_s23  ;;  %v937_v0 = vsel %vm661_vm1, %v5919_v23, %v774_v50 }
  0xdc   : > { %1762 = vrot.lane.b32.xlu0 %v6271_v54, %s5731_s22 }
  0xdd   : > { %v872_v3 = vpop.permute.xlu1 %871 }
  0xde   : > { %v870_v53 = vpop.permute.xlu0 %869  ;;  %v970_v15 = vsel %vm694_vm2, %v938_v60, %v872_v3  ;;  %v226_v60 = vrot.slane %v5877_v17, 1 }
  0xdf   : > { %v969_v13 = vsel %vm694_vm2, %v937_v0, %v870_v53  ;;  %593 = vrot.lane.b32.xlu1 %v6279_v57, %s5731_s22  ;;  %v6327_v0 = vsel %vm267_vm4, %v289_v12, %v290_v46 }
  0xe0   : > { %5398 = vmatprep.mubr.msk.f32.mxu0 %vm982_vm3, %v969_v13  ;;  %591 = vrot.lane.b32.xlu0 %v6286_v58, %s5731_s22  ;;  %v6334_v13 = vsel %vm267_vm4, %v226_v60, %v289_v12 }
  0xe1   : > { %5399 = vmatmul.mubr.msk.f32.gmra.mxu0 %vm982_vm3, %v970_v15  ;;  %v780_v34 = vpop.permute.xlu1 %779 }
  0xe2   : > { %v778_v5 = vpop.permute.xlu0 %777  ;;  %v940_v39 = vsel %vm661_vm1, %v5930_v24, %v780_v34 }
  0xe3   : > { %1670 = vrot.lane.b32.xlu1 %v6271_v54, %s5732_s23  ;;  %v939_v40 = vsel %vm661_vm1, %v5933_v25, %v778_v5 }
  0xe4   : > { %1668 = vrot.lane.b32.xlu0 %v6258_v42, %s5732_s23 }
  0xe5   : > { %v876_v2 = vpop.permute.xlu1 %875 }
  0xe6   : > { %v874_v4 = vpop.permute.xlu0 %873  ;;  %v972_v44 = vsel %vm694_vm2, %v940_v39, %v876_v2  ;;  %v378_v39 = vrot.slane %v5874_v16, 1 }
  0xe7   : > { %v971_v14 = vsel %vm694_vm2, %v939_v40, %v874_v4  ;;  %499 = vrot.lane.b32.xlu1 %v6286_v58, %s5732_s23 }
  0xe8   : > { %5401 = vmatprep.mubr.msk.f32.mxu0 %vm982_vm3, %v971_v14  ;;  %1764 = vrot.lane.b32.xlu0 %v6306_v9, %s5731_s22  ;;  %v6354_v14 = vsel %vm363_vm5, %v226_v60, %v378_v39 }
  0xe9   : > { %5402 = vmatmul.mubr.msk.f32.gmra.mxu0 %vm982_vm3, %v972_v44  ;;  %v784_v10 = vpop.permute.xlu1 %783 }
  0xea   : > { %v782_v50 = vpop.permute.xlu0 %781  ;;  %v942_v3 = vsel %vm661_vm1, %v5944_v26, %v784_v10  ;;  %v292_v10 = vrot.slane %v5891_v19, 7 }
  0xeb   : > { %501 = vrot.lane.b32.xlu1 %v6279_v57, %s5732_s23  ;;  %v941_v53 = vsel %vm661_vm1, %v5947_v27, %v782_v50  ;;  %v293_v50 = vrot.slane %v5888_v18, 7 }
  0xec   : > { %1766 = vrot.lane.b32.xlu0 %v6319_v56, %s5731_s22 }
  0xed   : > { %v880_v15 = vpop.permute.xlu1 %879 }
  0xee   : > { %v878_v51 = vpop.permute.xlu0 %877  ;;  %v974_v34 = vsel %vm694_vm2, %v942_v3, %v880_v15 }
  0xef   : > { %v973_v17 = vsel %vm694_vm2, %v941_v53, %v878_v51  ;;  %597 = vrot.lane.b32.xlu1 %v6327_v0, %s5731_s22  ;;  %v6367_v53 = vsel %vm363_vm5, %v378_v39, %v290_v46  ;;  %v380_v39 = vrot.slane %v5888_v18, 1 }
  0xf0   : > { %5404 = vmatprep.mubr.msk.f32.mxu0 %vm982_vm3, %v973_v17  ;;  %595 = vrot.lane.b32.xlu0 %v6334_v13, %s5731_s22  ;;  %v227_v17 = vrot.slane %v5891_v19, 1  ;;  %v6382_v19 = vsel %vm267_vm4, %v292_v10, %v293_v50 }
  0xf1   : > { %5405 = vmatmul.mubr.msk.f32.gmra.mxu0 %vm982_vm3, %v974_v34  ;;  %v788_v5 = vpop.permute.xlu1 %787 }
  0xf2   : > { %v786_v11 = vpop.permute.xlu0 %785  ;;  %v944_v40 = vsel %vm661_vm1, %v5958_v28, %v788_v5  ;;  %v6406_v18 = vsel %vm363_vm5, %v227_v17, %v380_v39 }
  0xf3   : > { %1674 = vrot.lane.b32.xlu1 %v6319_v56, %s5732_s23  ;;  %v943_v2 = vsel %vm661_vm1, %v5961_v29, %v786_v11 }
  0xf4   : > { %1672 = vrot.lane.b32.xlu0 %v6306_v9, %s5732_s23 }
  0xf5   : > { %v884_v4 = vpop.permute.xlu1 %883 }
  0xf6   : > { %v882_v44 = vpop.permute.xlu0 %881  ;;  %v976_v12 = vsel %vm694_vm2, %v944_v40, %v884_v4 }
  0xf7   : > { %v975_v16 = vsel %vm694_vm2, %v943_v2, %v882_v44  ;;  %503 = vrot.lane.b32.xlu1 %v6334_v13, %s5732_s23 }
  0xf8   : > { %5407 = vmatprep.mubr.msk.f32.mxu0 %vm982_vm3, %v975_v16  ;;  %1768 = vrot.lane.b32.xlu0 %v6354_v14, %s5731_s22 }
  0xf9   : > { %5408 = vmatmul.mubr.msk.f32.gmra.mxu0 %vm982_vm3, %v976_v12  ;;  %v792_v60 = vpop.permute.xlu1 %791 }
  0xfa   : > { %v790_v3 = vpop.permute.xlu0 %789  ;;  %v946_v34 = vsel %vm661_vm1, %v5972_v30, %v792_v60  ;;  %v295_v60 = vrot.slane %v5905_v21, 7 }
  0xfb   : > { %v945_v5 = vsel %vm661_vm1, %v5975_v31, %v790_v3  ;;  %505 = vrot.lane.b32.xlu1 %v6327_v0, %s5732_s23  ;;  %v978_v40 = vsel %vm694_vm2, %v946_v34, %v880_v15  ;;  %v6386_v31 = vsel %vm267_vm4, %v227_v17, %v292_v10  ;;  %v296_v3 = vrot.slane %v5902_v20, 7 }
  0xfc   : > { %v977_v11 = vsel %vm694_vm2, %v945_v5, %v878_v51  ;;  %1770 = vrot.lane.b32.xlu0 %v6367_v53, %s5731_s22  ;;  %v6415_v5 = vsel %vm363_vm5, %v380_v39, %v293_v50 }
  0xfd   : > { %5410 = vmatprep.mubr.msk.f32.mxu0 %vm982_vm3, %v977_v11  ;;  %v478_v30 = vpop.permute.xlu1 %477  ;;  %v228_v11 = vrot.slane %v5905_v21, 1 }
  0xfe   : > { %5411 = vmatmul.mubr.msk.f32.gmra.mxu0 %vm982_vm3, %v978_v40  ;;  %v476_v46 = vpop.permute.xlu0 %475  ;;  %v663_v15 = vsel %vm661_vm1, %v6027_v55, %v478_v30 }
  0xff   : > { %601 = vrot.lane.b32.xlu1 %v6382_v19, %s5731_s22  ;;  %v662_v2 = vsel %vm661_vm1, %v6039_v62, %v476_v46  ;;  %v6427_v46 = vsel %vm267_vm4, %v295_v60, %v296_v3  ;;  %v6430_v21 = vsel %vm267_vm4, %v228_v11, %v295_v60 }
 0x100   : > { %599 = vrot.lane.b32.xlu0 %v6386_v31, %s5731_s22 }
 0x101   : > { %v574_v51 = vpop.permute.xlu1 %573 }
 0x102   : > { %v696_v4 = vsel %vm694_vm2, %v663_v15, %v574_v51  ;;  %v572_v44 = vpop.permute.xlu0 %571 }
 0x103   : > { %1678 = vrot.lane.b32.xlu1 %v6367_v53, %s5732_s23  ;;  %v695_v12 = vsel %vm694_vm2, %v662_v2, %v572_v44  ;;  %v382_v44 = vrot.slane %v5902_v20, 1 }
 0x104   : > { %1676 = vrot.lane.b32.xlu0 %v6354_v14, %s5732_s23  ;;  %5417 = vmatprep.mubr.msk.f32.mxu1 %vm982_vm3, %v695_v12 }
 0x105   : > { %5418 = vmatmul.mubr.msk.f32.vlgmr.msra.gmra.mxu1 %vm982_vm3, %v696_v4  ;;  %v1651_v16 = vpop.permute.xlu1 %1650  ;;  %v6454_v20 = vsel %vm363_vm5, %v228_v11, %v382_v44 }
 0x106   : > { %v1649_v10 = vpop.permute.xlu0 %1648  ;;  %v1835_v15 = vsel %vm661_vm1, %v6079_v43, %v1651_v16 }
 0x107   : > { %507 = vrot.lane.b32.xlu1 %v6386_v31, %s5732_s23  ;;  %v1834_v17 = vsel %vm661_vm1, %v6066_v38, %v1649_v10 }
 0x108   : > { %1772 = vrot.lane.b32.xlu0 %v6406_v18, %s5731_s22 }
 0x109   : > { %v480_v34 = vpop.permute.xlu1 %479 }
 0x10a   : > { %v1745_v40 = vpop.permute.xlu0 %1744  ;;  %v664_v12 = vsel %vm661_vm1, %v6014_v48, %v480_v34  ;;  %v298_v34 = vrot.slane %v5919_v23, 7 }
 0x10b   : > { %v1866_v30 = vsel %vm694_vm2, %v1834_v17, %v1745_v40  ;;  %509 = vrot.lane.b32.xlu1 %v6382_v19, %s5732_s23  ;;  %v299_v17 = vrot.slane %v5916_v22, 7 }
 0x10c   : > { %1774 = vrot.lane.b32.xlu0 %v6415_v5, %s5731_s22  ;;  %5469 = vmatprep.mubr.msk.f32.mxu0 %vm982_vm3, %v1866_v30  ;;  %v6463_v30 = vsel %vm363_vm5, %v382_v44, %v296_v3 }
 0x10d   : > { %v482_v50 = vpop.permute.xlu1 %481 }
 0x10e   : > { %v1747_v51 = vpop.permute.xlu0 %1746  ;;  %v665_v2 = vsel %vm661_vm1, %v6011_v47, %v482_v50  ;;  %v229_v50 = vrot.slane %v5919_v23, 1 }
 0x10f   : > { %v1867_v39 = vsel %vm694_vm2, %v1835_v15, %v1747_v51  ;;  %605 = vrot.lane.b32.xlu1 %v6427_v46, %s5731_s22 }
 0x110   : > { %603 = vrot.lane.b32.xlu0 %v6430_v21, %s5731_s22  ;;  %5470 = vmatmul.mubr.msk.f32.vlgmr.msra.gmra.mxu0 %vm982_vm3, %v1867_v39  ;;  %v6475_v39 = vsel %vm267_vm4, %v298_v34, %v299_v17  ;;  %v6478_v23 = vsel %vm267_vm4, %v229_v50, %v298_v34  ;;  %v302_v34 = vrot.slane %v5930_v24, 7 }
 0x111   : > { %v578_v4 = vpop.permute.xlu1 %577 }
 0x112   : > { %v698_v16 = vsel %vm694_vm2, %v665_v2, %v578_v4  ;;  %v576_v10 = vpop.permute.xlu0 %575 }
 0x113   : > { %v697_v60 = vsel %vm694_vm2, %v664_v12, %v576_v10  ;;  %1682 = vrot.lane.b32.xlu1 %v6415_v5, %s5732_s23 }
 0x114   : > { %1680 = vrot.lane.b32.xlu0 %v6406_v18, %s5732_s23  ;;  %5420 = vmatprep.mubr.msk.f32.mxu1 %vm982_vm3, %v697_v60 }
 0x115   : > { %5421 = vmatmul.mubr.msk.f32.gmra.mxu1 %vm982_vm3, %v698_v16  ;;  %v1655_v47 = vpop.permute.xlu1 %1654  ;;  %v384_v16 = vrot.slane %v5916_v22, 1 }
 0x116   : > { %v1653_v48 = vpop.permute.xlu0 %1652 }
 0x117   : > { %511 = vrot.lane.b32.xlu1 %v6430_v21, %s5732_s23  ;;  %v1836_v11 = vsel %vm661_vm1, %v6054_v32, %v1653_v48  ;;  %v1837_v32 = vsel %vm661_vm1, %v6051_v1, %v1655_v47  ;;  %v6502_v22 = vsel %vm363_vm5, %v229_v50, %v384_v16  ;;  %v301_v48 = vrot.slane %v5933_v25, 7 }
 0x118   : > { %1776 = vrot.lane.b32.xlu0 %v6454_v20, %s5731_s22 }
 0x119   : > { %v484_v40 = vpop.permute.xlu1 %483 }
 0x11a   : > { %v1749_v15 = vpop.permute.xlu0 %1748  ;;  %v666_v1 = vsel %vm661_vm1, %v6039_v62, %v484_v40 }
 0x11b   : > { %v1868_v51 = vsel %vm694_vm2, %v1836_v11, %v1749_v15  ;;  %513 = vrot.lane.b32.xlu1 %v6427_v46, %s5732_s23  ;;  %v6511_v11 = vsel %vm363_vm5, %v384_v16, %v299_v17  ;;  %v230_v15 = vrot.slane %v5933_v25, 1  ;;  %v386_v16 = vrot.slane %v5930_v24, 1 }
 0x11c   : > { %1778 = vrot.lane.b32.xlu0 %v6463_v30, %s5731_s22  ;;  %5472 = vmatprep.mubr.msk.f32.mxu0 %vm982_vm3, %v1868_v51 }
 0x11d   : > { %v486_v3 = vpop.permute.xlu1 %485  ;;  %v6526_v25 = vsel %vm267_vm4, %v230_v15, %v301_v48  ;;  %v6550_v24 = vsel %vm363_vm5, %v230_v15, %v386_v16 }
 0x11e   : > { %v1751_v2 = vpop.permute.xlu0 %1750  ;;  %v667_v44 = vsel %vm661_vm1, %v6027_v55, %v486_v3 }
 0x11f   : > { %v1869_v4 = vsel %vm694_vm2, %v1837_v32, %v1751_v2  ;;  %609 = vrot.lane.b32.xlu1 %v6475_v39, %s5731_s22  ;;  %v6523_v32 = vsel %vm267_vm4, %v301_v48, %v302_v34  ;;  %v6559_v48 = vsel %vm363_vm5, %v386_v16, %v302_v34 }
 0x120   : > { %607 = vrot.lane.b32.xlu0 %v6478_v23, %s5731_s22  ;;  %5473 = vmatmul.mubr.msk.f32.gmra.mxu0 %vm982_vm3, %v1869_v4 }
 0x121   : > { %v582_v12 = vpop.permute.xlu1 %581 }
 0x122   : > { %v700_v10 = vsel %vm694_vm2, %v667_v44, %v582_v12  ;;  %v580_v60 = vpop.permute.xlu0 %579 }
 0x123   : > { %v699_v47 = vsel %vm694_vm2, %v666_v1, %v580_v60  ;;  %1686 = vrot.lane.b32.xlu1 %v6463_v30, %s5732_s23 }
 0x124   : > { %1684 = vrot.lane.b32.xlu0 %v6454_v20, %s5732_s23  ;;  %5423 = vmatprep.mubr.msk.f32.mxu1 %vm982_vm3, %v699_v47  ;;  %v304_v47 = vrot.slane %v5947_v27, 7 }
 0x125   : > { %5424 = vmatmul.mubr.msk.f32.gmra.mxu1 %vm982_vm3, %v700_v10  ;;  %v1659_v55 = vpop.permute.xlu1 %1658 }
 0x126   : > { %v1657_v62 = vpop.permute.xlu0 %1656 }
 0x127   : > { %515 = vrot.lane.b32.xlu1 %v6478_v23, %s5732_s23  ;;  %v1838_v50 = vsel %vm661_vm1, %v6066_v38, %v1657_v62  ;;  %v1839_v38 = vsel %vm661_vm1, %v6079_v43, %v1659_v55  ;;  %v305_v55 = vrot.slane %v5944_v26, 7 }
 0x128   : > { %1780 = vrot.lane.b32.xlu0 %v6502_v22, %s5731_s22 }
 0x129   : > { %v488_v40 = vpop.permute.xlu1 %487 }
 0x12a   : > { %v1753_v51 = vpop.permute.xlu0 %1752  ;;  %v668_v43 = vsel %vm661_vm1, %v6094_v52, %v488_v40  ;;  %v231_v40 = vrot.slane %v5947_v27, 1 }
 0x12b   : > { %v1870_v3 = vsel %vm694_vm2, %v1838_v50, %v1753_v51  ;;  %517 = vrot.lane.b32.xlu1 %v6475_v39, %s5732_s23 }
 0x12c   : > { %1782 = vrot.lane.b32.xlu0 %v6511_v11, %s5731_s22  ;;  %5475 = vmatprep.mubr.msk.f32.mxu0 %vm982_vm3, %v1870_v3  ;;  %v6571_v3 = vsel %vm267_vm4, %v304_v47, %v305_v55  ;;  %v6574_v27 = vsel %vm267_vm4, %v231_v40, %v304_v47 }
 0x12d   : > { %v490_v17 = vpop.permute.xlu1 %489 }
 0x12e   : > { %v1755_v2 = vpop.permute.xlu0 %1754  ;;  %v669_v44 = vsel %vm661_vm1, %v6087_v45, %v490_v17 }
 0x12f   : > { %v1871_v4 = vsel %vm694_vm2, %v1839_v38, %v1755_v2  ;;  %613 = vrot.lane.b32.xlu1 %v6523_v32, %s5731_s22 }
 0x130   : > { %611 = vrot.lane.b32.xlu0 %v6526_v25, %s5731_s22  ;;  %5476 = vmatmul.mubr.msk.f32.gmra.mxu0 %vm982_vm3, %v1871_v4 }
 0x131   : > { %v586_v12 = vpop.permute.xlu1 %585 }
 0x132   : > { %v702_v1 = vsel %vm694_vm2, %v669_v44, %v586_v12  ;;  %v584_v10 = vpop.permute.xlu0 %583  ;;  %v388_v44 = vrot.slane %v5944_v26, 1 }
 0x133   : > { %v701_v60 = vsel %vm694_vm2, %v668_v43, %v584_v10  ;;  %1690 = vrot.lane.b32.xlu1 %v6511_v11, %s5732_s23  ;;  %v308_v10 = vrot.slane %v5958_v28, 7 }
 0x134   : > { %1688 = vrot.lane.b32.xlu0 %v6502_v22, %s5732_s23  ;;  %5426 = vmatprep.mubr.msk.f32.mxu1 %vm982_vm3, %v701_v60  ;;  %v6598_v26 = vsel %vm363_vm5, %v231_v40, %v388_v44 }
 0x135   : > { %5427 = vmatmul.mubr.msk.f32.gmra.mxu1 %vm982_vm3, %v702_v1  ;;  %v1663_v45 = vpop.permute.xlu1 %1662  ;;  %v307_v1 = vrot.slane %v5961_v29, 7 }
 0x136   : > { %v1661_v52 = vpop.permute.xlu0 %1660 }
 0x137   : > { %519 = vrot.lane.b32.xlu1 %v6526_v25, %s5732_s23  ;;  %v1840_v15 = vsel %vm661_vm1, %v6114_v63, %v1661_v52  ;;  %v1841_v63 = vsel %vm661_vm1, %v6127_v35, %v1663_v45  ;;  %v6607_v45 = vsel %vm363_vm5, %v388_v44, %v305_v55  ;;  %v232_v52 = vrot.slane %v5961_v29, 1  ;;  %v5687_v44 = vld [vmem:[%s5777_s21 + $0xe0] sm:$0xff] }
 0x138   : > { %1784 = vrot.lane.b32.xlu0 %v6550_v24, %s5731_s22 }
 0x139   : > { %v492_v62 = vpop.permute.xlu1 %491  ;;  %v6622_v29 = vsel %vm267_vm4, %v232_v52, %v307_v1 }
 0x13a   : > { %v1757_v50 = vpop.permute.xlu0 %1756  ;;  %v670_v35 = vsel %vm661_vm1, %v6142_v41, %v492_v62 }
 0x13b   : > { %v1872_v51 = vsel %vm694_vm2, %v1840_v15, %v1757_v50  ;;  %521 = vrot.lane.b32.xlu1 %v6523_v32, %s5732_s23  ;;  %v6619_v15 = vsel %vm267_vm4, %v307_v1, %v308_v10 }
 0x13c   : > { %1786 = vrot.lane.b32.xlu0 %v6559_v48, %s5731_s22  ;;  %5478 = vmatprep.mubr.msk.f32.mxu0 %vm982_vm3, %v1872_v51 }
 0x13d   : > { %v494_v34 = vpop.permute.xlu1 %493 }
 0x13e   : > { %v1759_v17 = vpop.permute.xlu0 %1758  ;;  %v671_v2 = vsel %vm661_vm1, %v6135_v37, %v494_v34 }
 0x13f   : > { %v1873_v38 = vsel %vm694_vm2, %v1841_v63, %v1759_v17  ;;  %617 = vrot.lane.b32.xlu1 %v6571_v3, %s5731_s22  ;;  %v390_v17 = vrot.slane %v5958_v28, 1 }
 0x140   : > { %615 = vrot.lane.b32.xlu0 %v6574_v27, %s5731_s22  ;;  %5479 = vmatmul.mubr.msk.f32.gmra.mxu0 %vm982_vm3, %v1873_v38 }
 0x141   : > { %v590_v4 = vpop.permute.xlu1 %589 }
 0x142   : > { %v704_v12 = vsel %vm694_vm2, %v671_v2, %v590_v4  ;;  %v588_v16 = vpop.permute.xlu0 %587 }
 0x143   : > { %v703_v43 = vsel %vm694_vm2, %v670_v35, %v588_v16  ;;  %1694 = vrot.lane.b32.xlu1 %v6559_v48, %s5732_s23  ;;  %v310_v35 = vrot.slane %v5687_v44, 7 }
 0x144   : > { %1692 = vrot.lane.b32.xlu0 %v6550_v24, %s5732_s23  ;;  %5429 = vmatprep.mubr.msk.f32.mxu1 %vm982_vm3, %v703_v43 }
 0x145   : > { %5430 = vmatmul.mubr.msk.f32.gmra.mxu1 %vm982_vm3, %v704_v12  ;;  %v1667_v37 = vpop.permute.xlu1 %1666  ;;  %v5688_v12 = vld [vmem:[%s5777_s21 + $0xe8] sm:$0xff] }
 0x146   : > { %v1665_v41 = vpop.permute.xlu0 %1664  ;;  %v311_v16 = vrot.slane %v5688_v12, 7 }
 0x147   : > { %523 = vrot.lane.b32.xlu1 %v6574_v27, %s5732_s23  ;;  %v1842_v47 = vsel %vm661_vm1, %v6162_v7, %v1665_v41  ;;  %v1843_v7 = vsel %vm661_vm1, %v6175_v61, %v1667_v37  ;;  %v6655_v37 = vsel %vm363_vm5, %v390_v17, %v308_v10  ;;  %v233_v41 = vrot.slane %v5687_v44, 1 }
 0x148   : > { %1788 = vrot.lane.b32.xlu0 %v6598_v26, %s5731_s22 }
 0x149   : > { %v496_v60 = vpop.permute.xlu1 %495 }
 0x14a   : > { %v1761_v62 = vpop.permute.xlu0 %1760  ;;  %v672_v61 = vsel %vm661_vm1, %v6190_v36, %v496_v60 }
 0x14b   : > { %v1874_v40 = vsel %vm694_vm2, %v1842_v47, %v1761_v62  ;;  %525 = vrot.lane.b32.xlu1 %v6571_v3, %s5732_s23  ;;  %v6666_v47 = vsel %vm267_vm4, %v310_v35, %v311_v16  ;;  %v6669_v62 = vsel %vm267_vm4, %v233_v41, %v310_v35 }
 0x14c   : > { %1790 = vrot.lane.b32.xlu0 %v6607_v45, %s5731_s22  ;;  %5481 = vmatprep.mubr.msk.f32.mxu0 %vm982_vm3, %v1874_v40 }
 0x14d   : > { %v498_v55 = vpop.permute.xlu1 %497 }
 0x14e   : > { %v1763_v50 = vpop.permute.xlu0 %1762  ;;  %v673_v34 = vsel %vm661_vm1, %v6183_v6, %v498_v55  ;;  %v6646_v6 = vsel %vm363_vm5, %v232_v52, %v390_v17 }
 0x14f   : > { %v1875_v51 = vsel %vm694_vm2, %v1843_v7, %v1763_v50  ;;  %621 = vrot.lane.b32.xlu1 %v6619_v15, %s5731_s22 }
 0x150   : > { %619 = vrot.lane.b32.xlu0 %v6622_v29, %s5731_s22  ;;  %5482 = vmatmul.mubr.msk.f32.gmra.mxu0 %vm982_vm3, %v1875_v51  ;;  %v392_v51 = vrot.slane %v5688_v12, 1 }
 0x151   : > { %v594_v63 = vpop.permute.xlu1 %593 }
 0x152   : > { %v706_v38 = vsel %vm694_vm2, %v673_v34, %v594_v63  ;;  %v592_v2 = vpop.permute.xlu0 %591  ;;  %v6701_v44 = vsel %vm363_vm5, %v392_v51, %v311_v16 }
 0x153   : > { %v705_v4 = vsel %vm694_vm2, %v672_v61, %v592_v2  ;;  %1698 = vrot.lane.b32.xlu1 %v6607_v45, %s5732_s23  ;;  %v6692_v61 = vsel %vm363_vm5, %v233_v41, %v392_v51 }
 0x154   : > { %1696 = vrot.lane.b32.xlu0 %v6598_v26, %s5732_s23  ;;  %5432 = vmatprep.mubr.msk.f32.mxu1 %vm982_vm3, %v705_v4  ;;  %v5690_v4 = vld [vmem:[%s5777_s21 + $0xf8] sm:$0xff] }
 0x155   : > { %5433 = vmatmul.mubr.msk.f32.gmra.mxu1 %vm982_vm3, %v706_v38  ;;  %v1671_v28 = vpop.permute.xlu1 %1670  ;;  %v5689_v38 = vld [vmem:[%s5777_s21 + $0xf0] sm:$0xff] }
 0x156   : > { %v1669_v36 = vpop.permute.xlu0 %1668  ;;  %v313_v2 = vrot.slane %v5689_v38, 7  ;;  %v234_v35 = vrot.slane %v5689_v38, 1 }
 0x157   : > { %527 = vrot.lane.b32.xlu1 %v6622_v29, %s5732_s23  ;;  %v1844_v1 = vsel %vm661_vm1, %v6210_v49, %v1669_v36  ;;  %v1845_v49 = vsel %vm661_vm1, %v6223_v8, %v1671_v28  ;;  %v314_v28 = vrot.slane %v5690_v4, 7 }
 0x158   : > { %1792 = vrot.lane.b32.xlu0 %v6646_v6, %s5731_s22  ;;  %v362_v16 = vsel %vm267_vm4, %v234_v35, %v313_v2 }
 0x159   : > { %v500_v43 = vpop.permute.xlu1 %499 }
 0x15a   : > { %v1765_v60 = vpop.permute.xlu0 %1764  ;;  %v674_v8 = vsel %vm661_vm1, %v6238_v33, %v500_v43 }
 0x15b   : > { %v1876_v52 = vsel %vm694_vm2, %v1844_v1, %v1765_v60  ;;  %529 = vrot.lane.b32.xlu1 %v6619_v15, %s5732_s23  ;;  %v315_v1 = vsel %vm267_vm4, %v313_v2, %v314_v28 }
 0x15c   : > { %1794 = vrot.lane.b32.xlu0 %v6655_v37, %s5731_s22  ;;  %5484 = vmatprep.mubr.msk.f32.mxu0 %vm982_vm3, %v1876_v52 }
 0x15d   : > { %v502_v10 = vpop.permute.xlu1 %501 }
 0x15e   : > { %v1767_v40 = vpop.permute.xlu0 %1766  ;;  %v675_v7 = vsel %vm661_vm1, %v6231_v59, %v502_v10 }
 0x15f   : > { %v1877_v55 = vsel %vm694_vm2, %v1845_v49, %v1767_v40  ;;  %625 = vrot.lane.b32.xlu1 %v6666_v47, %s5731_s22 }
 0x160   : > { %623 = vrot.lane.b32.xlu0 %v6669_v62, %s5731_s22  ;;  %5485 = vmatmul.mubr.msk.f32.gmra.mxu0 %vm982_vm3, %v1877_v55  ;;  %v394_v55 = vrot.slane %v5690_v4, 1 }
 0x161   : > { %v598_v50 = vpop.permute.xlu1 %597 }
 0x162   : > { %v708_v34 = vsel %vm694_vm2, %v675_v7, %v598_v50  ;;  %v596_v63 = vpop.permute.xlu0 %595 }
 0x163   : > { %v707_v17 = vsel %vm694_vm2, %v674_v8, %v596_v63  ;;  %1702 = vrot.lane.b32.xlu1 %v6655_v37, %s5732_s23  ;;  %v395_v8 = vsel %vm363_vm5, %v234_v35, %v394_v55  ;;  %v458_v63 = vsel %vm363_vm5, %v394_v55, %v314_v28 }
 0x164   : > { %1700 = vrot.lane.b32.xlu0 %v6646_v6, %s5732_s23  ;;  %5435 = vmatprep.mubr.msk.f32.mxu1 %vm982_vm3, %v707_v17 }
 0x165   : > { %5436 = vmatmul.mubr.msk.f32.gmra.mxu1 %vm982_vm3, %v708_v34  ;;  %v1675_v59 = vpop.permute.xlu1 %1674 }
 0x166   : > { %v1673_v33 = vpop.permute.xlu0 %1672  ;;  %v1847_v52 = vsel %vm661_vm1, %v6271_v54, %v1675_v59 }
 0x167   : > { %531 = vrot.lane.b32.xlu1 %v6669_v62, %s5732_s23  ;;  %v1846_v12 = vsel %vm661_vm1, %v6258_v42, %v1673_v33 }
 0x168   : > { %1796 = vrot.lane.b32.xlu0 %v6692_v61, %s5731_s22 }
 0x169   : > { %v504_v36 = vpop.permute.xlu1 %503 }
 0x16a   : > { %v1769_v43 = vpop.permute.xlu0 %1768  ;;  %v676_v7 = vsel %vm661_vm1, %v6286_v58, %v504_v36 }
 0x16b   : > { %v1878_v41 = vsel %vm694_vm2, %v1846_v12, %v1769_v43  ;;  %533 = vrot.lane.b32.xlu1 %v6666_v47, %s5732_s23 }
 0x16c   : > { %1798 = vrot.lane.b32.xlu0 %v6701_v44, %s5731_s22  ;;  %5487 = vmatprep.mubr.msk.f32.mxu0 %vm982_vm3, %v1878_v41 }
 0x16d   : > { %v506_v60 = vpop.permute.xlu1 %505 }
 0x16e   : > { %v1771_v42 = vpop.permute.xlu0 %1770  ;;  %v677_v49 = vsel %vm661_vm1, %v6279_v57, %v506_v60 }
 0x16f   : > { %v1879_v10 = vsel %vm694_vm2, %v1847_v52, %v1771_v42  ;;  %629 = vrot.lane.b32.xlu1 %v315_v1, %s5731_s22 }
 0x170   : > { %627 = vrot.lane.b32.xlu0 %v362_v16, %s5731_s22  ;;  %5488 = vmatmul.mubr.msk.f32.gmra.mxu0 %vm982_vm3, %v1879_v10 }
 0x171   : > { %v602_v40 = vpop.permute.xlu1 %601 }
 0x172   : > { %v710_v50 = vsel %vm694_vm2, %v677_v49, %v602_v40  ;;  %v600_v54 = vpop.permute.xlu0 %599 }
 0x173   : > { %v709_v51 = vsel %vm694_vm2, %v676_v7, %v600_v54  ;;  %1706 = vrot.lane.b32.xlu1 %v6701_v44, %s5732_s23 }
 0x174   : > { %1704 = vrot.lane.b32.xlu0 %v6692_v61, %s5732_s23  ;;  %5438 = vmatprep.mubr.msk.f32.mxu1 %vm982_vm3, %v709_v51 }
 0x175   : > { %5439 = vmatmul.mubr.msk.f32.gmra.mxu1 %vm982_vm3, %v710_v50  ;;  %v1679_v57 = vpop.permute.xlu1 %1678 }
 0x176   : > { %v1677_v34 = vpop.permute.xlu0 %1676  ;;  %v1849_v2 = vsel %vm661_vm1, %v6319_v56, %v1679_v57 }
 0x177   : > { %535 = vrot.lane.b32.xlu1 %v362_v16, %s5732_s23  ;;  %v1848_v17 = vsel %vm661_vm1, %v6306_v9, %v1677_v34 }
 0x178   : > { %1800 = vrot.lane.b32.xlu0 %v395_v8, %s5731_s22 }
 0x179   : > { %v508_v58 = vpop.permute.xlu1 %507 }
 0x17a   : > { %v1773_v59 = vpop.permute.xlu0 %1772  ;;  %v678_v35 = vsel %vm661_vm1, %v6334_v13, %v508_v58 }
 0x17b   : > { %v1880_v33 = vsel %vm694_vm2, %v1848_v17, %v1773_v59  ;;  %537 = vrot.lane.b32.xlu1 %v315_v1, %s5732_s23 }
 0x17c   : > { %1802 = vrot.lane.b32.xlu0 %v458_v63, %s5731_s22  ;;  %5490 = vmatprep.mubr.msk.f32.mxu0 %vm982_vm3, %v1880_v33 }
 0x17d   : > { %v510_v38 = vpop.permute.xlu1 %509 }
 0x17e   : > { %v1775_v4 = vpop.permute.xlu0 %1774  ;;  %v679_v9 = vsel %vm661_vm1, %v6327_v0, %v510_v38 }
 0x17f   : > { %v1881_v36 = vsel %vm694_vm2, %v1849_v2, %v1775_v4  ;;  %1710 = vrot.lane.b32.xlu1 %v458_v63, %s5732_s23 }
 0x180   : > { %1708 = vrot.lane.b32.xlu0 %v395_v8, %s5732_s23  ;;  %5491 = vmatmul.mubr.msk.f32.gmra.mxu0 %vm982_vm3, %v1881_v36 }
 0x181   : > { %v606_v28 = vpop.permute.xlu1 %605 }
 0x182   : > { %v712_v12 = vsel %vm694_vm2, %v679_v9, %v606_v28  ;;  %v604_v43 = vpop.permute.xlu0 %603 }
 0x183   : > { %v711_v56 = vsel %vm694_vm2, %v678_v35, %v604_v43 }
 0x184   : > { %5441 = vmatprep.mubr.msk.f32.mxu1 %vm982_vm3, %v711_v56 }
 0x185   : > { %5442 = vmatmul.mubr.msk.f32.gmra.mxu1 %vm982_vm3, %v712_v12  ;;  %v1683_v41 = vpop.permute.xlu1 %1682 }
 0x186   : > { %v1681_v1 = vpop.permute.xlu0 %1680  ;;  %v1851_v42 = vsel %vm661_vm1, %v6367_v53, %v1683_v41 }
 0x187   : > { %v1850_v16 = vsel %vm661_vm1, %v6354_v14, %v1681_v1 }
 0x189   : > { %v512_v60 = vpop.permute.xlu1 %511 }
 0x18a   : > { %v1777_v0 = vpop.permute.xlu0 %1776  ;;  %v680_v14 = vsel %vm661_vm1, %v6386_v31, %v512_v60 }
 0x18b   : > { %v1882_v52 = vsel %vm694_vm2, %v1850_v16, %v1777_v0 }
 0x18c   : > { %5493 = vmatprep.mubr.msk.f32.mxu0 %vm982_vm3, %v1882_v52 }
 0x18d   : > { %v514_v13 = vpop.permute.xlu1 %513 }
 0x18e   : > { %v1779_v10 = vpop.permute.xlu0 %1778  ;;  %v681_v40 = vsel %vm661_vm1, %v6382_v19, %v514_v13 }
 0x18f   : > { %v1883_v49 = vsel %vm694_vm2, %v1851_v42, %v1779_v10 }
 0x190   : > { %5494 = vmatmul.mubr.msk.f32.gmra.mxu0 %vm982_vm3, %v1883_v49 }
 0x191   : > { %v610_v55 = vpop.permute.xlu1 %609 }
 0x192   : > { %v714_v7 = vsel %vm694_vm2, %v681_v40, %v610_v55  ;;  %v608_v50 = vpop.permute.xlu0 %607 }
 0x193   : > { %v713_v54 = vsel %vm694_vm2, %v680_v14, %v608_v50 }
 0x194   : > { %5444 = vmatprep.mubr.msk.f32.mxu1 %vm982_vm3, %v713_v54 }
 0x195   : > { %5445 = vmatmul.mubr.msk.f32.gmra.mxu1 %vm982_vm3, %v714_v7  ;;  %v1687_v53 = vpop.permute.xlu1 %1686 }
 0x196   : > { %v1685_v51 = vpop.permute.xlu0 %1684  ;;  %v1853_v58 = vsel %vm661_vm1, %v6415_v5, %v1687_v53 }
 0x197   : > { %v1852_v8 = vsel %vm661_vm1, %v6406_v18, %v1685_v51 }
 0x199   : > { %v516_v57 = vpop.permute.xlu1 %515 }
 0x19a   : > { %v1781_v19 = vpop.permute.xlu0 %1780  ;;  %v682_v18 = vsel %vm661_vm1, %v6430_v21, %v516_v57 }
 0x19b   : > { %v1884_v34 = vsel %vm694_vm2, %v1852_v8, %v1781_v19 }
 0x19c   : > { %5496 = vmatprep.mubr.msk.f32.mxu0 %vm982_vm3, %v1884_v34 }
 0x19d   : > { %v518_v31 = vpop.permute.xlu1 %517 }
 0x19e   : > { %v1783_v63 = vpop.permute.xlu0 %1782  ;;  %v683_v59 = vsel %vm661_vm1, %v6427_v46, %v518_v31 }
 0x19f   : > { %v1885_v17 = vsel %vm694_vm2, %v1853_v58, %v1783_v63 }
 0x1a0   : > { %5497 = vmatmul.mubr.msk.f32.gmra.mxu0 %vm982_vm3, %v1885_v17 }
 0x1a1   : > { %v614_v33 = vpop.permute.xlu1 %613 }
 0x1a2   : > { %v716_v38 = vsel %vm694_vm2, %v683_v59, %v614_v33  ;;  %v612_v2 = vpop.permute.xlu0 %611 }
 0x1a3   : > { %v715_v4 = vsel %vm694_vm2, %v682_v18, %v612_v2 }
 0x1a4   : > { %5447 = vmatprep.mubr.msk.f32.mxu1 %vm982_vm3, %v715_v4 }
 0x1a5   : > { %5448 = vmatmul.mubr.msk.f32.gmra.mxu1 %vm982_vm3, %v716_v38  ;;  %v1691_v5 = vpop.permute.xlu1 %1690 }
 0x1a6   : > { %v1689_v36 = vpop.permute.xlu0 %1688  ;;  %v1855_v12 = vsel %vm661_vm1, %v6463_v30, %v1691_v5 }
 0x1a7   : > { %v1854_v28 = vsel %vm661_vm1, %v6454_v20, %v1689_v36 }
 0x1a9   : > { %v520_v9 = vpop.permute.xlu1 %519 }
 0x1aa   : > { %v1785_v46 = vpop.permute.xlu0 %1784  ;;  %v684_v20 = vsel %vm661_vm1, %v6478_v23, %v520_v9 }
 0x1ab   : > { %v1886_v35 = vsel %vm694_vm2, %v1854_v28, %v1785_v46 }
 0x1ac   : > { %5499 = vmatprep.mubr.msk.f32.mxu0 %vm982_vm3, %v1886_v35 }
 0x1ad   : > { %v522_v21 = vpop.permute.xlu1 %521 }
 0x1ae   : > { %v1787_v43 = vpop.permute.xlu0 %1786  ;;  %v685_v41 = vsel %vm661_vm1, %v6475_v39, %v522_v21 }
 0x1af   : > { %v1887_v56 = vsel %vm694_vm2, %v1855_v12, %v1787_v43 }
 0x1b0   : > { %5500 = vmatmul.mubr.msk.f32.gmra.mxu0 %vm982_vm3, %v1887_v56 }
 0x1b1   : > { %v618_v1 = vpop.permute.xlu1 %617 }
 0x1b2   : > { %v718_v60 = vsel %vm694_vm2, %v685_v41, %v618_v1  ;;  %v616_v16 = vpop.permute.xlu0 %615 }
 0x1b3   : > { %v717_v0 = vsel %vm694_vm2, %v684_v20, %v616_v16 }
 0x1b4   : > { %5450 = vmatprep.mubr.msk.f32.mxu1 %vm982_vm3, %v717_v0 }
 0x1b5   : > { %5451 = vmatmul.mubr.msk.f32.gmra.mxu1 %vm982_vm3, %v718_v60  ;;  %v1695_v30 = vpop.permute.xlu1 %1694 }
 0x1b6   : > { %v1693_v52 = vpop.permute.xlu0 %1692  ;;  %v1857_v49 = vsel %vm661_vm1, %v6511_v11, %v1695_v30 }
 0x1b7   : > { %v1856_v42 = vsel %vm661_vm1, %v6502_v22, %v1693_v52 }
 0x1b9   : > { %v524_v13 = vpop.permute.xlu1 %523 }
 0x1ba   : > { %v1789_v39 = vpop.permute.xlu0 %1788  ;;  %v686_v22 = vsel %vm661_vm1, %v6526_v25, %v524_v13  ;;  %v5367_v13 = vpop.f32.mrf.mxu0 }
 0x1bb   : > { %v1888_v10 = vsel %vm694_vm2, %v1856_v42, %v1789_v39 }
 0x1bc   : > { %5502 = vmatprep.mubr.msk.f32.mxu0 %vm982_vm3, %v1888_v10 }
 0x1bd   : > { %v526_v23 = vpop.permute.xlu1 %525 }
 0x1be   : > { %v1791_v40 = vpop.permute.xlu0 %1790  ;;  %v687_v14 = vsel %vm661_vm1, %v6523_v32, %v526_v23  ;;  %v1149_v23 = vpop.f32.mrf.mxu0 }
 0x1bf   : > { %v1889_v55 = vsel %vm694_vm2, %v1857_v49, %v1791_v40 }
 0x1c0   : > { %5503 = vmatmul.mubr.msk.f32.gmra.mxu0 %vm982_vm3, %v1889_v55  ;;  %v5370_v40 = vpop.f32.mrf.mxu0 }
 0x1c1   : > { %v622_v7 = vpop.permute.xlu1 %621 }
 0x1c2   : > { %v720_v50 = vsel %vm694_vm2, %v687_v14, %v622_v7  ;;  %v620_v54 = vpop.permute.xlu0 %619  ;;  %v1159_v55 = vpop.f32.mrf.mxu0 }
 0x1c3   : > { %v719_v53 = vsel %vm694_vm2, %v686_v22, %v620_v54 }
 0x1c4   : > { %5453 = vmatprep.mubr.msk.f32.mxu1 %vm982_vm3, %v719_v53  ;;  %v6875_v14 = vpop.f32.mrf.mxu0 }
 0x1c5   : > { %5454 = vmatmul.mubr.msk.f32.gmra.mxu1 %vm982_vm3, %v720_v50  ;;  %v1699_v11 = vpop.permute.xlu1 %1698 }
 0x1c6   : > { %v1697_v51 = vpop.permute.xlu0 %1696  ;;  %v1859_v34 = vsel %vm661_vm1, %v6559_v48, %v1699_v11  ;;  %v1169_v7 = vpop.f32.mrf.mxu0 }
 0x1c7   : > { %v1858_v8 = vsel %vm661_vm1, %v6550_v24, %v1697_v51 }
 0x1c8   : > { %v6877_v22 = vpop.f32.mrf.mxu0 }
 0x1c9   : > { %v528_v57 = vpop.permute.xlu1 %527 }
 0x1ca   : > { %v1793_v32 = vpop.permute.xlu0 %1792  ;;  %v688_v24 = vsel %vm661_vm1, %v6574_v27, %v528_v57 }
 0x1cb   : > { %v1890_v19 = vsel %vm694_vm2, %v1858_v8, %v1793_v32 }
 0x1cc   : > { %5505 = vmatprep.mubr.msk.f32.mxu0 %vm982_vm3, %v1890_v19 }
 0x1cd   : > { %v530_v25 = vpop.permute.xlu1 %529 }
 0x1ce   : > { %v1795_v31 = vpop.permute.xlu0 %1794  ;;  %v689_v63 = vsel %vm661_vm1, %v6571_v3, %v530_v25 }
 0x1cf   : > { %v1891_v58 = vsel %vm694_vm2, %v1859_v34, %v1795_v31 }
 0x1d0   : > { %5506 = vmatmul.mubr.msk.f32.gmra.mxu0 %vm982_vm3, %v1891_v58 }
 0x1d1   : > { %v626_v17 = vpop.permute.xlu1 %625 }
 0x1d2   : > { %v624_v59 = vpop.permute.xlu0 %623  ;;  %v722_v33 = vsel %vm694_vm2, %v689_v63, %v626_v17 }
 0x1d3   : > { %v721_v18 = vsel %vm694_vm2, %v688_v24, %v624_v59 }
 0x1d4   : > { %5456 = vmatprep.mubr.msk.f32.mxu1 %vm982_vm3, %v721_v18 }
 0x1d5   : > { %5457 = vmatmul.mubr.msk.f32.gmra.mxu1 %vm982_vm3, %v722_v33  ;;  %v1703_v48 = vpop.permute.xlu1 %1702 }
 0x1d6   : > { %v1701_v38 = vpop.permute.xlu0 %1700  ;;  %v1861_v36 = vsel %vm661_vm1, %v6607_v45, %v1703_v48 }
 0x1d7   : > { %v1860_v4 = vsel %vm661_vm1, %v6598_v26, %v1701_v38 }
 0x1d9   : > { %v532_v2 = vpop.permute.xlu1 %531 }
 0x1da   : > { %v1797_v3 = vpop.permute.xlu0 %1796  ;;  %v690_v26 = vsel %vm661_vm1, %v6622_v29, %v532_v2 }
 0x1db   : > { %v1892_v5 = vsel %vm694_vm2, %v1860_v4, %v1797_v3 }
 0x1dc   : > { %5508 = vmatprep.mubr.msk.f32.mxu0 %vm982_vm3, %v1892_v5 }
 0x1dd   : > { %v534_v27 = vpop.permute.xlu1 %533 }
 0x1de   : > { %v1799_v9 = vpop.permute.xlu0 %1798  ;;  %v691_v46 = vsel %vm661_vm1, %v6619_v15, %v534_v27 }
 0x1df   : > { %v1893_v28 = vsel %vm694_vm2, %v1861_v36, %v1799_v9 }
 0x1e0   : > { %5509 = vmatmul.mubr.msk.f32.gmra.mxu0 %vm982_vm3, %v1893_v28 }
 0x1e1   : > { %v630_v35 = vpop.permute.xlu1 %629 }
 0x1e2   : > { %v724_v21 = vsel %vm694_vm2, %v691_v46, %v630_v35  ;;  %v628_v12 = vpop.permute.xlu0 %627 }
 0x1e3   : > { %v723_v43 = vsel %vm694_vm2, %v690_v26, %v628_v12 }
 0x1e4   : > { %5459 = vmatprep.mubr.msk.f32.mxu1 %vm982_vm3, %v723_v43 }
 0x1e5   : > { %5460 = vmatmul.mubr.msk.f32.gmra.mxu1 %vm982_vm3, %v724_v21  ;;  %v1707_v45 = vpop.permute.xlu1 %1706 }
 0x1e6   : > { %v1705_v56 = vpop.permute.xlu0 %1704  ;;  %v1863_v0 = vsel %vm661_vm1, %v6655_v37, %v1707_v45 }
 0x1e7   : > { %v1862_v1 = vsel %vm661_vm1, %v6646_v6, %v1705_v56 }
 0x1e9   : > { %v536_v41 = vpop.permute.xlu1 %535 }
 0x1ea   : > { %v692_v15 = vsel %vm661_vm1, %v6669_v62, %v536_v41  ;;  %v1801_v20 = vpop.permute.xlu0 %1800 }
 0x1eb   : > { %v1894_v29 = vsel %vm694_vm2, %v1862_v1, %v1801_v20  ;;  %v725_v60 = vsel %vm694_vm2, %v692_v15, %v624_v59 }
 0x1ec   : > { %5511 = vmatprep.mubr.msk.f32.mxu0 %vm982_vm3, %v1894_v29  ;;  %5462 = vmatprep.mubr.msk.f32.mxu1 %vm982_vm3, %v725_v60 }
 0x1ed   : > { %v538_v16 = vpop.permute.xlu1 %537 }
 0x1ee   : > { %v693_v30 = vsel %vm661_vm1, %v6666_v47, %v538_v16  ;;  %v1803_v6 = vpop.permute.xlu0 %1802 }
 0x1ef   : > { %v1895_v52 = vsel %vm694_vm2, %v1863_v0, %v1803_v6  ;;  %v726_v62 = vsel %vm694_vm2, %v693_v30, %v626_v17 }
 0x1f0   : > { %5512 = vmatmul.mubr.msk.f32.gmra.mxu0 %vm982_vm3, %v1895_v52  ;;  %5463 = vmatmul.mubr.msk.f32.gmra.mxu1 %vm982_vm3, %v726_v62 }
 0x1f1   : > { %v1711_v42 = vpop.permute.xlu1 %1710 }
 0x1f2   : > { %v1865_v39 = vsel %vm661_vm1, %v6701_v44, %v1711_v42  ;;  %v1709_v10 = vpop.permute.xlu0 %1708  ;;  %v6879_v44 = vpop.f32.mrf.mxu0 }
 0x1f3   : > { %v1864_v37 = vsel %vm661_vm1, %v6692_v61, %v1709_v10  ;;  %v1897_v49 = vsel %vm694_vm2, %v1865_v39, %v1799_v9 }
 0x1f4   : > { %v1896_v47 = vsel %vm694_vm2, %v1864_v37, %v1797_v3  ;;  %v6881_v50 = vpop.f32.mrf.mxu0  ;;  %v5419_v3 = vpop.f32.mrf.mxu1 }
 0x1f5   : > { %5514 = vmatprep.mubr.msk.f32.mxu0 %vm982_vm3, %v1896_v47  ;;  %v1479_v26 = vadd.f32 %v5419_v3, %v5367_v13 }
 0x1f6   : > { %5515 = vmatmul.mubr.msk.f32.gmra.mxu0 %vm982_vm3, %v1897_v49  ;;  %v6883_v61 = vpop.f32.mrf.mxu0  ;;  %v1473_v27 = vpop.f32.mrf.mxu1 }
 0x1f7   : > { %v1474_v35 = vadd.f32 %v1473_v27, %v1149_v23 }
 0x1f8   : > { %v6885_v54 = vpop.f32.mrf.mxu0  ;;  %v5422_v9 = vpop.f32.mrf.mxu1 }
 0x1f9   : > { %v1489_v30 = vadd.f32 %v5422_v9, %v5370_v40 }
 0x1fa   : > { %v6887_v53 = vpop.f32.mrf.mxu0  ;;  %v1483_v46 = vpop.f32.mrf.mxu1 }
 0x1fb   : > { %v1484_v45 = vadd.f32 %v1483_v46, %v1159_v55 }
 0x1fc   : > { %v6889_v11 = vpop.f32.mrf.mxu0  ;;  %v5425_v12 = vpop.f32.mrf.mxu1 }
 0x1fe   : > { %v6891_v51 = vpop.f32.mrf.mxu0  ;;  %v1493_v15 = vpop.f32.mrf.mxu1 }
 0x1ff   : > { %v1494_v52 = vadd.f32 %v1493_v15, %v1169_v7 }
 0x200   : > { %v6893_v57 = vpop.f32.mrf.mxu0  ;;  %v5428_v16 = vpop.f32.mrf.mxu1 }
 0x202   : > { %v6895_v8 = vpop.f32.mrf.mxu0  ;;  %v1503_v47 = vpop.f32.mrf.mxu1 }
 0x204   : > { %v6897_v32 = vpop.f32.mrf.mxu0 }
 0x206   : > { %v6899_v19 = vpop.f32.mrf.mxu0 }
 0x208   : > { %v6901_v25 = vpop.f32.mrf.mxu0 }
 0x20a   : > { %v6903_v34 = vpop.f32.mrf.mxu0 }
 0x20c   : > { %v6905_v31 = vpop.f32.mrf.mxu0 }
 0x20e   : > { %v6907_v58 = vpop.f32.mrf.mxu0 }
 0x210   : > { %v6909_v63 = vpop.f32.mrf.mxu0 }
 0x212   : > { %v6911_v17 = vpop.f32.mrf.mxu0 }
 0x214   : > { %v6913_v24 = vpop.f32.mrf.mxu0 }
 0x216   : > { %v6915_v59 = vpop.f32.mrf.mxu0 }
 0x218   : > { %v6917_v33 = vpop.f32.mrf.mxu0 }
 0x21a   : > { %v6919_v18 = vpop.f32.mrf.mxu0 }
 0x21c   : > { %v6921_v48 = vpop.f32.mrf.mxu0 }
 0x21e   : > { %v6923_v38 = vpop.f32.mrf.mxu0 }
 0x220   : > { %v6925_v2 = vpop.f32.mrf.mxu0 }
 0x222   : > { %v6927_v4 = vpop.f32.mrf.mxu0 }
 0x224   : > { %v5471_v5 = vpop.f32.mrf.mxu0 }
 0x225   : > { %v6931_v56 = vadd.f32 %v5471_v5, %v1479_v26  ;;  %v5431_v5 = vpop.f32.mrf.mxu1 }
 0x226   : > { %v2066_v36 = vpop.f32.mrf.mxu0 }
 0x227   : > { %v6929_v43 = vadd.f32 %v2066_v36, %v1474_v35  ;;  %v2327_v29 = vmul.f32 %v6931_v56, %v6931_v56  ;;  %v2258_v62 = vsel %vm661_vm1, %v6931_v56, 0.0  ;;  %v1499_v36 = vadd.f32 %v5425_v12, %v6875_v14 }
 0x228   : > { %v5474_v28 = vpop.f32.mrf.mxu0 }
 0x229   : > { %v2326_v20 = vmul.f32 %v6929_v43, %v6929_v43  ;;  %v2257_v0 = vsel %vm661_vm1, %v6929_v43, 0.0  ;;  %v6946_v39 = vadd.f32 %v5474_v28, %v1489_v30  ;;  %v2359_v49 = vsel %vm661_vm1, %v2327_v29, 0.0  ;;  %v1513_v29 = vpop.f32.mrf.mxu1 }
 0x22a   : > { %v2076_v21 = vpop.f32.mrf.mxu0  ;;  %v2259_v23 = vadd.f32 %v2258_v62, %v2257_v0  ;;  %v1504_v28 = vadd.f32 %v1503_v47, %v6879_v44  ;;  %v1514_v62 = vadd.f32 %v1513_v29, %v6883_v61 }
 0x22b   : > { %v6933_v1 = vadd.f32 %v2076_v21, %v1484_v45  ;;  %v2358_v42 = vsel %vm661_vm1, %v2326_v20, 0.0  ;;  %v2329_v27 = vmul.f32 %v6946_v39, %v6946_v39  ;;  %v2262_v26 = vsel %vm661_vm1, %v6946_v39, 0.0  ;;  %v5434_v30 = vpop.f32.mrf.mxu1 }
 0x22c   : > { %v5477_v41 = vpop.f32.mrf.mxu0  ;;  %v2360_v55 = vadd.f32 %v2359_v49, %v2358_v42 }
 0x22d   : > { %v2328_v6 = vmul.f32 %v6933_v1, %v6933_v1  ;;  %v2260_v10 = vsel %vm661_vm1, %v6933_v1, 0.0  ;;  %v6962_v21 = vadd.f32 %v5477_v41, %v1499_v36  ;;  %v2363_v14 = vsel %vm661_vm1, %v2329_v27, 0.0 }
 0x22e   : > { %v2086_v60 = vpop.f32.mrf.mxu0  ;;  %v2261_v7 = vadd.f32 %v2260_v10, %v2259_v23  ;;  %v1509_v41 = vadd.f32 %v5428_v16, %v6877_v22 }
 0x22f   : > { %v6950_v37 = vadd.f32 %v2086_v60, %v1494_v52  ;;  %v2361_v40 = vsel %vm661_vm1, %v2328_v6, 0.0  ;;  %v2331_v6 = vmul.f32 %v6962_v21, %v6962_v21  ;;  %v2266_v23 = vsel %vm661_vm1, %v6962_v21, 0.0 }
 0x230   : > { %v5480_v13 = vpop.f32.mrf.mxu0  ;;  %v2362_v46 = vadd.f32 %v2361_v40, %v2360_v55  ;;  %v2263_v20 = vadd.f32 %v2262_v26, %v2261_v7  ;;  %v1523_v7 = vpop.f32.mrf.mxu1 }
 0x231   : > { %v2330_v9 = vmul.f32 %v6950_v37, %v6950_v37  ;;  %v2264_v45 = vsel %vm661_vm1, %v6950_v37, 0.0  ;;  %v6978_v47 = vadd.f32 %v5480_v13, %v1509_v41  ;;  %v2367_v22 = vsel %vm661_vm1, %v2331_v6, 0.0 }
 0x232   : > { %v2096_v3 = vpop.f32.mrf.mxu0  ;;  %v2265_v60 = vadd.f32 %v2264_v45, %v2263_v20  ;;  %v2364_v44 = vadd.f32 %v2363_v14, %v2362_v46  ;;  %v5437_v36 = vpop.f32.mrf.mxu1  ;;  %v1519_v13 = vadd.f32 %v5431_v5, %v6881_v50  ;;  %v1524_v46 = vadd.f32 %v1523_v7, %v6887_v53 }
 0x233   : > { %v6966_v15 = vadd.f32 %v2096_v3, %v1504_v28  ;;  %v2365_v12 = vsel %vm661_vm1, %v2330_v9, 0.0  ;;  %v2333_v9 = vmul.f32 %v6978_v47, %v6978_v47  ;;  %v2270_v20 = vsel %vm661_vm1, %v6978_v47, 0.0 }
 0x234   : > { %v5483_v35 = vpop.f32.mrf.mxu0  ;;  %v2366_v42 = vadd.f32 %v2365_v12, %v2364_v44  ;;  %v2267_v55 = vadd.f32 %v2266_v23, %v2265_v60  ;;  %v1533_v44 = vpop.f32.mrf.mxu1 }
 0x235   : > { %v2332_v52 = vmul.f32 %v6966_v15, %v6966_v15  ;;  %v2268_v49 = vsel %vm661_vm1, %v6966_v15, 0.0  ;;  %v6994_v29 = vadd.f32 %v5483_v35, %v1519_v13  ;;  %v2371_v50 = vsel %vm661_vm1, %v2333_v9, 0.0 }
 0x236   : > { %v2106_v0 = vpop.f32.mrf.mxu0  ;;  %v2269_v3 = vadd.f32 %v2268_v49, %v2267_v55  ;;  %v2368_v61 = vadd.f32 %v2367_v22, %v2366_v42  ;;  %v5440_v41 = vpop.f32.mrf.mxu1  ;;  %v1529_v35 = vadd.f32 %v5434_v30, %v6885_v54  ;;  %v1534_v42 = vadd.f32 %v1533_v44, %v6891_v51 }
 0x237   : > { %v6982_v40 = vadd.f32 %v2106_v0, %v1514_v62  ;;  %v2369_v16 = vsel %vm661_vm1, %v2332_v52, 0.0  ;;  %v2335_v52 = vmul.f32 %v6994_v29, %v6994_v29  ;;  %v2274_v55 = vsel %vm661_vm1, %v6994_v29, 0.0 }
 0x238   : > { %v5486_v10 = vpop.f32.mrf.mxu0  ;;  %v2370_v26 = vadd.f32 %v2369_v16, %v2368_v61  ;;  %v2271_v60 = vadd.f32 %v2270_v20, %v2269_v3  ;;  %v1543_v61 = vpop.f32.mrf.mxu1 }
 0x239   : > { %v2334_v28 = vmul.f32 %v6982_v40, %v6982_v40  ;;  %v2272_v14 = vsel %vm661_vm1, %v6982_v40, 0.0  ;;  %v7010_v7 = vadd.f32 %v5486_v10, %v1529_v35  ;;  %v2375_v54 = vsel %vm661_vm1, %v2335_v52, 0.0 }
 0x23a   : > { %v2116_v27 = vpop.f32.mrf.mxu0  ;;  %v2273_v0 = vadd.f32 %v2272_v14, %v2271_v60  ;;  %v2372_v53 = vadd.f32 %v2371_v50, %v2370_v26  ;;  %v1539_v10 = vadd.f32 %v5437_v36, %v6889_v11  ;;  %v1544_v26 = vadd.f32 %v1543_v61, %v6895_v8 }
 0x23b   : > { %v6998_v12 = vadd.f32 %v2116_v27, %v1524_v46  ;;  %v2373_v5 = vsel %vm661_vm1, %v2334_v28, 0.0  ;;  %v2337_v28 = vmul.f32 %v7010_v7, %v7010_v7  ;;  %v2278_v60 = vsel %vm661_vm1, %v7010_v7, 0.0 }
 0x23c   : > { %v5489_v45 = vpop.f32.mrf.mxu0  ;;  %v2374_v23 = vadd.f32 %v2373_v5, %v2372_v53  ;;  %v2275_v3 = vadd.f32 %v2274_v55, %v2273_v0 }
 0x23d   : > { %v2336_v62 = vmul.f32 %v6998_v12, %v6998_v12  ;;  %v2276_v22 = vsel %vm661_vm1, %v6998_v12, 0.0  ;;  %v7026_v44 = vadd.f32 %v5489_v45, %v1539_v10  ;;  %v2379_v11 = vsel %vm661_vm1, %v2337_v28, 0.0 }
 0x23e   : > { %v2126_v6 = vpop.f32.mrf.mxu0  ;;  %v2277_v27 = vadd.f32 %v2276_v22, %v2275_v3  ;;  %v2376_v51 = vadd.f32 %v2375_v54, %v2374_v23  ;;  %v1549_v45 = vadd.f32 %v5440_v41, %v6893_v57 }
 0x23f   : > { %v7014_v16 = vadd.f32 %v2126_v6, %v1534_v42  ;;  %v2377_v30 = vsel %vm661_vm1, %v2336_v62, 0.0  ;;  %v2339_v62 = vmul.f32 %v7026_v44, %v7026_v44  ;;  %v2282_v3 = vsel %vm661_vm1, %v7026_v44, 0.0 }
 0x240   : > { %v5492_v49 = vpop.f32.mrf.mxu0  ;;  %v2378_v20 = vadd.f32 %v2377_v30, %v2376_v51  ;;  %v2279_v0 = vadd.f32 %v2278_v60, %v2277_v27 }
 0x241   : > { %v2338_v46 = vmul.f32 %v7014_v16, %v7014_v16  ;;  %v2280_v50 = vsel %vm661_vm1, %v7014_v16, 0.0  ;;  %v7042_v61 = vadd.f32 %v5492_v49, %v1549_v45  ;;  %v2383_v57 = vsel %vm661_vm1, %v2339_v62, 0.0 }
 0x242   : > { %v2136_v9 = vpop.f32.mrf.mxu0  ;;  %v2281_v6 = vadd.f32 %v2280_v50, %v2279_v0  ;;  %v2380_v8 = vadd.f32 %v2379_v11, %v2378_v20 }
 0x243   : > { %v7030_v5 = vadd.f32 %v2136_v9, %v1544_v26  ;;  %v2381_v36 = vsel %vm661_vm1, %v2338_v46, 0.0  ;;  %v2341_v46 = vmul.f32 %v7042_v61, %v7042_v61  ;;  %v2286_v0 = vsel %vm661_vm1, %v7042_v61, 0.0 }
 0x244   : > { %v2382_v55 = vadd.f32 %v2381_v36, %v2380_v8  ;;  %v2283_v27 = vadd.f32 %v2282_v3, %v2281_v6 }
 0x245   : > { %v5443_v13 = vpop.f32.mrf.mxu1  ;;  %v2340_v42 = vmul.f32 %v7030_v5, %v7030_v5  ;;  %v2284_v54 = vsel %vm661_vm1, %v7030_v5, 0.0 }
 0x246   : > { %v2285_v9 = vadd.f32 %v2284_v54, %v2283_v27  ;;  %v1559_v49 = vadd.f32 %v5443_v13, %v6897_v32  ;;  %v2387_v32 = vsel %vm661_vm1, %v2341_v46, 0.0 }
 0x247   : > { %v1553_v53 = vpop.f32.mrf.mxu1  ;;  %v2385_v41 = vsel %vm661_vm1, %v2340_v42, 0.0 }
 0x248   : > { %v1554_v23 = vadd.f32 %v1553_v53, %v6899_v19  ;;  %v2384_v19 = vadd.f32 %v2383_v57, %v2382_v55  ;;  %v2287_v6 = vadd.f32 %v2286_v0, %v2285_v9 }
 0x24a   : > { %v2386_v60 = vadd.f32 %v2385_v41, %v2384_v19 }
 0x250   : > { %v5495_v14 = vpop.f32.mrf.mxu0 }
 0x251   : > { %v7058_v53 = vadd.f32 %v5495_v14, %v1559_v49 }
 0x252   : > { %v2146_v52 = vpop.f32.mrf.mxu0 }
 0x253   : > { %v7046_v30 = vadd.f32 %v2146_v52, %v1554_v23  ;;  %v2343_v42 = vmul.f32 %v7058_v53, %v7058_v53  ;;  %v2290_v27 = vsel %vm661_vm1, %v7058_v53, 0.0 }
 0x255   : > { %v5446_v35 = vpop.f32.mrf.mxu1  ;;  %v2342_v26 = vmul.f32 %v7046_v30, %v7046_v30  ;;  %v2288_v11 = vsel %vm661_vm1, %v7046_v30, 0.0 }
 0x256   : > { %v2289_v52 = vadd.f32 %v2288_v11, %v2287_v6  ;;  %v1569_v14 = vadd.f32 %v5446_v35, %v6901_v25  ;;  %v2391_v25 = vsel %vm661_vm1, %v2343_v42, 0.0 }
 0x257   : > { %v1563_v51 = vpop.f32.mrf.mxu1  ;;  %v2389_v13 = vsel %vm661_vm1, %v2342_v26, 0.0 }
 0x258   : > { %v1564_v20 = vadd.f32 %v1563_v51, %v6903_v34  ;;  %v2388_v34 = vadd.f32 %v2387_v32, %v2386_v60  ;;  %v2291_v9 = vadd.f32 %v2290_v27, %v2289_v52 }
 0x25a   : > { %v2390_v3 = vadd.f32 %v2389_v13, %v2388_v34 }
 0x260   : > { %v5498_v22 = vpop.f32.mrf.mxu0 }
 0x261   : > { %v7074_v51 = vadd.f32 %v5498_v22, %v1569_v14 }
 0x262   : > { %v2156_v28 = vpop.f32.mrf.mxu0 }
 0x263   : > { %v7062_v36 = vadd.f32 %v2156_v28, %v1564_v20  ;;  %v2345_v26 = vmul.f32 %v7074_v51, %v7074_v51  ;;  %v2294_v6 = vsel %vm661_vm1, %v7074_v51, 0.0 }
 0x265   : > { %v5449_v10 = vpop.f32.mrf.mxu1  ;;  %v2344_v23 = vmul.f32 %v7062_v36, %v7062_v36  ;;  %v2292_v57 = vsel %vm661_vm1, %v7062_v36, 0.0 }
 0x266   : > { %v2293_v28 = vadd.f32 %v2292_v57, %v2291_v9  ;;  %v1579_v22 = vadd.f32 %v5449_v10, %v6905_v31  ;;  %v2395_v31 = vsel %vm661_vm1, %v2345_v26, 0.0 }
 0x267   : > { %v1573_v8 = vpop.f32.mrf.mxu1  ;;  %v2393_v35 = vsel %vm661_vm1, %v2344_v23, 0.0 }
 0x268   : > { %v1574_v55 = vadd.f32 %v1573_v8, %v6907_v58  ;;  %v2392_v58 = vadd.f32 %v2391_v25, %v2390_v3  ;;  %v2295_v52 = vadd.f32 %v2294_v6, %v2293_v28 }
 0x26a   : > { %v2394_v0 = vadd.f32 %v2393_v35, %v2392_v58 }
 0x270   : > { %v5501_v50 = vpop.f32.mrf.mxu0 }
 0x271   : > { %v7090_v8 = vadd.f32 %v5501_v50, %v1579_v22 }
 0x272   : > { %v2166_v62 = vpop.f32.mrf.mxu0 }
 0x273   : > { %v7078_v41 = vadd.f32 %v2166_v62, %v1574_v55  ;;  %v2347_v23 = vmul.f32 %v7090_v8, %v7090_v8  ;;  %v2298_v9 = vsel %vm661_vm1, %v7090_v8, 0.0 }
 0x275   : > { %v5452_v45 = vpop.f32.mrf.mxu1  ;;  %v2346_v20 = vmul.f32 %v7078_v41, %v7078_v41  ;;  %v2296_v32 = vsel %vm661_vm1, %v7078_v41, 0.0 }
 0x276   : > { %v2297_v62 = vadd.f32 %v2296_v32, %v2295_v52  ;;  %v1589_v50 = vadd.f32 %v5452_v45, %v6909_v63  ;;  %v2399_v63 = vsel %vm661_vm1, %v2347_v23, 0.0 }
 0x277   : > { %v1583_v19 = vpop.f32.mrf.mxu1  ;;  %v2397_v10 = vsel %vm661_vm1, %v2346_v20, 0.0 }
 0x278   : > { %v1584_v60 = vadd.f32 %v1583_v19, %v6911_v17  ;;  %v2396_v17 = vadd.f32 %v2395_v31, %v2394_v0  ;;  %v2299_v28 = vadd.f32 %v2298_v9, %v2297_v62 }
 0x27a   : > { %v2398_v27 = vadd.f32 %v2397_v10, %v2396_v17 }
 0x280   : > { %v5504_v54 = vpop.f32.mrf.mxu0 }
 0x281   : > { %v7106_v19 = vadd.f32 %v5504_v54, %v1589_v50 }
 0x282   : > { %v2176_v46 = vpop.f32.mrf.mxu0 }
 0x283   : > { %v7094_v13 = vadd.f32 %v2176_v46, %v1584_v60  ;;  %v2349_v22 = vmul.f32 %v7106_v19, %v7106_v19  ;;  %v2302_v6 = vsel %vm661_vm1, %v7106_v19, 0.0 }
 0x285   : > { %v5455_v49 = vpop.f32.mrf.mxu1  ;;  %v2348_v55 = vmul.f32 %v7094_v13, %v7094_v13  ;;  %v2300_v25 = vsel %vm661_vm1, %v7094_v13, 0.0  ;;  %v2403_v10 = vsel %vm661_vm1, %v2349_v22, 0.0 }
 0x286   : > { %v2301_v46 = vadd.f32 %v2300_v25, %v2299_v28  ;;  %v1599_v54 = vadd.f32 %v5455_v49, %v6913_v24 }
 0x287   : > { %v1593_v34 = vpop.f32.mrf.mxu1  ;;  %v2401_v45 = vsel %vm661_vm1, %v2348_v55, 0.0 }
 0x288   : > { %v1594_v3 = vadd.f32 %v1593_v34, %v6915_v59  ;;  %v2400_v59 = vadd.f32 %v2399_v63, %v2398_v27  ;;  %v2303_v31 = vadd.f32 %v2302_v6, %v2301_v46 }
 0x28a   : > { %v2402_v0 = vadd.f32 %v2401_v45, %v2400_v59 }
 0x28c   : > { %v2404_v62 = vadd.f32 %v2403_v10, %v2402_v0 }
 0x290   : > { %v5507_v11 = vpop.f32.mrf.mxu0 }
 0x291   : > { %v7122_v32 = vadd.f32 %v5507_v11, %v1599_v54 }
 0x292   : > { %v2186_v42 = vpop.f32.mrf.mxu0 }
 0x293   : > { %v7110_v35 = vadd.f32 %v2186_v42, %v1594_v3  ;;  %v2306_v50 = vsel %vm661_vm1, %v7122_v32, 0.0 }
 0x295   : > { %v5458_v14 = vpop.f32.mrf.mxu1  ;;  %v2350_v20 = vmul.f32 %v7110_v35, %v7110_v35  ;;  %v2304_v52 = vsel %vm661_vm1, %v7110_v35, 0.0 }
 0x296   : > { %v2305_v49 = vadd.f32 %v2304_v52, %v2303_v31  ;;  %v1609_v42 = vadd.f32 %v5458_v14, %v6917_v33 }
 0x297   : > { %v1603_v58 = vpop.f32.mrf.mxu1  ;;  %v2405_v24 = vsel %vm661_vm1, %v2350_v20, 0.0 }
 0x298   : > { %v1604_v60 = vadd.f32 %v1603_v58, %v6919_v18  ;;  %v2351_v18 = vmul.f32 %v7122_v32, %v7122_v32  ;;  %v2406_v23 = vadd.f32 %v2405_v24, %v2404_v62  ;;  %v2307_v27 = vadd.f32 %v2306_v50, %v2305_v49 }
 0x29a   : > { %v2407_v25 = vsel %vm661_vm1, %v2351_v18, 0.0 }
 0x29b   : > { %v2408_v33 = vadd.f32 %v2407_v25, %v2406_v23 }
 0x2a0   : > { %v5510_v57 = vpop.f32.mrf.mxu0 }
 0x2a1   : > { %v7137_v55 = vadd.f32 %v5510_v57, %v1609_v42 }
 0x2a2   : > { %v2196_v26 = vpop.f32.mrf.mxu0 }
 0x2a3   : > { %v7126_v34 = vadd.f32 %v2196_v26, %v1604_v60  ;;  %v2353_v45 = vmul.f32 %v7137_v55, %v7137_v55  ;;  %v2310_v22 = vsel %vm661_vm1, %v7137_v55, 0.0 }
 0x2a5   : > { %v5461_v17 = vpop.f32.mrf.mxu1  ;;  %v2352_v11 = vmul.f32 %v7126_v34, %v7126_v34  ;;  %v2308_v3 = vsel %vm661_vm1, %v7126_v34, 0.0  ;;  %v2411_v6 = vsel %vm661_vm1, %v2353_v45, 0.0 }
 0x2a6   : > { %v2309_v58 = vadd.f32 %v2308_v3, %v2307_v27  ;;  %v1619_v46 = vadd.f32 %v5461_v17, %v6921_v48 }
 0x2a7   : > { %v1613_v9 = vpop.f32.mrf.mxu1  ;;  %v2409_v28 = vsel %vm661_vm1, %v2352_v11, 0.0 }
 0x2a8   : > { %v1614_v57 = vadd.f32 %v1613_v9, %v6923_v38  ;;  %v2410_v59 = vadd.f32 %v2409_v28, %v2408_v33  ;;  %v2311_v60 = vadd.f32 %v2310_v22, %v2309_v58 }
 0x2aa   : > { %v2412_v10 = vadd.f32 %v2411_v6, %v2410_v59 }
 0x2b0   : > { %v5513_v14 = vpop.f32.mrf.mxu0  ;;  %v5464_v63 = vpop.f32.mrf.mxu1 }
 0x2b1   : > { %v7149_v54 = vadd.f32 %v5513_v14, %v1619_v46  ;;  %v1629_v52 = vadd.f32 %v5464_v63, %v6925_v2 }
 0x2b2   : > { %v2206_v26 = vpop.f32.mrf.mxu0  ;;  %v1623_v0 = vpop.f32.mrf.mxu1 }
 0x2b3   : > { %v7151_v20 = vadd.f32 %v2206_v26, %v1614_v57  ;;  %v2355_v49 = vmul.f32 %v7149_v54, %v7149_v54  ;;  %v1624_v17 = vadd.f32 %v1623_v0, %v6927_v4  ;;  %v2314_v11 = vsel %vm661_vm1, %v7149_v54, 0.0 }
 0x2b5   : > { %v2312_v48 = vsel %vm661_vm1, %v7151_v20, 0.0  ;;  %v2354_v38 = vmul.f32 %v7151_v20, %v7151_v20  ;;  %v2415_v3 = vsel %vm661_vm1, %v2355_v49, 0.0 }
 0x2b6   : > { %v2313_v31 = vadd.f32 %v2312_v48, %v2311_v60  ;;  %v5516_v24 = vpop.f32.mrf.mxu0 }
 0x2b7   : > { %v2413_v62 = vsel %vm661_vm1, %v2354_v38, 0.0  ;;  %v7163_v18 = vadd.f32 %v5516_v24, %v1629_v52 }
 0x2b8   : > { %v2414_v42 = vadd.f32 %v2413_v62, %v2412_v10  ;;  %v2216_v2 = vpop.f32.mrf.mxu0  ;;  %v2315_v50 = vadd.f32 %v2314_v11, %v2313_v31 }
 0x2b9   : > { %v2255_v23 = vadd.f32 %v2216_v2, %v1624_v17  ;;  %v2357_v27 = vmul.f32 %v7163_v18, %v7163_v18  ;;  %v2318_v4 = vsel %vm661_vm1, %v7163_v18, 0.0 }
 0x2ba   : > { %v2416_v58 = vadd.f32 %v2415_v3, %v2414_v42 }
 0x2bb   : > { %v2316_v9 = vsel %vm661_vm1, %v2255_v23, 0.0  ;;  %v2356_v25 = vmul.f32 %v2255_v23, %v2255_v23  ;;  %v2419_v45 = vsel %vm661_vm1, %v2357_v27, 0.0 }
 0x2bc   : > { %v2317_v28 = vadd.f32 %v2316_v9, %v2315_v50 }
 0x2bd   : > { %v2417_v33 = vsel %vm661_vm1, %v2356_v25, 0.0 }
 0x2be   : > { %v2319_v14 = vadd.f32 %v2318_v4, %v2317_v28  ;;  %v2418_v63 = vadd.f32 %v2417_v33, %v2416_v58 }
 0x2c0   : > { %v2320_v46 = vrot.slane %v2319_v14, 4  ;;  %v2420_v57 = vadd.f32 %v2419_v45, %v2418_v63 }
 0x2c2   : > { %v2321_v59 = vadd.f32 %v2320_v46, %v2319_v14  ;;  %v2421_v26 = vrot.slane %v2420_v57, 4 }
 0x2c4   : > { %v2322_v22 = vrot.slane %v2321_v59, 2  ;;  %v2422_v60 = vadd.f32 %v2421_v26, %v2420_v57 }
 0x2c6   : > { %v2323_v0 = vadd.f32 %v2322_v22, %v2321_v59  ;;  %v2423_v6 = vrot.slane %v2422_v60, 2 }
 0x2c8   : > { %v2324_v52 = vrot.slane %v2323_v0, 1  ;;  %v2424_v48 = vadd.f32 %v2423_v6, %v2422_v60 }
 0x2ca   : > { %v2325_v38 = vadd.f32 %v2324_v52, %v2323_v0  ;;  %v2425_v31 = vrot.slane %v2424_v48, 1 }
 0x2cc   : > { %v2426_v10 = vadd.f32 %v2425_v31, %v2424_v48  ;;  %v7175_v24 = vmul.f32 0.00390625, %v2325_v38 }
 0x2ce   : > { %v2428_v49 = vmul.f32 0.00390625, %v2426_v10  ;;  %v2429_v62 = vmul.f32 %v7175_v24, %v7175_v24  ;;  %v2462_v17 = vsub.f32 %v2255_v23, %v7175_v24  ;;  %v2456_v50 = vsub.f32 %v7110_v35, %v7175_v24  ;;  %v5051_v35 = vld [vmem:[%s8931_s2 + $0x18] sm:$0xf] }
 0x2cf   : > { %v2458_v3 = vsub.f32 %v7126_v34, %v7175_v24  ;;  %v2459_v27 = vsub.f32 %v7137_v55, %v7175_v24  ;;  %v2460_v9 = vsub.f32 %v7151_v20, %v7175_v24  ;;  %v2461_v25 = vsub.f32 %v7149_v54, %v7175_v24  ;;  %5517 = vmatprep.subr.msk.mxu1 %vm1079_vm0, %v5051_v35 }
 0x2d0   : > { %v2430_v42 = vsub.f32 %v2428_v49, %v2429_v62  ;;  %v2463_v23 = vsub.f32 %v7163_v18, %v7175_v24  ;;  %v2433_v28 = vsub.f32 %v6931_v56, %v7175_v24  ;;  %v2432_v55 = vsub.f32 %v6929_v43, %v7175_v24  ;;  %5518 = vmatpush3.msk.msra.mxu1 %vm1079_vm0, %v5051_v35 }
 0x2d1   : > { %v2434_v20 = vsub.f32 %v6933_v1, %v7175_v24  ;;  %v2435_v54 = vsub.f32 %v6946_v39, %v7175_v24  ;;  %v2446_v56 = vsub.f32 %v7030_v5, %v7175_v24  ;;  %v2447_v58 = vsub.f32 %v7042_v61, %v7175_v24  ;;  %v5050_v5 = vld [vmem:[%s8931_s2 + $0x10] sm:$0xff] }
 0x2d2   : > { %v2431_v2 = vmax.f32 %v2430_v42, 0.0  ;;  %v2448_v43 = vsub.f32 %v7046_v30, %v7175_v24  ;;  %v2449_v1 = vsub.f32 %v7058_v53, %v7175_v24  ;;  %v2450_v39 = vsub.f32 %v7062_v36, %v7175_v24  ;;  %5519 = vmatprep.subr.mxu1 %v5050_v5 }
 0x2d3   : > { %v2451_v33 = vsub.f32 %v7074_v51, %v7175_v24  ;;  %v2452_v61 = vsub.f32 %v7078_v41, %v7175_v24  ;;  %v2453_v14 = vsub.f32 %v7090_v8, %v7175_v24  ;;  %v2454_v30 = vsub.f32 %v7094_v13, %v7175_v24  ;;  %5520 = vmatpush3.msra.mxu1 %v5050_v5 }
 0x2d4   : > { %v2464_v11 = vadd.f32 1e-05, %v2431_v2  ;;  %v2455_v36 = vsub.f32 %v7106_v19, %v7175_v24  ;;  %v2457_v51 = vsub.f32 %v7122_v32, %v7175_v24  ;;  %v2440_v35 = vsub.f32 %v6982_v40, %v7175_v24 }
 0x2d6   : > { %5683 = vrsqrt.f32 %v2464_v11  ;;  %v2436_v11 = vsub.f32 %v6950_v37, %v7175_v24 }
 0x2e3   : > { %v7197_v34 = vpop.eup %5683 }
 0x2e4   : > { %v7207_v18 = vmul.f32 %v7197_v34, %v2462_v17  ;;  %v2467_v4 = vmul.f32 %v7197_v34, %v2433_v28  ;;  %v2466_v63 = vmul.f32 %v7197_v34, %v2432_v55  ;;  %v2469_v45 = vmul.f32 %v7197_v34, %v2435_v54 }
 0x2e5   : > { %v7243_v41 = vmul.f32 %v7197_v34, %v2446_v56  ;;  %v7246_v8 = vmul.f32 %v7197_v34, %v2447_v58  ;;  %v7249_v13 = vmul.f32 %v7197_v34, %v2448_v43  ;;  %v7252_v19 = vmul.f32 %v7197_v34, %v2449_v1 }
 0x2e6   : > { %v7232_v53 = vmax.f32 %v2467_v4, 0.0  ;;  %v7255_v32 = vmul.f32 %v7197_v34, %v2450_v39  ;;  %v7258_v46 = vmul.f32 %v7197_v34, %v2451_v33  ;;  %v7261_v57 = vmul.f32 %v7197_v34, %v2452_v61 }
 0x2e7   : > { %v7264_v59 = vmul.f32 %v7197_v34, %v2453_v14  ;;  %v7267_v26 = vmul.f32 %v7197_v34, %v2454_v30  ;;  %v7270_v22 = vmul.f32 %v7197_v34, %v2455_v36  ;;  %v7273_v60 = vmul.f32 %v7197_v34, %v2456_v50 }
 0x2e8   : > { %3054 = vrot.lane.b32.xlu1 %v7232_v53, %s5732_s23  ;;  %v7276_v0 = vmul.f32 %v7197_v34, %v2457_v51  ;;  %v7279_v6 = vmul.f32 %v7197_v34, %v2458_v3  ;;  %v7282_v52 = vmul.f32 %v7197_v34, %v2459_v27  ;;  %v7285_v48 = vmul.f32 %v7197_v34, %v2460_v9 }
 0x2e9   : > { %v7288_v38 = vmul.f32 %v7197_v34, %v2461_v25  ;;  %v2468_v31 = vmul.f32 %v7197_v34, %v2434_v20  ;;  %v7292_v10 = vmul.f32 %v7197_v34, %v2463_v23  ;;  %v7294_v49 = vmax.f32 %v2466_v63, 0.0 }
 0x2ea   : > { %v7296_v62 = vmax.f32 %v2469_v45, 0.0  ;;  %v2437_v17 = vsub.f32 %v6962_v21, %v7175_v24  ;;  %v2470_v21 = vmul.f32 %v7197_v34, %v2436_v11  ;;  %v2439_v3 = vsub.f32 %v6978_v47, %v7175_v24 }
 0x2eb   : > { %3052 = vrot.lane.b32.xlu0 %v7294_v49, %s5732_s23  ;;  %v7305_v2 = vmax.f32 %v2468_v31, 0.0  ;;  %v2438_v9 = vsub.f32 %v6966_v15, %v7175_v24  ;;  %v2441_v23 = vsub.f32 %v6994_v29, %v7175_v24  ;;  %v2474_v29 = vmul.f32 %v7197_v34, %v2440_v35 }
 0x2ec   : > { %3150 = vrot.lane.b32.xlu1 %v7296_v62, %s5731_s22  ;;  %v2471_v42 = vmul.f32 %v7197_v34, %v2437_v17  ;;  %v2473_v37 = vmul.f32 %v7197_v34, %v2439_v3  ;;  %v7323_v27 = vmax.f32 %v2470_v21, 0.0  ;;  %v2443_v20 = vsub.f32 %v7010_v7, %v7175_v24 }
 0x2ed   : > { %v2472_v47 = vmul.f32 %v7197_v34, %v2438_v9  ;;  %v2475_v15 = vmul.f32 %v7197_v34, %v2441_v23  ;;  %v7359_v54 = vmax.f32 %v2474_v29, 0.0  ;;  %v2442_v56 = vsub.f32 %v6998_v12, %v7175_v24 }
 0x2ee   : > { %v7314_v50 = vmax.f32 %v2471_v42, 0.0  ;;  %v7332_v25 = vmax.f32 %v2473_v37, 0.0  ;;  %v2477_v40 = vmul.f32 %v7197_v34, %v2443_v20  ;;  %v2445_v4 = vsub.f32 %v7026_v44, %v7175_v24  ;;  %v5118_v20 = vld [vmem:[%s8931_s2 + $0x20] sm:$0xff] }
 0x2ef   : > { %3148 = vrot.lane.b32.xlu0 %v7305_v2, %s5731_s22  ;;  %v7341_v28 = vmax.f32 %v2472_v47, 0.0  ;;  %v7350_v55 = vmax.f32 %v2475_v15, 0.0  ;;  %v2476_v7 = vmul.f32 %v7197_v34, %v2442_v56  ;;  %v2444_v1 = vsub.f32 %v7014_v16, %v7175_v24  ;;  %v5119_v15 = vld [vmem:[%s8931_s2 + $0x28] sm:$0xf] }
 0x2f0   : > { %3058 = vrot.lane.b32.xlu1 %v7296_v62, %s5732_s23  ;;  %v7368_v58 = vmax.f32 %v2477_v40, 0.0  ;;  %v2479_v12 = vmul.f32 %v7197_v34, %v2445_v4  ;;  %v7399_v16 = vmax.f32 %v7246_v8, 0.0  ;;  %v7406_v24 = vmax.f32 %v7243_v41, 0.0  ;;  %5621 = vmatprep.subr.msk.mxu1 %vm1079_vm0, %v5119_v15 }
 0x2f1   : > { %v7377_v43 = vmax.f32 %v2476_v7, 0.0  ;;  %v2478_v44 = vmul.f32 %v7197_v34, %v2444_v1  ;;  %v7413_v34 = vmax.f32 %v7252_v19, 0.0  ;;  %v7420_v5 = vmax.f32 %v7249_v13, 0.0 }
 0x2f2   : > { %v7386_v39 = vmax.f32 %v2479_v12, 0.0  ;;  %v7427_v61 = vmax.f32 %v7258_v46, 0.0  ;;  %v7434_v14 = vmax.f32 %v7255_v32, 0.0  ;;  %v7441_v30 = vmax.f32 %v7264_v59, 0.0  ;;  %v3051_v59 = vld [vmem:[%s8931_s2 + $0x8] sm:$0xf] }
 0x2f3   : > { %3056 = vrot.lane.b32.xlu0 %v7305_v2, %s5732_s23  ;;  %v7392_v33 = vmax.f32 %v2478_v44, 0.0  ;;  %v7448_v36 = vmax.f32 %v7261_v57, 0.0  ;;  %v7455_v51 = vmax.f32 %v7270_v22, 0.0  ;;  %v7462_v63 = vmax.f32 %v7267_v26, 0.0  ;;  %5569 = vmatprep.subr.msk.mxu0 %vm1079_vm0, %v3051_v59 }
 0x2f4   : > { %3154 = vrot.lane.b32.xlu1 %v7314_v50, %s5731_s22  ;;  %v7469_v45 = vmax.f32 %v7276_v0, 0.0  ;;  %v7476_v41 = vmax.f32 %v7273_v60, 0.0  ;;  %v7483_v8 = vmax.f32 %v7282_v52, 0.0  ;;  %v7490_v13 = vmax.f32 %v7279_v6, 0.0  ;;  %5570 = vmatpush3.msk.msra.mxu0 %vm1079_vm0, %v3051_v59  ;;  %v3050_v0 = vld [vmem:[%s8931_s2] sm:$0xff] }
 0x2f5   : > { %v7497_v19 = vmax.f32 %v7288_v38, 0.0  ;;  %v7504_v32 = vmax.f32 %v7285_v48, 0.0  ;;  %v7511_v57 = vmax.f32 %v7292_v10, 0.0  ;;  %v7522_v22 = vmax.f32 %v7207_v18, 0.0  ;;  %5571 = vmatprep.subr.mxu0 %v3050_v0 }
 0x2f6   : > { %v2597_v6 = vrot.slane %v7294_v49, 7  ;;  %v2598_v52 = vrot.slane %v7232_v53, 7  ;;  %5572 = vmatpush3.msra.mxu0 %v3050_v0  ;;  %v2547_v42 = vrot.slane %v7294_v49, 1  ;;  %v2594_v21 = vrot.slane %v7305_v2, 7 }
 0x2f7   : > { %3152 = vrot.lane.b32.xlu0 %v7323_v27, %s5731_s22  ;;  %v2595_v3 = vrot.slane %v7296_v62, 7  ;;  %v2546_v23 = vrot.slane %v7305_v2, 1  ;;  %v2691_v29 = vrot.slane %v7232_v53, 1 }
 0x2f8   : > { %3062 = vrot.lane.b32.xlu1 %v7314_v50, %s5732_s23  ;;  %v7545_v11 = vsel %vm267_vm4, %v2597_v6, %v2598_v52  ;;  %v7553_v47 = vsel %vm267_vm4, %v2547_v42, %v2597_v6 }
 0x2f9   : > { %v7562_v35 = vsel %vm267_vm4, %v2594_v21, %v2595_v3  ;;  %v7579_v44 = vsel %vm267_vm4, %v2546_v23, %v2594_v21  ;;  %v7591_v59 = vsel %vm363_vm5, %v2547_v42, %v2691_v29  ;;  %v2548_v42 = vrot.slane %v7323_v27, 1 }
 0x2fb   : > { %3060 = vrot.lane.b32.xlu0 %v7323_v27, %s5732_s23 }
 0x2fc   : > { %3158 = vrot.lane.b32.xlu1 %v7332_v25, %s5731_s22 }
 0x2ff   : > { %3156 = vrot.lane.b32.xlu0 %v7341_v28, %s5731_s22 }
 0x300   : > { %3066 = vrot.lane.b32.xlu1 %v7332_v25, %s5732_s23 }
 0x303   : > { %3064 = vrot.lane.b32.xlu0 %v7341_v28, %s5732_s23 }
 0x304   : > { %3162 = vrot.lane.b32.xlu1 %v7350_v55, %s5731_s22 }
 0x307   : > { %3160 = vrot.lane.b32.xlu0 %v7359_v54, %s5731_s22 }
 0x308   : > { %3070 = vrot.lane.b32.xlu1 %v7350_v55, %s5732_s23 }
 0x30b   : > { %3068 = vrot.lane.b32.xlu0 %v7359_v54, %s5732_s23 }
 0x30c   : > { %3166 = vrot.lane.b32.xlu1 %v7368_v58, %s5731_s22 }
 0x30f   : > { %3164 = vrot.lane.b32.xlu0 %v7377_v43, %s5731_s22 }
 0x310   : > { %3074 = vrot.lane.b32.xlu1 %v7368_v58, %s5732_s23 }
 0x313   : > { %3072 = vrot.lane.b32.xlu0 %v7377_v43, %s5732_s23 }
 0x314   : > { %3170 = vrot.lane.b32.xlu1 %v7386_v39, %s5731_s22 }
 0x317   : > { %3168 = vrot.lane.b32.xlu0 %v7392_v33, %s5731_s22 }
 0x318   : > { %3078 = vrot.lane.b32.xlu1 %v7386_v39, %s5732_s23 }
 0x31b   : > { %3076 = vrot.lane.b32.xlu0 %v7392_v33, %s5732_s23 }
 0x31c   : > { %3174 = vrot.lane.b32.xlu1 %v7399_v16, %s5731_s22 }
 0x31f   : > { %3172 = vrot.lane.b32.xlu0 %v7406_v24, %s5731_s22 }
 0x320   : > { %3082 = vrot.lane.b32.xlu1 %v7399_v16, %s5732_s23 }
 0x323   : > { %3080 = vrot.lane.b32.xlu0 %v7406_v24, %s5732_s23 }
 0x324   : > { %3178 = vrot.lane.b32.xlu1 %v7413_v34, %s5731_s22 }
 0x327   : > { %3176 = vrot.lane.b32.xlu0 %v7420_v5, %s5731_s22 }
 0x328   : > { %3086 = vrot.lane.b32.xlu1 %v7413_v34, %s5732_s23 }
 0x32b   : > { %3084 = vrot.lane.b32.xlu0 %v7420_v5, %s5732_s23 }
 0x32c   : > { %3182 = vrot.lane.b32.xlu1 %v7427_v61, %s5731_s22 }
 0x32f   : > { %3180 = vrot.lane.b32.xlu0 %v7434_v14, %s5731_s22 }
 0x330   : > { %3090 = vrot.lane.b32.xlu1 %v7427_v61, %s5732_s23 }
 0x333   : > { %3088 = vrot.lane.b32.xlu0 %v7434_v14, %s5732_s23 }
 0x334   : > { %3186 = vrot.lane.b32.xlu1 %v7441_v30, %s5731_s22 }
 0x337   : > { %3184 = vrot.lane.b32.xlu0 %v7448_v36, %s5731_s22 }
 0x338   : > { %3094 = vrot.lane.b32.xlu1 %v7441_v30, %s5732_s23 }
 0x33b   : > { %3092 = vrot.lane.b32.xlu0 %v7448_v36, %s5732_s23 }
 0x33c   : > { %3190 = vrot.lane.b32.xlu1 %v7455_v51, %s5731_s22 }
 0x33f   : > { %3188 = vrot.lane.b32.xlu0 %v7462_v63, %s5731_s22 }
 0x340   : > { %3098 = vrot.lane.b32.xlu1 %v7455_v51, %s5732_s23 }
 0x343   : > { %3096 = vrot.lane.b32.xlu0 %v7462_v63, %s5732_s23 }
 0x344   : > { %3194 = vrot.lane.b32.xlu1 %v7469_v45, %s5731_s22 }
 0x347   : > { %3192 = vrot.lane.b32.xlu0 %v7476_v41, %s5731_s22 }
 0x348   : > { %3102 = vrot.lane.b32.xlu1 %v7469_v45, %s5732_s23 }
 0x34b   : > { %3100 = vrot.lane.b32.xlu0 %v7476_v41, %s5732_s23 }
 0x34c   : > { %3198 = vrot.lane.b32.xlu1 %v7483_v8, %s5731_s22 }
 0x34f   : > { %3196 = vrot.lane.b32.xlu0 %v7490_v13, %s5731_s22 }
 0x350   : > { %3106 = vrot.lane.b32.xlu1 %v7483_v8, %s5732_s23 }
 0x353   : > { %3104 = vrot.lane.b32.xlu0 %v7490_v13, %s5732_s23 }
 0x354   : > { %3202 = vrot.lane.b32.xlu1 %v7497_v19, %s5731_s22 }
 0x357   : > { %3200 = vrot.lane.b32.xlu0 %v7504_v32, %s5731_s22 }
 0x358   : > { %3110 = vrot.lane.b32.xlu1 %v7497_v19, %s5732_s23 }
 0x35a   : > { %v3055_v46 = vpop.permute.xlu1 %3054 }
 0x35b   : > { %3108 = vrot.lane.b32.xlu0 %v7504_v32, %s5732_s23  ;;  %v3239_v18 = vsel %vm661_vm1, %v7296_v62, %v3055_v46 }
 0x35c   : > { %3206 = vrot.lane.b32.xlu1 %v7511_v57, %s5731_s22 }
 0x35d   : > { %v3053_v26 = vpop.permute.xlu0 %3052 }
 0x35e   : > { %v3151_v60 = vpop.permute.xlu1 %3150  ;;  %v3238_v48 = vsel %vm661_vm1, %v7305_v2, %v3053_v26  ;;  %v2689_v26 = vrot.slane %v7296_v62, 1 }
 0x35f   : > { %3204 = vrot.lane.b32.xlu0 %v7522_v22, %s5731_s22  ;;  %v3271_v38 = vsel %vm694_vm2, %v3239_v18, %v3151_v60 }
 0x360   : > { %3114 = vrot.lane.b32.xlu1 %v7511_v57, %s5732_s23 }
 0x361   : > { %v3149_v31 = vpop.permute.xlu0 %3148 }
 0x362   : > { %v3059_v10 = vpop.permute.xlu1 %3058  ;;  %v3270_v17 = vsel %vm694_vm2, %v3238_v48, %v3149_v31  ;;  %v2601_v31 = vrot.slane %v7314_v50, 7 }
 0x363   : > { %3112 = vrot.lane.b32.xlu0 %v7522_v22, %s5732_s23  ;;  %5521 = vmatprep.mubr.msk.f32.mxu1 %vm982_vm3, %v3270_v17  ;;  %v3241_v40 = vsel %vm661_vm1, %v7232_v53, %v3059_v10  ;;  %v7585_v53 = vsel %vm363_vm5, %v2691_v29, %v2598_v52  ;;  %v7616_v17 = vsel %vm363_vm5, %v2689_v26, %v2595_v3 }
 0x364   : > { %5522 = vmatmul.mubr.msk.f32.vlgmr.msra.gmra.mxu1 %vm982_vm3, %v3271_v38  ;;  %2802 = vrot.lane.b32.xlu1 %v7545_v11, %s5732_s23  ;;  %v7605_v38 = vsel %vm363_vm5, %v2546_v23, %v2689_v26  ;;  %v2603_v26 = vrot.slane %v7341_v28, 7 }
 0x365   : > { %v3057_v37 = vpop.permute.xlu0 %3056  ;;  %5622 = vmatpush3.msk.msra.mxu1 %vm1079_vm0, %v5119_v15 }
 0x366   : > { %v3155_v9 = vpop.permute.xlu1 %3154  ;;  %v3240_v56 = vsel %vm661_vm1, %v7294_v49, %v3057_v37  ;;  %5623 = vmatprep.subr.mxu1 %v5118_v20 }
 0x367   : > { %2800 = vrot.lane.b32.xlu0 %v7553_v47, %s5732_s23  ;;  %v3273_v7 = vsel %vm694_vm2, %v3241_v40, %v3155_v9  ;;  %5624 = vmatpush3.msra.mxu1 %v5118_v20 }
 0x368   : > { %2898 = vrot.lane.b32.xlu1 %v7562_v35, %s5731_s22 }
 0x369   : > { %v3153_v4 = vpop.permute.xlu0 %3152 }
 0x36a   : > { %v3063_v12 = vpop.permute.xlu1 %3062  ;;  %v3272_v1 = vsel %vm694_vm2, %v3240_v56, %v3153_v4  ;;  %v2693_v56 = vrot.slane %v7314_v50, 1 }
 0x36b   : > { %5524 = vmatprep.mubr.msk.f32.mxu1 %vm982_vm3, %v3272_v1  ;;  %2896 = vrot.lane.b32.xlu0 %v7579_v44, %s5731_s22  ;;  %v3243_v60 = vsel %vm661_vm1, %v7296_v62, %v3063_v12  ;;  %v2600_v62 = vrot.slane %v7323_v27, 7 }
 0x36c   : > { %5525 = vmatmul.mubr.msk.f32.gmra.mxu1 %vm982_vm3, %v3273_v7  ;;  %3971 = vrot.lane.b32.xlu1 %v7585_v53, %s5732_s23 }
 0x36d   : > { %v3061_v49 = vpop.permute.xlu0 %3060  ;;  %v7622_v21 = vsel %vm267_vm4, %v2600_v62, %v2601_v31  ;;  %v7633_v20 = vsel %vm267_vm4, %v2548_v42, %v2600_v62 }
 0x36e   : > { %v3159_v46 = vpop.permute.xlu1 %3158  ;;  %v3242_v0 = vsel %vm661_vm1, %v7305_v2, %v3061_v49 }
 0x36f   : > { %3969 = vrot.lane.b32.xlu0 %v7591_v59, %s5732_s23  ;;  %v3275_v6 = vsel %vm694_vm2, %v3243_v60, %v3159_v46  ;;  %v2604_v60 = vrot.slane %v7332_v25, 7 }
 0x370   : > { %2804 = vrot.lane.b32.xlu1 %v7579_v44, %s5732_s23 }
 0x371   : > { %v3157_v52 = vpop.permute.xlu0 %3156 }
 0x372   : > { %v3067_v18 = vpop.permute.xlu1 %3066  ;;  %v3274_v48 = vsel %vm694_vm2, %v3242_v0, %v3157_v52  ;;  %v7664_v52 = vsel %vm363_vm5, %v2693_v56, %v2601_v31 }
 0x373   : > { %5527 = vmatprep.mubr.msk.f32.mxu1 %vm982_vm3, %v3274_v48  ;;  %4065 = vrot.lane.b32.xlu0 %v7605_v38, %s5731_s22  ;;  %v3245_v37 = vsel %vm661_vm1, %v7314_v50, %v3067_v18  ;;  %v7653_v50 = vsel %vm363_vm5, %v2548_v42, %v2693_v56  ;;  %v2549_v18 = vrot.slane %v7341_v28, 1  ;;  %v7670_v48 = vsel %vm267_vm4, %v2603_v26, %v2604_v60 }
 0x374   : > { %5528 = vmatmul.mubr.msk.f32.gmra.mxu1 %vm982_vm3, %v3275_v6  ;;  %2806 = vrot.lane.b32.xlu1 %v7562_v35, %s5732_s23 }
 0x375   : > { %v3065_v2 = vpop.permute.xlu0 %3064 }
 0x376   : > { %v3163_v10 = vpop.permute.xlu1 %3162  ;;  %v3244_v9 = vsel %vm661_vm1, %v7323_v27, %v3065_v2 }
 0x377   : > { %4067 = vrot.lane.b32.xlu0 %v7616_v17, %s5731_s22  ;;  %v3277_v3 = vsel %vm694_vm2, %v3245_v37, %v3163_v10  ;;  %v7681_v37 = vsel %vm267_vm4, %v2549_v18, %v2603_v26  ;;  %v2550_v26 = vrot.slane %v7359_v54, 1 }
 0x378   : > { %2902 = vrot.lane.b32.xlu1 %v7622_v21, %s5731_s22 }
 0x379   : > { %v3161_v23 = vpop.permute.xlu0 %3160 }
 0x37a   : > { %v3071_v15 = vpop.permute.xlu1 %3070  ;;  %v3276_v29 = vsel %vm694_vm2, %v3244_v9, %v3161_v23  ;;  %v2695_v23 = vrot.slane %v7332_v25, 1 }
 0x37b   : > { %5530 = vmatprep.mubr.msk.f32.mxu1 %vm982_vm3, %v3276_v29  ;;  %2900 = vrot.lane.b32.xlu0 %v7633_v20, %s5731_s22  ;;  %v3247_v7 = vsel %vm661_vm1, %v7332_v25, %v3071_v15 }
 0x37c   : > { %5531 = vmatmul.mubr.msk.f32.gmra.mxu1 %vm982_vm3, %v3277_v3  ;;  %3975 = vrot.lane.b32.xlu1 %v7616_v17, %s5732_s23  ;;  %v7701_v25 = vsel %vm363_vm5, %v2549_v18, %v2695_v23 }
 0x37d   : > { %v3069_v27 = vpop.permute.xlu0 %3068 }
 0x37e   : > { %v3167_v40 = vpop.permute.xlu1 %3166  ;;  %v3246_v4 = vsel %vm661_vm1, %v7341_v28, %v3069_v27 }
 0x37f   : > { %3973 = vrot.lane.b32.xlu0 %v7605_v38, %s5732_s23  ;;  %v3279_v12 = vsel %vm694_vm2, %v3247_v7, %v3167_v40 }
 0x380   : > { %2808 = vrot.lane.b32.xlu1 %v7633_v20, %s5732_s23 }
 0x381   : > { %v3165_v1 = vpop.permute.xlu0 %3164 }
 0x382   : > { %v3075_v49 = vpop.permute.xlu1 %3074  ;;  %v3278_v46 = vsel %vm694_vm2, %v3246_v4, %v3165_v1  ;;  %v2606_v4 = vrot.slane %v7359_v54, 7 }
 0x383   : > { %5533 = vmatprep.mubr.msk.f32.mxu1 %vm982_vm3, %v3278_v46  ;;  %4069 = vrot.lane.b32.xlu0 %v7653_v50, %s5731_s22  ;;  %v3249_v62 = vsel %vm661_vm1, %v7350_v55, %v3075_v49  ;;  %v7712_v46 = vsel %vm363_vm5, %v2695_v23, %v2604_v60 }
 0x384   : > { %5534 = vmatmul.mubr.msk.f32.gmra.mxu1 %vm982_vm3, %v3279_v12  ;;  %2810 = vrot.lane.b32.xlu1 %v7622_v21, %s5732_s23  ;;  %v2607_v12 = vrot.slane %v7350_v55, 7 }
 0x385   : > { %v3073_v0 = vpop.permute.xlu0 %3072 }
 0x386   : > { %v3171_v6 = vpop.permute.xlu1 %3170  ;;  %v3248_v2 = vsel %vm661_vm1, %v7359_v54, %v3073_v0  ;;  %v7718_v0 = vsel %vm267_vm4, %v2606_v4, %v2607_v12 }
 0x387   : > { %4071 = vrot.lane.b32.xlu0 %v7664_v52, %s5731_s22  ;;  %v3281_v31 = vsel %vm694_vm2, %v3249_v62, %v3171_v6 }
 0x388   : > { %2906 = vrot.lane.b32.xlu1 %v7670_v48, %s5731_s22 }
 0x389   : > { %v3169_v10 = vpop.permute.xlu0 %3168 }
 0x38a   : > { %v3079_v42 = vpop.permute.xlu1 %3078  ;;  %v3280_v28 = vsel %vm694_vm2, %v3248_v2, %v3169_v10 }
 0x38b   : > { %5536 = vmatprep.mubr.msk.f32.mxu1 %vm982_vm3, %v3280_v28  ;;  %2904 = vrot.lane.b32.xlu0 %v7681_v37, %s5731_s22  ;;  %v3251_v15 = vsel %vm661_vm1, %v7368_v58, %v3079_v42  ;;  %v2697_v28 = vrot.slane %v7350_v55, 1 }
 0x38c   : > { %5537 = vmatmul.mubr.msk.f32.gmra.mxu1 %vm982_vm3, %v3281_v31  ;;  %3979 = vrot.lane.b32.xlu1 %v7664_v52, %s5732_s23  ;;  %v7729_v31 = vsel %vm267_vm4, %v2550_v26, %v2606_v4 }
 0x38d   : > { %v3077_v9 = vpop.permute.xlu0 %3076  ;;  %v7749_v55 = vsel %vm363_vm5, %v2550_v26, %v2697_v28 }
 0x38e   : > { %v3175_v3 = vpop.permute.xlu1 %3174  ;;  %v3250_v29 = vsel %vm661_vm1, %v7377_v43, %v3077_v9 }
 0x38f   : > { %3977 = vrot.lane.b32.xlu0 %v7653_v50, %s5732_s23  ;;  %v3283_v27 = vsel %vm694_vm2, %v3251_v15, %v3175_v3 }
 0x390   : > { %2812 = vrot.lane.b32.xlu1 %v7681_v37, %s5732_s23 }
 0x391   : > { %v3173_v40 = vpop.permute.xlu0 %3172 }
 0x392   : > { %v3083_v56 = vpop.permute.xlu1 %3082  ;;  %v3282_v7 = vsel %vm694_vm2, %v3250_v29, %v3173_v40  ;;  %v2609_v40 = vrot.slane %v7377_v43, 7 }
 0x393   : > { %5539 = vmatprep.mubr.msk.f32.mxu1 %vm982_vm3, %v3282_v7  ;;  %4073 = vrot.lane.b32.xlu0 %v7701_v25, %s5731_s22  ;;  %v3253_v6 = vsel %vm661_vm1, %v7386_v39, %v3083_v56  ;;  %v2610_v56 = vrot.slane %v7368_v58, 7 }
 0x394   : > { %5540 = vmatmul.mubr.msk.f32.gmra.mxu1 %vm982_vm3, %v3283_v27  ;;  %2814 = vrot.lane.b32.xlu1 %v7670_v48, %s5732_s23 }
 0x395   : > { %v3081_v1 = vpop.permute.xlu0 %3080  ;;  %v7766_v26 = vsel %vm267_vm4, %v2609_v40, %v2610_v56 }
 0x396   : > { %v3179_v49 = vpop.permute.xlu1 %3178  ;;  %v3252_v18 = vsel %vm661_vm1, %v7392_v33, %v3081_v1  ;;  %v7760_v1 = vsel %vm363_vm5, %v2697_v28, %v2607_v12 }
 0x397   : > { %4075 = vrot.lane.b32.xlu0 %v7712_v46, %s5731_s22  ;;  %v3285_v60 = vsel %vm694_vm2, %v3253_v6, %v3179_v49  ;;  %v2551_v49 = vrot.slane %v7377_v43, 1 }
 0x398   : > { %2910 = vrot.lane.b32.xlu1 %v7718_v0, %s5731_s22 }
 0x399   : > { %v3177_v62 = vpop.permute.xlu0 %3176 }
 0x39a   : > { %v3087_v2 = vpop.permute.xlu1 %3086  ;;  %v3284_v54 = vsel %vm694_vm2, %v3252_v18, %v3177_v62 }
 0x39b   : > { %5542 = vmatprep.mubr.msk.f32.mxu1 %vm982_vm3, %v3284_v54  ;;  %2908 = vrot.lane.b32.xlu0 %v7729_v31, %s5731_s22  ;;  %v3255_v9 = vsel %vm661_vm1, %v7399_v16, %v3087_v2  ;;  %v7777_v2 = vsel %vm267_vm4, %v2551_v49, %v2609_v40  ;;  %v2613_v40 = vrot.slane %v7386_v39, 7 }
 0x39c   : > { %5543 = vmatmul.mubr.msk.f32.gmra.mxu1 %vm982_vm3, %v3285_v60  ;;  %3983 = vrot.lane.b32.xlu1 %v7712_v46, %s5732_s23 }
 0x39d   : > { %v3085_v10 = vpop.permute.xlu0 %3084 }
 0x39e   : > { %v3183_v42 = vpop.permute.xlu1 %3182  ;;  %v3254_v3 = vsel %vm661_vm1, %v7406_v24, %v3085_v10 }
 0x39f   : > { %3981 = vrot.lane.b32.xlu0 %v7701_v25, %s5732_s23  ;;  %v3287_v23 = vsel %vm694_vm2, %v3255_v9, %v3183_v42  ;;  %v2699_v42 = vrot.slane %v7368_v58, 1 }
 0x3a0   : > { %2816 = vrot.lane.b32.xlu1 %v7729_v31, %s5732_s23 }
 0x3a1   : > { %v3181_v15 = vpop.permute.xlu0 %3180  ;;  %v7797_v58 = vsel %vm363_vm5, %v2551_v49, %v2699_v42  ;;  %v2552_v49 = vrot.slane %v7392_v33, 1 }
 0x3a2   : > { %v3091_v29 = vpop.permute.xlu1 %3090  ;;  %v3286_v27 = vsel %vm694_vm2, %v3254_v3, %v3181_v15 }
 0x3a3   : > { %5545 = vmatprep.mubr.msk.f32.mxu1 %vm982_vm3, %v3286_v27  ;;  %4077 = vrot.lane.b32.xlu0 %v7749_v55, %s5731_s22  ;;  %v3257_v6 = vsel %vm661_vm1, %v7413_v34, %v3091_v29  ;;  %v2612_v27 = vrot.slane %v7392_v33, 7 }
 0x3a4   : > { %5546 = vmatmul.mubr.msk.f32.gmra.mxu1 %vm982_vm3, %v3287_v23  ;;  %2818 = vrot.lane.b32.xlu1 %v7718_v0, %s5732_s23 }
 0x3a5   : > { %v3089_v7 = vpop.permute.xlu0 %3088 }
 0x3a6   : > { %v3187_v4 = vpop.permute.xlu1 %3186  ;;  %v3256_v18 = vsel %vm661_vm1, %v7420_v5, %v3089_v7 }
 0x3a7   : > { %4079 = vrot.lane.b32.xlu0 %v7760_v1, %s5731_s22  ;;  %v3289_v12 = vsel %vm694_vm2, %v3257_v6, %v3187_v4  ;;  %v7808_v6 = vsel %vm363_vm5, %v2699_v42, %v2610_v56 }
 0x3a8   : > { %2914 = vrot.lane.b32.xlu1 %v7766_v26, %s5731_s22 }
 0x3a9   : > { %v3185_v60 = vpop.permute.xlu0 %3184 }
 0x3aa   : > { %v3095_v62 = vpop.permute.xlu1 %3094  ;;  %v3288_v43 = vsel %vm694_vm2, %v3256_v18, %v3185_v60  ;;  %v7814_v18 = vsel %vm267_vm4, %v2612_v27, %v2613_v40 }
 0x3ab   : > { %5548 = vmatprep.mubr.msk.f32.mxu1 %vm982_vm3, %v3288_v43  ;;  %2912 = vrot.lane.b32.xlu0 %v7777_v2, %s5731_s22  ;;  %v3259_v28 = vsel %vm661_vm1, %v7427_v61, %v3095_v62 }
 0x3ac   : > { %5549 = vmatmul.mubr.msk.f32.gmra.mxu1 %vm982_vm3, %v3289_v12  ;;  %3987 = vrot.lane.b32.xlu1 %v7760_v1, %s5732_s23 }
 0x3ad   : > { %v3093_v54 = vpop.permute.xlu0 %3092 }
 0x3ae   : > { %v3191_v10 = vpop.permute.xlu1 %3190  ;;  %v3258_v9 = vsel %vm661_vm1, %v7434_v14, %v3093_v54  ;;  %v7825_v54 = vsel %vm267_vm4, %v2552_v49, %v2612_v27 }
 0x3af   : > { %3985 = vrot.lane.b32.xlu0 %v7749_v55, %s5732_s23  ;;  %v3291_v3 = vsel %vm694_vm2, %v3259_v28, %v3191_v10  ;;  %v2701_v28 = vrot.slane %v7386_v39, 1 }
 0x3b0   : > { %2820 = vrot.lane.b32.xlu1 %v7777_v2, %s5732_s23 }
 0x3b1   : > { %v3189_v23 = vpop.permute.xlu0 %3188  ;;  %v7845_v39 = vsel %vm363_vm5, %v2552_v49, %v2701_v28  ;;  %v2553_v49 = vrot.slane %v7406_v24, 1 }
 0x3b2   : > { %v3099_v15 = vpop.permute.xlu1 %3098  ;;  %v3290_v29 = vsel %vm694_vm2, %v3258_v9, %v3189_v23 }
 0x3b3   : > { %5551 = vmatprep.mubr.msk.f32.mxu1 %vm982_vm3, %v3290_v29  ;;  %4081 = vrot.lane.b32.xlu0 %v7797_v58, %s5731_s22  ;;  %v3261_v12 = vsel %vm661_vm1, %v7441_v30, %v3099_v15 }
 0x3b4   : > { %5552 = vmatmul.mubr.msk.f32.gmra.mxu1 %vm982_vm3, %v3291_v3  ;;  %2822 = vrot.lane.b32.xlu1 %v7766_v26, %s5732_s23 }
 0x3b5   : > { %v3097_v7 = vpop.permute.xlu0 %3096 }
 0x3b6   : > { %v3195_v4 = vpop.permute.xlu1 %3194  ;;  %v3260_v60 = vsel %vm661_vm1, %v7448_v36, %v3097_v7  ;;  %v2615_v7 = vrot.slane %v7406_v24, 7 }
 0x3b7   : > { %4083 = vrot.lane.b32.xlu0 %v7808_v6, %s5731_s22  ;;  %v3293_v56 = vsel %vm694_vm2, %v3261_v12, %v3195_v4  ;;  %v2616_v4 = vrot.slane %v7399_v16, 7 }
 0x3b8   : > { %2918 = vrot.lane.b32.xlu1 %v7814_v18, %s5731_s22 }
 0x3b9   : > { %v3193_v62 = vpop.permute.xlu0 %3192 }
 0x3ba   : > { %v3103_v43 = vpop.permute.xlu1 %3102  ;;  %v3292_v33 = vsel %vm694_vm2, %v3260_v60, %v3193_v62  ;;  %v7862_v62 = vsel %vm267_vm4, %v2615_v7, %v2616_v4 }
 0x3bb   : > { %5554 = vmatprep.mubr.msk.f32.mxu1 %vm982_vm3, %v3292_v33  ;;  %2916 = vrot.lane.b32.xlu0 %v7825_v54, %s5731_s22  ;;  %v3263_v9 = vsel %vm661_vm1, %v7455_v51, %v3103_v43 }
 0x3bc   : > { %5555 = vmatmul.mubr.msk.f32.gmra.mxu1 %vm982_vm3, %v3293_v56  ;;  %3991 = vrot.lane.b32.xlu1 %v7808_v6, %s5732_s23  ;;  %v7856_v56 = vsel %vm363_vm5, %v2701_v28, %v2613_v40  ;;  %v7873_v28 = vsel %vm267_vm4, %v2553_v49, %v2615_v7 }
 0x3bd   : > { %v3101_v10 = vpop.permute.xlu0 %3100 }
 0x3be   : > { %v3199_v42 = vpop.permute.xlu1 %3198  ;;  %v3262_v3 = vsel %vm661_vm1, %v7462_v63, %v3101_v10 }
 0x3bf   : > { %3989 = vrot.lane.b32.xlu0 %v7797_v58, %s5732_s23  ;;  %v3295_v23 = vsel %vm694_vm2, %v3263_v9, %v3199_v42 }
 0x3c0   : > { %2824 = vrot.lane.b32.xlu1 %v7825_v54, %s5732_s23 }
 0x3c1   : > { %v3197_v15 = vpop.permute.xlu0 %3196 }
 0x3c2   : > { %v3107_v29 = vpop.permute.xlu1 %3106  ;;  %v3294_v27 = vsel %vm694_vm2, %v3262_v3, %v3197_v15 }
 0x3c3   : > { %5557 = vmatprep.mubr.msk.f32.mxu1 %vm982_vm3, %v3294_v27  ;;  %4085 = vrot.lane.b32.xlu0 %v7845_v39, %s5731_s22  ;;  %v3265_v43 = vsel %vm661_vm1, %v7469_v45, %v3107_v29 }
 0x3c4   : > { %5558 = vmatmul.mubr.msk.f32.gmra.mxu1 %vm982_vm3, %v3295_v23  ;;  %2826 = vrot.lane.b32.xlu1 %v7814_v18, %s5732_s23  ;;  %v2703_v23 = vrot.slane %v7399_v16, 1 }
 0x3c5   : > { %v3105_v12 = vpop.permute.xlu0 %3104 }
 0x3c6   : > { %v3203_v60 = vpop.permute.xlu1 %3202  ;;  %v3264_v33 = vsel %vm661_vm1, %v7476_v41, %v3105_v12  ;;  %v7893_v16 = vsel %vm363_vm5, %v2553_v49, %v2703_v23 }
 0x3c7   : > { %4087 = vrot.lane.b32.xlu0 %v7856_v56, %s5731_s22  ;;  %v3297_v40 = vsel %vm694_vm2, %v3265_v43, %v3203_v60 }
 0x3c8   : > { %2922 = vrot.lane.b32.xlu1 %v7862_v62, %s5731_s22 }
 0x3c9   : > { %v3201_v10 = vpop.permute.xlu0 %3200 }
 0x3ca   : > { %v3111_v42 = vpop.permute.xlu1 %3110  ;;  %v3296_v24 = vsel %vm694_vm2, %v3264_v33, %v3201_v10 }
 0x3cb   : > { %5560 = vmatprep.mubr.msk.f32.mxu1 %vm982_vm3, %v3296_v24  ;;  %2920 = vrot.lane.b32.xlu0 %v7873_v28, %s5731_s22  ;;  %v3267_v15 = vsel %vm661_vm1, %v7483_v8, %v3111_v42  ;;  %v2619_v42 = vrot.slane %v7413_v34, 7 }
 0x3cc   : > { %5561 = vmatmul.mubr.msk.f32.gmra.mxu1 %vm982_vm3, %v3297_v40  ;;  %3995 = vrot.lane.b32.xlu1 %v7856_v56, %s5732_s23  ;;  %v2618_v40 = vrot.slane %v7420_v5, 7 }
 0x3cd   : > { %v3109_v9 = vpop.permute.xlu0 %3108 }
 0x3ce   : > { %v3207_v3 = vpop.permute.xlu1 %3206  ;;  %v3266_v29 = vsel %vm661_vm1, %v7490_v13, %v3109_v9  ;;  %v7908_v9 = vsel %vm363_vm5, %v2703_v23, %v2616_v4 }
 0x3cf   : > { %3993 = vrot.lane.b32.xlu0 %v7845_v39, %s5732_s23  ;;  %v3299_v27 = vsel %vm694_vm2, %v3267_v15, %v3207_v3 }
 0x3d0   : > { %2828 = vrot.lane.b32.xlu1 %v7873_v28, %s5732_s23 }
 0x3d1   : > { %v3205_v7 = vpop.permute.xlu0 %3204 }
 0x3d2   : > { %v3115_v12 = vpop.permute.xlu1 %3114  ;;  %v3298_v43 = vsel %vm694_vm2, %v3266_v29, %v3205_v7  ;;  %v2554_v29 = vrot.slane %v7420_v5, 1  ;;  %v7916_v7 = vsel %vm267_vm4, %v2618_v40, %v2619_v42 }
 0x3d3   : > { %5563 = vmatprep.mubr.msk.f32.mxu1 %vm982_vm3, %v3298_v43  ;;  %4089 = vrot.lane.b32.xlu0 %v7893_v16, %s5731_s22  ;;  %v3269_v33 = vsel %vm661_vm1, %v7497_v19, %v3115_v12 }
 0x3d4   : > { %5564 = vmatmul.mubr.msk.f32.gmra.mxu1 %vm982_vm3, %v3299_v27  ;;  %2830 = vrot.lane.b32.xlu1 %v7862_v62, %s5732_s23  ;;  %v3301_v3 = vsel %vm694_vm2, %v3269_v33, %v3203_v60  ;;  %v7923_v60 = vsel %vm267_vm4, %v2554_v29, %v2618_v40 }
 0x3d5   : > { %v3113_v24 = vpop.permute.xlu0 %3112 }
 0x3d6   : > { %v3268_v49 = vsel %vm661_vm1, %v7504_v32, %v3113_v24  ;;  %v2803_v15 = vpop.permute.xlu1 %2802  ;;  %v2705_v24 = vrot.slane %v7413_v34, 1  ;;  %v2621_v34 = vrot.slane %v7434_v14, 7 }
 0x3d7   : > { %4091 = vrot.lane.b32.xlu0 %v7908_v9, %s5731_s22  ;;  %v3300_v27 = vsel %vm694_vm2, %v3268_v49, %v3201_v10  ;;  %v2987_v10 = vsel %vm661_vm1, %v7562_v35, %v2803_v15 }
 0x3d8   : > { %5566 = vmatprep.mubr.msk.f32.mxu1 %vm982_vm3, %v3300_v27  ;;  %2926 = vrot.lane.b32.xlu1 %v7916_v7, %s5731_s22  ;;  %v2622_v27 = vrot.slane %v7427_v61, 7 }
 0x3d9   : > { %5567 = vmatmul.mubr.msk.f32.gmra.mxu1 %vm982_vm3, %v3301_v3  ;;  %v2801_v4 = vpop.permute.xlu0 %2800  ;;  %v7943_v3 = vsel %vm363_vm5, %v2554_v29, %v2705_v24  ;;  %v7955_v29 = vsel %vm363_vm5, %v2705_v24, %v2619_v42 }
 0x3da   : > { %v2899_v5 = vpop.permute.xlu1 %2898  ;;  %v2986_v23 = vsel %vm661_vm1, %v7579_v44, %v2801_v4 }
 0x3db   : > { %2924 = vrot.lane.b32.xlu0 %v7923_v60, %s5731_s22  ;;  %v3019_v12 = vsel %vm694_vm2, %v2987_v10, %v2899_v5 }
 0x3dc   : > { %3999 = vrot.lane.b32.xlu1 %v7908_v9, %s5732_s23 }
 0x3dd   : > { %v2897_v43 = vpop.permute.xlu0 %2896 }
 0x3de   : > { %v3018_v33 = vsel %vm694_vm2, %v2986_v23, %v2897_v43  ;;  %v3972_v40 = vpop.permute.xlu1 %3971  ;;  %v7962_v43 = vsel %vm267_vm4, %v2621_v34, %v2622_v27 }
 0x3df   : > { %3997 = vrot.lane.b32.xlu0 %v7893_v16, %s5732_s23  ;;  %5573 = vmatprep.mubr.msk.f32.mxu0 %vm982_vm3, %v3018_v33  ;;  %v4156_v33 = vsel %vm661_vm1, %v7616_v17, %v3972_v40 }
 0x3e0   : > { %5574 = vmatmul.mubr.msk.f32.vlgmr.msra.gmra.mxu0 %vm982_vm3, %v3019_v12  ;;  %2832 = vrot.lane.b32.xlu1 %v7923_v60, %s5732_s23  ;;  %v2555_v12 = vrot.slane %v7434_v14, 1 }
 0x3e1   : > { %v3970_v49 = vpop.permute.xlu0 %3969 }
 0x3e2   : > { %v2805_v15 = vpop.permute.xlu1 %2804  ;;  %v4155_v4 = vsel %vm661_vm1, %v7605_v38, %v3970_v49  ;;  %v7970_v24 = vsel %vm267_vm4, %v2555_v12, %v2621_v34 }
 0x3e3   : > { %4093 = vrot.lane.b32.xlu0 %v7943_v3, %s5731_s22  ;;  %v2988_v40 = vsel %vm661_vm1, %v7553_v47, %v2805_v15 }
 0x3e4   : > { %2834 = vrot.lane.b32.xlu1 %v7916_v7, %s5732_s23 }
 0x3e5   : > { %v4066_v5 = vpop.permute.xlu0 %4065 }
 0x3e6   : > { %v4187_v10 = vsel %vm694_vm2, %v4155_v4, %v4066_v5  ;;  %v2807_v23 = vpop.permute.xlu1 %2806 }
 0x3e7   : > { %4095 = vrot.lane.b32.xlu0 %v7955_v29, %s5731_s22  ;;  %5625 = vmatprep.mubr.msk.f32.mxu1 %vm982_vm3, %v4187_v10  ;;  %v2989_v4 = vsel %vm661_vm1, %v7545_v11, %v2807_v23  ;;  %v2625_v23 = vrot.slane %v7441_v30, 7 }
 0x3e8   : > { %2930 = vrot.lane.b32.xlu1 %v7962_v43, %s5731_s22 }
 0x3e9   : > { %v4068_v49 = vpop.permute.xlu0 %4067 }
 0x3ea   : > { %v4188_v42 = vsel %vm694_vm2, %v4156_v33, %v4068_v49  ;;  %v2903_v14 = vpop.permute.xlu1 %2902  ;;  %v2707_v49 = vrot.slane %v7427_v61, 1  ;;  %v2624_v61 = vrot.slane %v7448_v36, 7 }
 0x3eb   : > { %2928 = vrot.lane.b32.xlu0 %v7970_v24, %s5731_s22  ;;  %5626 = vmatmul.mubr.msk.f32.vlgmr.msra.gmra.mxu1 %vm982_vm3, %v4188_v42  ;;  %v3021_v5 = vsel %vm694_vm2, %v2989_v4, %v2903_v14 }
 0x3ec   : > { %4003 = vrot.lane.b32.xlu1 %v7955_v29, %s5732_s23  ;;  %v7991_v47 = vsel %vm363_vm5, %v2555_v12, %v2707_v49  ;;  %v8003_v12 = vsel %vm363_vm5, %v2707_v49, %v2622_v27 }
 0x3ed   : > { %v2901_v10 = vpop.permute.xlu0 %2900 }
 0x3ee   : > { %v3020_v34 = vsel %vm694_vm2, %v2988_v40, %v2901_v10  ;;  %v3976_v33 = vpop.permute.xlu1 %3975  ;;  %v8010_v10 = vsel %vm267_vm4, %v2624_v61, %v2625_v23 }
 0x3ef   : > { %4001 = vrot.lane.b32.xlu0 %v7943_v3, %s5732_s23  ;;  %5576 = vmatprep.mubr.msk.f32.mxu0 %vm982_vm3, %v3020_v34 }
 0x3f0   : > { %5577 = vmatmul.mubr.msk.f32.gmra.mxu0 %vm982_vm3, %v3021_v5  ;;  %2836 = vrot.lane.b32.xlu1 %v7970_v24, %s5732_s23  ;;  %v2556_v5 = vrot.slane %v7448_v36, 1 }
 0x3f1   : > { %v3974_v11 = vpop.permute.xlu0 %3973 }
 0x3f2   : > { %v2809_v15 = vpop.permute.xlu1 %2808  ;;  %v4157_v42 = vsel %vm661_vm1, %v7591_v59, %v3974_v11  ;;  %v4158_v59 = vsel %vm661_vm1, %v7585_v53, %v3976_v33  ;;  %v8018_v49 = vsel %vm267_vm4, %v2556_v5, %v2624_v61 }
 0x3f3   : > { %4097 = vrot.lane.b32.xlu0 %v7991_v47, %s5731_s22  ;;  %v2990_v53 = vsel %vm661_vm1, %v7579_v44, %v2809_v15 }
 0x3f4   : > { %2838 = vrot.lane.b32.xlu1 %v7962_v43, %s5732_s23 }
 0x3f5   : > { %v4070_v14 = vpop.permute.xlu0 %4069 }
 0x3f6   : > { %v4189_v4 = vsel %vm694_vm2, %v4157_v42, %v4070_v14  ;;  %v2811_v40 = vpop.permute.xlu1 %2810 }
 0x3f7   : > { %4099 = vrot.lane.b32.xlu0 %v8003_v12, %s5731_s22  ;;  %5628 = vmatprep.mubr.msk.f32.mxu1 %vm982_vm3, %v4189_v4  ;;  %v2991_v11 = vsel %vm661_vm1, %v7562_v35, %v2811_v40  ;;  %v2709_v4 = vrot.slane %v7441_v30, 1  ;;  %v2627_v30 = vrot.slane %v7462_v63, 7  ;;  %v2628_v40 = vrot.slane %v7455_v51, 7 }
 0x3f8   : > { %2934 = vrot.lane.b32.xlu1 %v8010_v10, %s5731_s22 }
 0x3f9   : > { %v4072_v34 = vpop.permute.xlu0 %4071  ;;  %v8039_v44 = vsel %vm363_vm5, %v2556_v5, %v2709_v4  ;;  %v8051_v5 = vsel %vm363_vm5, %v2709_v4, %v2625_v23 }
 0x3fa   : > { %v4190_v27 = vsel %vm694_vm2, %v4158_v59, %v4072_v34  ;;  %v2907_v36 = vpop.permute.xlu1 %2906 }
 0x3fb   : > { %2932 = vrot.lane.b32.xlu0 %v8018_v49, %s5731_s22  ;;  %5629 = vmatmul.mubr.msk.f32.gmra.mxu1 %vm982_vm3, %v4190_v27  ;;  %v3023_v33 = vsel %vm694_vm2, %v2991_v11, %v2907_v36  ;;  %v2557_v11 = vrot.slane %v7462_v63, 1 }
 0x3fc   : > { %4007 = vrot.lane.b32.xlu1 %v8003_v12, %s5732_s23 }
 0x3fd   : > { %v2905_v42 = vpop.permute.xlu0 %2904 }
 0x3fe   : > { %v3022_v61 = vsel %vm694_vm2, %v2990_v53, %v2905_v42  ;;  %v3980_v14 = vpop.permute.xlu1 %3979  ;;  %v8058_v53 = vsel %vm267_vm4, %v2627_v30, %v2628_v40  ;;  %v8066_v42 = vsel %vm267_vm4, %v2557_v11, %v2627_v30 }
 0x3ff   : > { %4005 = vrot.lane.b32.xlu0 %v7991_v47, %s5732_s23  ;;  %5579 = vmatprep.mubr.msk.f32.mxu0 %vm982_vm3, %v3022_v61 }
 0x400   : > { %5580 = vmatmul.mubr.msk.f32.gmra.mxu0 %vm982_vm3, %v3023_v33  ;;  %2840 = vrot.lane.b32.xlu1 %v8018_v49, %s5732_s23 }
 0x401   : > { %v3978_v35 = vpop.permute.xlu0 %3977 }
 0x402   : > { %v2813_v15 = vpop.permute.xlu1 %2812  ;;  %v4159_v59 = vsel %vm661_vm1, %v7605_v38, %v3978_v35  ;;  %v4160_v38 = vsel %vm661_vm1, %v7616_v17, %v3980_v14 }
 0x403   : > { %4101 = vrot.lane.b32.xlu0 %v8039_v44, %s5731_s22  ;;  %v2992_v17 = vsel %vm661_vm1, %v7633_v20, %v2813_v15 }
 0x404   : > { %2842 = vrot.lane.b32.xlu1 %v8010_v10, %s5732_s23 }
 0x405   : > { %v4074_v34 = vpop.permute.xlu0 %4073 }
 0x406   : > { %v4191_v27 = vsel %vm694_vm2, %v4159_v59, %v4074_v34  ;;  %v2815_v36 = vpop.permute.xlu1 %2814  ;;  %v2711_v59 = vrot.slane %v7455_v51, 1  ;;  %v2630_v51 = vrot.slane %v7476_v41, 7  ;;  %v2631_v34 = vrot.slane %v7469_v45, 7 }
 0x407   : > { %4103 = vrot.lane.b32.xlu0 %v8051_v5, %s5731_s22  ;;  %5631 = vmatprep.mubr.msk.f32.mxu1 %vm982_vm3, %v4191_v27  ;;  %v2993_v61 = vsel %vm661_vm1, %v7622_v21, %v2815_v36 }
 0x408   : > { %2938 = vrot.lane.b32.xlu1 %v8058_v53, %s5731_s22  ;;  %v8087_v20 = vsel %vm363_vm5, %v2557_v11, %v2711_v59  ;;  %v8099_v11 = vsel %vm363_vm5, %v2711_v59, %v2628_v40 }
 0x409   : > { %v4076_v33 = vpop.permute.xlu0 %4075 }
 0x40a   : > { %v4192_v23 = vsel %vm694_vm2, %v4160_v38, %v4076_v33  ;;  %v2911_v63 = vpop.permute.xlu1 %2910 }
 0x40b   : > { %2936 = vrot.lane.b32.xlu0 %v8066_v42, %s5731_s22  ;;  %5632 = vmatmul.mubr.msk.f32.gmra.mxu1 %vm982_vm3, %v4192_v23  ;;  %v3025_v14 = vsel %vm694_vm2, %v2993_v61, %v2911_v63  ;;  %v2558_v23 = vrot.slane %v7476_v41, 1  ;;  %v8106_v63 = vsel %vm267_vm4, %v2630_v51, %v2631_v34 }
 0x40c   : > { %4011 = vrot.lane.b32.xlu1 %v8051_v5, %s5732_s23 }
 0x40d   : > { %v2909_v4 = vpop.permute.xlu0 %2908 }
 0x40e   : > { %v3024_v35 = vsel %vm694_vm2, %v2992_v17, %v2909_v4  ;;  %v3984_v30 = vpop.permute.xlu1 %3983  ;;  %v8114_v17 = vsel %vm267_vm4, %v2558_v23, %v2630_v51  ;;  %v2634_v51 = vrot.slane %v7483_v8, 7 }
 0x40f   : > { %4009 = vrot.lane.b32.xlu0 %v8039_v44, %s5732_s23  ;;  %5582 = vmatprep.mubr.msk.f32.mxu0 %vm982_vm3, %v3024_v35 }
 0x410   : > { %5583 = vmatmul.mubr.msk.f32.gmra.mxu0 %vm982_vm3, %v3025_v14  ;;  %2844 = vrot.lane.b32.xlu1 %v8066_v42, %s5732_s23 }
 0x411   : > { %v3982_v21 = vpop.permute.xlu0 %3981 }
 0x412   : > { %v2817_v15 = vpop.permute.xlu1 %2816  ;;  %v4161_v27 = vsel %vm661_vm1, %v7653_v50, %v3982_v21  ;;  %v4162_v50 = vsel %vm661_vm1, %v7664_v52, %v3984_v30  ;;  %v2713_v21 = vrot.slane %v7469_v45, 1  ;;  %v2633_v45 = vrot.slane %v7490_v13, 7 }
 0x413   : > { %4105 = vrot.lane.b32.xlu0 %v8087_v20, %s5731_s22  ;;  %v2994_v52 = vsel %vm661_vm1, %v7681_v37, %v2817_v15 }
 0x414   : > { %2846 = vrot.lane.b32.xlu1 %v8058_v53, %s5732_s23  ;;  %v8135_v37 = vsel %vm363_vm5, %v2558_v23, %v2713_v21 }
 0x415   : > { %v4078_v36 = vpop.permute.xlu0 %4077 }
 0x416   : > { %v4193_v38 = vsel %vm694_vm2, %v4161_v27, %v4078_v36  ;;  %v2819_v33 = vpop.permute.xlu1 %2818 }
 0x417   : > { %4107 = vrot.lane.b32.xlu0 %v8099_v11, %s5731_s22  ;;  %5634 = vmatprep.mubr.msk.f32.mxu1 %vm982_vm3, %v4193_v38  ;;  %v2995_v14 = vsel %vm661_vm1, %v7670_v48, %v2819_v33  ;;  %v8147_v33 = vsel %vm363_vm5, %v2713_v21, %v2631_v34 }
 0x418   : > { %2942 = vrot.lane.b32.xlu1 %v8106_v63, %s5731_s22 }
 0x419   : > { %v4080_v61 = vpop.permute.xlu0 %4079 }
 0x41a   : > { %v4194_v40 = vsel %vm694_vm2, %v4162_v50, %v4080_v61  ;;  %v2915_v41 = vpop.permute.xlu1 %2914  ;;  %v2559_v50 = vrot.slane %v7490_v13, 1  ;;  %v8154_v61 = vsel %vm267_vm4, %v2633_v45, %v2634_v51 }
 0x41b   : > { %2940 = vrot.lane.b32.xlu0 %v8114_v17, %s5731_s22  ;;  %5635 = vmatmul.mubr.msk.f32.gmra.mxu1 %vm982_vm3, %v4194_v40  ;;  %v3027_v4 = vsel %vm694_vm2, %v2995_v14, %v2915_v41 }
 0x41c   : > { %4015 = vrot.lane.b32.xlu1 %v8099_v11, %s5732_s23  ;;  %v8162_v41 = vsel %vm267_vm4, %v2559_v50, %v2633_v45 }
 0x41d   : > { %v2913_v35 = vpop.permute.xlu0 %2912 }
 0x41e   : > { %v3026_v30 = vsel %vm694_vm2, %v2994_v52, %v2913_v35  ;;  %v3988_v59 = vpop.permute.xlu1 %3987 }
 0x41f   : > { %4013 = vrot.lane.b32.xlu0 %v8087_v20, %s5732_s23  ;;  %5585 = vmatprep.mubr.msk.f32.mxu0 %vm982_vm3, %v3026_v30 }
 0x420   : > { %5586 = vmatmul.mubr.msk.f32.gmra.mxu0 %vm982_vm3, %v3027_v4  ;;  %2848 = vrot.lane.b32.xlu1 %v8114_v17, %s5732_s23 }
 0x421   : > { %v3986_v48 = vpop.permute.xlu0 %3985 }
 0x422   : > { %v2821_v15 = vpop.permute.xlu1 %2820  ;;  %v4163_v27 = vsel %vm661_vm1, %v7701_v25, %v3986_v48  ;;  %v4164_v25 = vsel %vm661_vm1, %v7712_v46, %v3988_v59  ;;  %v2715_v59 = vrot.slane %v7483_v8, 1  ;;  %v2636_v8 = vrot.slane %v7504_v32, 7 }
 0x423   : > { %4109 = vrot.lane.b32.xlu0 %v8135_v37, %s5731_s22  ;;  %v2996_v46 = vsel %vm661_vm1, %v7729_v31, %v2821_v15  ;;  %v2637_v48 = vrot.slane %v7497_v19, 7 }
 0x424   : > { %2850 = vrot.lane.b32.xlu1 %v8106_v63, %s5732_s23  ;;  %v8183_v31 = vsel %vm363_vm5, %v2559_v50, %v2715_v59 }
 0x425   : > { %v4082_v36 = vpop.permute.xlu0 %4081  ;;  %v8202_v50 = vsel %vm267_vm4, %v2636_v8, %v2637_v48 }
 0x426   : > { %v4195_v38 = vsel %vm694_vm2, %v4163_v27, %v4082_v36  ;;  %v2823_v23 = vpop.permute.xlu1 %2822  ;;  %v8195_v36 = vsel %vm363_vm5, %v2715_v59, %v2634_v51 }
 0x427   : > { %4111 = vrot.lane.b32.xlu0 %v8147_v33, %s5731_s22  ;;  %5637 = vmatprep.mubr.msk.f32.mxu1 %vm982_vm3, %v4195_v38  ;;  %v2997_v14 = vsel %vm661_vm1, %v7718_v0, %v2823_v23  ;;  %v2560_v23 = vrot.slane %v7504_v32, 1 }
 0x428   : > { %2946 = vrot.lane.b32.xlu1 %v8154_v61, %s5731_s22 }
 0x429   : > { %v4084_v40 = vpop.permute.xlu0 %4083 }
 0x42a   : > { %v4196_v34 = vsel %vm694_vm2, %v4164_v25, %v4084_v40  ;;  %v2919_v13 = vpop.permute.xlu1 %2918  ;;  %v8210_v40 = vsel %vm267_vm4, %v2560_v23, %v2636_v8 }
 0x42b   : > { %2944 = vrot.lane.b32.xlu0 %v8162_v41, %s5731_s22  ;;  %5638 = vmatmul.mubr.msk.f32.gmra.mxu1 %vm982_vm3, %v4196_v34  ;;  %v3029_v52 = vsel %vm694_vm2, %v2997_v14, %v2919_v13 }
 0x42c   : > { %4019 = vrot.lane.b32.xlu1 %v8147_v33, %s5732_s23 }
 0x42d   : > { %v2917_v4 = vpop.permute.xlu0 %2916 }
 0x42e   : > { %v3028_v35 = vsel %vm694_vm2, %v2996_v46, %v2917_v4  ;;  %v3992_v30 = vpop.permute.xlu1 %3991  ;;  %v2717_v4 = vrot.slane %v7497_v19, 1  ;;  %v2639_v19 = vrot.slane %v7522_v22, 7 }
 0x42f   : > { %4017 = vrot.lane.b32.xlu0 %v8135_v37, %s5732_s23  ;;  %5588 = vmatprep.mubr.msk.f32.mxu0 %vm982_vm3, %v3028_v35 }
 0x430   : > { %5589 = vmatmul.mubr.msk.f32.gmra.mxu0 %vm982_vm3, %v3029_v52  ;;  %2852 = vrot.lane.b32.xlu1 %v8162_v41, %s5732_s23  ;;  %v8243_v8 = vsel %vm363_vm5, %v2717_v4, %v2637_v48 }
 0x431   : > { %v3990_v0 = vpop.permute.xlu0 %3989 }
 0x432   : > { %v2825_v21 = vpop.permute.xlu1 %2824  ;;  %v4165_v15 = vsel %vm661_vm1, %v7749_v55, %v3990_v0  ;;  %v4166_v55 = vsel %vm661_vm1, %v7760_v1, %v3992_v30  ;;  %v2640_v30 = vrot.slane %v7511_v57, 7 }
 0x433   : > { %4113 = vrot.lane.b32.xlu0 %v8183_v31, %s5731_s22  ;;  %v2998_v1 = vsel %vm661_vm1, %v7777_v2, %v2825_v21  ;;  %v8231_v2 = vsel %vm363_vm5, %v2560_v23, %v2717_v4 }
 0x434   : > { %2854 = vrot.lane.b32.xlu1 %v8154_v61, %s5732_s23 }
 0x435   : > { %v4086_v45 = vpop.permute.xlu0 %4085 }
 0x436   : > { %v4197_v27 = vsel %vm694_vm2, %v4165_v15, %v4086_v45  ;;  %v2827_v38 = vpop.permute.xlu1 %2826  ;;  %v2561_v45 = vrot.slane %v7522_v22, 1 }
 0x437   : > { %4115 = vrot.lane.b32.xlu0 %v8195_v36, %s5731_s22  ;;  %5640 = vmatprep.mubr.msk.f32.mxu1 %vm982_vm3, %v4197_v27  ;;  %v2999_v34 = vsel %vm661_vm1, %v7766_v26, %v2827_v38  ;;  %v2641_v27 = vsel %vm267_vm4, %v2639_v19, %v2640_v30 }
 0x438   : > { %2950 = vrot.lane.b32.xlu1 %v8202_v50, %s5731_s22  ;;  %v2688_v48 = vsel %vm267_vm4, %v2561_v45, %v2639_v19 }
 0x439   : > { %v4088_v25 = vpop.permute.xlu0 %4087 }
 0x43a   : > { %v4198_v51 = vsel %vm694_vm2, %v4166_v55, %v4088_v25  ;;  %v2923_v32 = vpop.permute.xlu1 %2922 }
 0x43b   : > { %2948 = vrot.lane.b32.xlu0 %v8210_v40, %s5731_s22  ;;  %5641 = vmatmul.mubr.msk.f32.gmra.mxu1 %vm982_vm3, %v4198_v51  ;;  %v3031_v13 = vsel %vm694_vm2, %v2999_v34, %v2923_v32 }
 0x43c   : > { %4023 = vrot.lane.b32.xlu1 %v8195_v36, %s5732_s23 }
 0x43d   : > { %v2921_v14 = vpop.permute.xlu0 %2920 }
 0x43e   : > { %v3030_v46 = vsel %vm694_vm2, %v2998_v1, %v2921_v14  ;;  %v3996_v52 = vpop.permute.xlu1 %3995  ;;  %v2719_v1 = vrot.slane %v7511_v57, 1 }
 0x43f   : > { %4021 = vrot.lane.b32.xlu0 %v8183_v31, %s5732_s23  ;;  %5591 = vmatprep.mubr.msk.f32.mxu0 %vm982_vm3, %v3030_v46 }
 0x440   : > { %5592 = vmatmul.mubr.msk.f32.gmra.mxu0 %vm982_vm3, %v3031_v13  ;;  %2856 = vrot.lane.b32.xlu1 %v8210_v40, %s5732_s23 }
 0x441   : > { %v3994_v26 = vpop.permute.xlu0 %3993 }
 0x442   : > { %v2829_v35 = vpop.permute.xlu1 %2828  ;;  %v4167_v59 = vsel %vm661_vm1, %v7797_v58, %v3994_v26  ;;  %v4168_v58 = vsel %vm661_vm1, %v7808_v6, %v3996_v52  ;;  %v2783_v52 = vsel %vm363_vm5, %v2719_v1, %v2640_v30 }
 0x443   : > { %4117 = vrot.lane.b32.xlu0 %v8231_v2, %s5731_s22  ;;  %v3000_v25 = vsel %vm661_vm1, %v7825_v54, %v2829_v35  ;;  %v2720_v54 = vsel %vm363_vm5, %v2561_v45, %v2719_v1 }
 0x444   : > { %2858 = vrot.lane.b32.xlu1 %v8202_v50, %s5732_s23 }
 0x445   : > { %v4090_v0 = vpop.permute.xlu0 %4089 }
 0x446   : > { %v4199_v21 = vsel %vm694_vm2, %v4167_v59, %v4090_v0  ;;  %v2831_v15 = vpop.permute.xlu1 %2830 }
 0x447   : > { %4119 = vrot.lane.b32.xlu0 %v8243_v8, %s5731_s22  ;;  %5643 = vmatprep.mubr.msk.f32.mxu1 %vm982_vm3, %v4199_v21  ;;  %v3001_v22 = vsel %vm661_vm1, %v7814_v18, %v2831_v15 }
 0x448   : > { %2954 = vrot.lane.b32.xlu1 %v2641_v27, %s5731_s22 }
 0x449   : > { %v4092_v38 = vpop.permute.xlu0 %4091 }
 0x44a   : > { %v4200_v23 = vsel %vm694_vm2, %v4168_v58, %v4092_v38  ;;  %v2927_v55 = vpop.permute.xlu1 %2926 }
 0x44b   : > { %2952 = vrot.lane.b32.xlu0 %v2688_v48, %s5731_s22  ;;  %5644 = vmatmul.mubr.msk.f32.gmra.mxu1 %vm982_vm3, %v4200_v23  ;;  %v3033_v6 = vsel %vm694_vm2, %v3001_v22, %v2927_v55 }
 0x44c   : > { %4027 = vrot.lane.b32.xlu1 %v8243_v8, %s5732_s23 }
 0x44d   : > { %v2925_v51 = vpop.permute.xlu0 %2924 }
 0x44e   : > { %v3032_v32 = vsel %vm694_vm2, %v3000_v25, %v2925_v51  ;;  %v4000_v34 = vpop.permute.xlu1 %3999 }
 0x44f   : > { %4025 = vrot.lane.b32.xlu0 %v8231_v2, %s5732_s23  ;;  %5594 = vmatprep.mubr.msk.f32.mxu0 %vm982_vm3, %v3032_v32  ;;  %v4170_v26 = vsel %vm661_vm1, %v7856_v56, %v4000_v34 }
 0x450   : > { %5595 = vmatmul.mubr.msk.f32.gmra.mxu0 %vm982_vm3, %v3033_v6  ;;  %2860 = vrot.lane.b32.xlu1 %v2688_v48, %s5732_s23 }
 0x451   : > { %v3998_v18 = vpop.permute.xlu0 %3997 }
 0x452   : > { %v2833_v13 = vpop.permute.xlu1 %2832  ;;  %v4169_v57 = vsel %vm661_vm1, %v7845_v39, %v3998_v18 }
 0x453   : > { %4121 = vrot.lane.b32.xlu0 %v2720_v54, %s5731_s22  ;;  %v3002_v30 = vsel %vm661_vm1, %v7873_v28, %v2833_v13 }
 0x454   : > { %2862 = vrot.lane.b32.xlu1 %v2641_v27, %s5732_s23 }
 0x455   : > { %v4094_v14 = vpop.permute.xlu0 %4093 }
 0x456   : > { %v4201_v46 = vsel %vm694_vm2, %v4169_v57, %v4094_v14  ;;  %v2835_v4 = vpop.permute.xlu1 %2834 }
 0x457   : > { %4123 = vrot.lane.b32.xlu0 %v2783_v52, %s5731_s22  ;;  %5646 = vmatprep.mubr.msk.f32.mxu1 %vm982_vm3, %v4201_v46  ;;  %v3003_v39 = vsel %vm661_vm1, %v7862_v62, %v2835_v4 }
 0x458   : > { %4031 = vrot.lane.b32.xlu1 %v2783_v52, %s5732_s23 }
 0x459   : > { %v4096_v35 = vpop.permute.xlu0 %4095 }
 0x45a   : > { %v4202_v19 = vsel %vm694_vm2, %v4170_v26, %v4096_v35  ;;  %v2931_v59 = vpop.permute.xlu1 %2930 }
 0x45b   : > { %4029 = vrot.lane.b32.xlu0 %v2720_v54, %s5732_s23  ;;  %5647 = vmatmul.mubr.msk.f32.gmra.mxu1 %vm982_vm3, %v4202_v19  ;;  %v3035_v0 = vsel %vm694_vm2, %v3003_v39, %v2931_v59  ;;  %s8808_s23 = scalar_lea.vmem %s8932_s3, %s5155_s18 }
 0x45d   : > { %v2929_v21 = vpop.permute.xlu0 %2928 }
 0x45e   : > { %v3034_v15 = vsel %vm694_vm2, %v3002_v30, %v2929_v21  ;;  %v4004_v56 = vpop.permute.xlu1 %4003 }
 0x45f   : > { %5597 = vmatprep.mubr.msk.f32.mxu0 %vm982_vm3, %v3034_v15  ;;  %v4172_v28 = vsel %vm661_vm1, %v7908_v9, %v4004_v56 }
 0x460   : > { %5598 = vmatmul.mubr.msk.f32.gmra.mxu0 %vm982_vm3, %v3035_v0 }
 0x461   : > { %v4002_v45 = vpop.permute.xlu0 %4001 }
 0x462   : > { %v2837_v27 = vpop.permute.xlu1 %2836  ;;  %v4171_v58 = vsel %vm661_vm1, %v7893_v16, %v4002_v45 }
 0x463   : > { %v3004_v16 = vsel %vm661_vm1, %v7923_v60, %v2837_v27 }
 0x465   : > { %v4098_v38 = vpop.permute.xlu0 %4097 }
 0x466   : > { %v4203_v62 = vsel %vm694_vm2, %v4171_v58, %v4098_v38  ;;  %v2839_v23 = vpop.permute.xlu1 %2838 }
 0x467   : > { %5649 = vmatprep.mubr.msk.f32.mxu1 %vm982_vm3, %v4203_v62  ;;  %v3005_v25 = vsel %vm661_vm1, %v7916_v7, %v2839_v23 }
 0x469   : > { %v4100_v48 = vpop.permute.xlu0 %4099 }
 0x46a   : > { %v4204_v55 = vsel %vm694_vm2, %v4172_v28, %v4100_v48  ;;  %v2935_v22 = vpop.permute.xlu1 %2934 }
 0x46b   : > { %5650 = vmatmul.mubr.msk.f32.gmra.mxu1 %vm982_vm3, %v4204_v55  ;;  %v3037_v6 = vsel %vm694_vm2, %v3005_v25, %v2935_v22 }
 0x46d   : > { %v2933_v51 = vpop.permute.xlu0 %2932 }
 0x46e   : > { %v3036_v32 = vsel %vm694_vm2, %v3004_v16, %v2933_v51  ;;  %v4008_v34 = vpop.permute.xlu1 %4007 }
 0x46f   : > { %5600 = vmatprep.mubr.msk.f32.mxu0 %vm982_vm3, %v3036_v32  ;;  %v4174_v60 = vsel %vm661_vm1, %v7955_v29, %v4008_v34 }
 0x470   : > { %5601 = vmatmul.mubr.msk.f32.gmra.mxu0 %vm982_vm3, %v3037_v6 }
 0x471   : > { %v4006_v9 = vpop.permute.xlu0 %4005 }
 0x472   : > { %v2841_v1 = vpop.permute.xlu1 %2840  ;;  %v4173_v18 = vsel %vm661_vm1, %v7943_v3, %v4006_v9 }
 0x473   : > { %v3006_v3 = vsel %vm661_vm1, %v7970_v24, %v2841_v1 }
 0x475   : > { %v4102_v54 = vpop.permute.xlu0 %4101 }
 0x476   : > { %v4205_v7 = vsel %vm694_vm2, %v4173_v18, %v4102_v54  ;;  %v2843_v13 = vpop.permute.xlu1 %2842 }
 0x477   : > { %5652 = vmatprep.mubr.msk.f32.mxu1 %vm982_vm3, %v4205_v7  ;;  %v3007_v52 = vsel %vm661_vm1, %v7962_v43, %v2843_v13 }
 0x479   : > { %v4104_v57 = vpop.permute.xlu0 %4103 }
 0x47a   : > { %v4206_v14 = vsel %vm694_vm2, %v4174_v60, %v4104_v57  ;;  %v2939_v46 = vpop.permute.xlu1 %2938 }
 0x47b   : > { %5653 = vmatmul.mubr.msk.f32.gmra.mxu1 %vm982_vm3, %v4206_v14  ;;  %v3039_v4 = vsel %vm694_vm2, %v3007_v52, %v2939_v46 }
 0x47d   : > { %v2937_v26 = vpop.permute.xlu0 %2936 }
 0x47e   : > { %v3038_v35 = vsel %vm694_vm2, %v3006_v3, %v2937_v26  ;;  %v4012_v19 = vpop.permute.xlu1 %4011 }
 0x47f   : > { %5603 = vmatprep.mubr.msk.f32.mxu0 %vm982_vm3, %v3038_v35  ;;  %v4176_v24 = vsel %vm661_vm1, %v8003_v12, %v4012_v19 }
 0x480   : > { %5604 = vmatmul.mubr.msk.f32.gmra.mxu0 %vm982_vm3, %v3039_v4 }
 0x481   : > { %v4010_v29 = vpop.permute.xlu0 %4009 }
 0x482   : > { %v2845_v59 = vpop.permute.xlu1 %2844  ;;  %v4175_v39 = vsel %vm661_vm1, %v7991_v47, %v4010_v29 }
 0x483   : > { %v3008_v47 = vsel %vm661_vm1, %v8018_v49, %v2845_v59 }
 0x485   : > { %v4106_v30 = vpop.permute.xlu0 %4105 }
 0x486   : > { %v4207_v43 = vsel %vm694_vm2, %v4175_v39, %v4106_v30  ;;  %v2847_v0 = vpop.permute.xlu1 %2846 }
 0x487   : > { %5655 = vmatprep.mubr.msk.f32.mxu1 %vm982_vm3, %v4207_v43  ;;  %v3009_v45 = vsel %vm661_vm1, %v8010_v10, %v2847_v0 }
 0x489   : > { %v4108_v21 = vpop.permute.xlu0 %4107 }
 0x48a   : > { %v4208_v15 = vsel %vm694_vm2, %v4176_v24, %v4108_v21  ;;  %v2943_v56 = vpop.permute.xlu1 %2942 }
 0x48b   : > { %5656 = vmatmul.mubr.msk.f32.gmra.mxu1 %vm982_vm3, %v4208_v15  ;;  %v3041_v27 = vsel %vm694_vm2, %v3009_v45, %v2943_v56 }
 0x48d   : > { %v2941_v58 = vpop.permute.xlu0 %2940 }
 0x48e   : > { %v3040_v38 = vsel %vm694_vm2, %v3008_v47, %v2941_v58  ;;  %v4016_v62 = vpop.permute.xlu1 %4015 }
 0x48f   : > { %5606 = vmatprep.mubr.msk.f32.mxu0 %vm982_vm3, %v3040_v38  ;;  %v4178_v49 = vsel %vm661_vm1, %v8051_v5, %v4016_v62 }
 0x490   : > { %5607 = vmatmul.mubr.msk.f32.gmra.mxu0 %vm982_vm3, %v3041_v27 }
 0x491   : > { %v4014_v12 = vpop.permute.xlu0 %4013 }
 0x492   : > { %v2849_v23 = vpop.permute.xlu1 %2848  ;;  %v4177_v28 = vsel %vm661_vm1, %v8039_v44, %v4014_v12 }
 0x493   : > { %v3010_v44 = vsel %vm661_vm1, %v8066_v42, %v2849_v23 }
 0x495   : > { %v4110_v48 = vpop.permute.xlu0 %4109 }
 0x496   : > { %v4209_v10 = vsel %vm694_vm2, %v4177_v28, %v4110_v48  ;;  %v2851_v55 = vpop.permute.xlu1 %2850  ;;  %v5523_v28 = vpop.f32.mrf.mxu1 }
 0x497   : > { %5658 = vmatprep.mubr.msk.f32.mxu1 %vm982_vm3, %v4209_v10  ;;  %v3011_v6 = vsel %vm661_vm1, %v8058_v53, %v2851_v55 }
 0x499   : > { %v4112_v22 = vpop.permute.xlu0 %4111 }
 0x49a   : > { %v4210_v25 = vsel %vm694_vm2, %v4178_v49, %v4112_v22  ;;  %v2947_v16 = vpop.permute.xlu1 %2946  ;;  %v3470_v49 = vpop.f32.mrf.mxu1 }
 0x49b   : > { %5659 = vmatmul.mubr.msk.f32.gmra.mxu1 %vm982_vm3, %v4210_v25  ;;  %v3043_v51 = vsel %vm694_vm2, %v3011_v6, %v2947_v16 }
 0x49c   : > { %v5526_v22 = vpop.f32.mrf.mxu1 }
 0x49d   : > { %v2945_v32 = vpop.permute.xlu0 %2944 }
 0x49e   : > { %v3042_v34 = vsel %vm694_vm2, %v3010_v44, %v2945_v32  ;;  %v4020_v9 = vpop.permute.xlu1 %4019  ;;  %v3480_v25 = vpop.f32.mrf.mxu1 }
 0x49f   : > { %5609 = vmatprep.mubr.msk.f32.mxu0 %vm982_vm3, %v3042_v34  ;;  %v4180_v42 = vsel %vm661_vm1, %v8099_v11, %v4020_v9 }
 0x4a0   : > { %5610 = vmatmul.mubr.msk.f32.gmra.mxu0 %vm982_vm3, %v3043_v51  ;;  %v8414_v16 = vpop.f32.mrf.mxu1 }
 0x4a1   : > { %v4018_v5 = vpop.permute.xlu0 %4017 }
 0x4a2   : > { %v2853_v1 = vpop.permute.xlu1 %2852  ;;  %v4179_v18 = vsel %vm661_vm1, %v8087_v20, %v4018_v5  ;;  %v3490_v6 = vpop.f32.mrf.mxu1 }
 0x4a3   : > { %v3012_v20 = vsel %vm661_vm1, %v8114_v17, %v2853_v1 }
 0x4a4   : > { %v8416_v44 = vpop.f32.mrf.mxu1 }
 0x4a5   : > { %v4114_v54 = vpop.permute.xlu0 %4113 }
 0x4a6   : > { %v4211_v53 = vsel %vm694_vm2, %v4179_v18, %v4114_v54  ;;  %v2855_v7 = vpop.permute.xlu1 %2854 }
 0x4a7   : > { %5661 = vmatprep.mubr.msk.f32.mxu1 %vm982_vm3, %v4211_v53  ;;  %v3013_v14 = vsel %vm661_vm1, %v8106_v63, %v2855_v7 }
 0x4a9   : > { %v4116_v13 = vpop.permute.xlu0 %4115 }
 0x4aa   : > { %v4212_v60 = vsel %vm694_vm2, %v4180_v42, %v4116_v13  ;;  %v2951_v57 = vpop.permute.xlu1 %2950 }
 0x4ab   : > { %5662 = vmatmul.mubr.msk.f32.gmra.mxu1 %vm982_vm3, %v4212_v60  ;;  %v3045_v46 = vsel %vm694_vm2, %v3013_v14, %v2951_v57 }
 0x4ad   : > { %v2949_v52 = vpop.permute.xlu0 %2948 }
 0x4ae   : > { %v3044_v3 = vsel %vm694_vm2, %v3012_v20, %v2949_v52  ;;  %v4024_v4 = vpop.permute.xlu1 %4023 }
 0x4af   : > { %5612 = vmatprep.mubr.msk.f32.mxu0 %vm982_vm3, %v3044_v3  ;;  %v4182_v17 = vsel %vm661_vm1, %v8147_v33, %v4024_v4 }
 0x4b0   : > { %5613 = vmatmul.mubr.msk.f32.gmra.mxu0 %vm982_vm3, %v3045_v46 }
 0x4b1   : > { %v4022_v11 = vpop.permute.xlu0 %4021 }
 0x4b2   : > { %v2857_v26 = vpop.permute.xlu1 %2856  ;;  %v4181_v35 = vsel %vm661_vm1, %v8135_v37, %v4022_v11 }
 0x4b3   : > { %v3014_v37 = vsel %vm661_vm1, %v8162_v41, %v2857_v26 }
 0x4b5   : > { %v4118_v19 = vpop.permute.xlu0 %4117 }
 0x4b6   : > { %v4213_v63 = vsel %vm694_vm2, %v4181_v35, %v4118_v19  ;;  %v2859_v29 = vpop.permute.xlu1 %2858 }
 0x4b7   : > { %5664 = vmatprep.mubr.msk.f32.mxu1 %vm982_vm3, %v4213_v63  ;;  %v3015_v43 = vsel %vm661_vm1, %v8154_v61, %v2859_v29 }
 0x4b9   : > { %v4120_v59 = vpop.permute.xlu0 %4119 }
 0x4ba   : > { %v4214_v39 = vsel %vm694_vm2, %v4182_v17, %v4120_v59  ;;  %v2955_v30 = vpop.permute.xlu1 %2954 }
 0x4bb   : > { %5665 = vmatmul.mubr.msk.f32.gmra.mxu1 %vm982_vm3, %v4214_v39  ;;  %v3047_v0 = vsel %vm694_vm2, %v3015_v43, %v2955_v30 }
 0x4bd   : > { %v2953_v24 = vpop.permute.xlu0 %2952 }
 0x4be   : > { %v3046_v21 = vsel %vm694_vm2, %v3014_v37, %v2953_v24  ;;  %v4028_v15 = vpop.permute.xlu1 %4027 }
 0x4bf   : > { %5615 = vmatprep.mubr.msk.f32.mxu0 %vm982_vm3, %v3046_v21 }
 0x4c0   : > { %5616 = vmatmul.mubr.msk.f32.gmra.mxu0 %vm982_vm3, %v3047_v0 }
 0x4c1   : > { %v4026_v33 = vpop.permute.xlu0 %4025 }
 0x4c2   : > { %v2861_v56 = vpop.permute.xlu1 %2860  ;;  %v4183_v41 = vsel %vm661_vm1, %v8183_v31, %v4026_v33 }
 0x4c3   : > { %v3016_v45 = vsel %vm661_vm1, %v8210_v40, %v2861_v56  ;;  %v4184_v40 = vsel %vm661_vm1, %v8195_v36, %v4028_v15 }
 0x4c4   : > { %v3048_v61 = vsel %vm694_vm2, %v3016_v45, %v2949_v52 }
 0x4c5   : > { %v4122_v47 = vpop.permute.xlu0 %4121  ;;  %5618 = vmatprep.mubr.msk.f32.mxu0 %vm982_vm3, %v3048_v61 }
 0x4c6   : > { %v4215_v27 = vsel %vm694_vm2, %v4183_v41, %v4122_v47  ;;  %v2863_v58 = vpop.permute.xlu1 %2862 }
 0x4c7   : > { %5667 = vmatprep.mubr.msk.f32.mxu1 %vm982_vm3, %v4215_v27  ;;  %v3017_v38 = vsel %vm661_vm1, %v8202_v50, %v2863_v58 }
 0x4c8   : > { %v3049_v62 = vsel %vm694_vm2, %v3017_v38, %v2951_v57 }
 0x4c9   : > { %v4124_v12 = vpop.permute.xlu0 %4123  ;;  %5619 = vmatmul.mubr.msk.f32.gmra.mxu0 %vm982_vm3, %v3049_v62 }
 0x4ca   : > { %v4216_v31 = vsel %vm694_vm2, %v4184_v40, %v4124_v12  ;;  %v4032_v23 = vpop.permute.xlu1 %4031 }
 0x4cb   : > { %5668 = vmatmul.mubr.msk.f32.gmra.mxu1 %vm982_vm3, %v4216_v31  ;;  %v4186_v48 = vsel %vm661_vm1, %v8243_v8, %v4032_v23  ;;  %v8418_v8 = vpop.f32.mrf.mxu1 }
 0x4cc   : > { %v4218_v55 = vsel %vm694_vm2, %v4186_v48, %v4120_v59 }
 0x4cd   : > { %v4030_v10 = vpop.permute.xlu0 %4029  ;;  %v8420_v51 = vpop.f32.mrf.mxu1 }
 0x4ce   : > { %v4185_v50 = vsel %vm661_vm1, %v8231_v2, %v4030_v10 }
 0x4cf   : > { %v4217_v36 = vsel %vm694_vm2, %v4185_v50, %v4118_v19  ;;  %v8422_v2 = vpop.f32.mrf.mxu1  ;;  %v5575_v19 = vpop.f32.mrf.mxu0 }
 0x4d0   : > { %5670 = vmatprep.mubr.msk.f32.mxu1 %vm982_vm3, %v4217_v36  ;;  %v3800_v37 = vadd.f32 %v5575_v19, %v5523_v28 }
 0x4d1   : > { %5671 = vmatmul.mubr.msk.f32.gmra.mxu1 %vm982_vm3, %v4218_v55  ;;  %v8424_v32 = vpop.f32.mrf.mxu1  ;;  %v3794_v29 = vpop.f32.mrf.mxu0 }
 0x4d2   : > { %v3795_v43 = vadd.f32 %v3794_v29, %v3470_v49 }
 0x4d3   : > { %v8426_v34 = vpop.f32.mrf.mxu1  ;;  %v5578_v59 = vpop.f32.mrf.mxu0 }
 0x4d4   : > { %v3810_v62 = vadd.f32 %v5578_v59, %v5526_v22 }
 0x4d5   : > { %v8428_v9 = vpop.f32.mrf.mxu1  ;;  %v3804_v30 = vpop.f32.mrf.mxu0 }
 0x4d6   : > { %v3805_v15 = vadd.f32 %v3804_v30, %v3480_v25 }
 0x4d7   : > { %v8430_v5 = vpop.f32.mrf.mxu1  ;;  %v5581_v24 = vpop.f32.mrf.mxu0 }
 0x4d9   : > { %v8432_v1 = vpop.f32.mrf.mxu1  ;;  %v3814_v61 = vpop.f32.mrf.mxu0 }
 0x4da   : > { %v3815_v12 = vadd.f32 %v3814_v61, %v3490_v6 }
 0x4db   : > { %v8434_v18 = vpop.f32.mrf.mxu1  ;;  %v5584_v58 = vpop.f32.mrf.mxu0 }
 0x4dd   : > { %v8436_v54 = vpop.f32.mrf.mxu1  ;;  %v3824_v49 = vpop.f32.mrf.mxu0 }
 0x4df   : > { %v8438_v53 = vpop.f32.mrf.mxu1 }
 0x4e1   : > { %v8440_v7 = vpop.f32.mrf.mxu1 }
 0x4e3   : > { %v8442_v42 = vpop.f32.mrf.mxu1 }
 0x4e5   : > { %v8444_v13 = vpop.f32.mrf.mxu1 }
 0x4e7   : > { %v8446_v60 = vpop.f32.mrf.mxu1 }
 0x4e9   : > { %v8448_v57 = vpop.f32.mrf.mxu1 }
 0x4eb   : > { %v8450_v14 = vpop.f32.mrf.mxu1 }
 0x4ed   : > { %v8452_v20 = vpop.f32.mrf.mxu1 }
 0x4ef   : > { %v8454_v46 = vpop.f32.mrf.mxu1 }
 0x4f1   : > { %v8456_v52 = vpop.f32.mrf.mxu1 }
 0x4f3   : > { %v8458_v3 = vpop.f32.mrf.mxu1 }
 0x4f5   : > { %v8460_v4 = vpop.f32.mrf.mxu1 }
 0x4f7   : > { %v8462_v11 = vpop.f32.mrf.mxu1 }
 0x4f9   : > { %v8464_v26 = vpop.f32.mrf.mxu1 }
 0x4fb   : > { %v8466_v35 = vpop.f32.mrf.mxu1 }
 0x4fd   : > { %v5627_v63 = vpop.f32.mrf.mxu1 }
 0x4fe   : > { %v8470_v33 = vadd.f32 %v5627_v63, %v3800_v37  ;;  %v5587_v63 = vpop.f32.mrf.mxu0 }
 0x4ff   : > { %v4387_v17 = vpop.f32.mrf.mxu1 }
 0x500   : > { %v8468_v21 = vadd.f32 %v4387_v17, %v3795_v43  ;;  %v4648_v47 = vmul.f32 %v8470_v33, %v8470_v33  ;;  %v4579_v31 = vsel %vm661_vm1, %v8470_v33, 0.0  ;;  %v3820_v17 = vadd.f32 %v5581_v24, %v8414_v16 }
 0x501   : > { %v5630_v39 = vpop.f32.mrf.mxu1 }
 0x502   : > { %v4647_v41 = vmul.f32 %v8468_v21, %v8468_v21  ;;  %v4578_v38 = vsel %vm661_vm1, %v8468_v21, 0.0  ;;  %v8485_v48 = vadd.f32 %v5630_v39, %v3810_v62  ;;  %v4680_v36 = vsel %vm661_vm1, %v4648_v47, 0.0  ;;  %v3834_v47 = vpop.f32.mrf.mxu0 }
 0x503   : > { %v4397_v0 = vpop.f32.mrf.mxu1  ;;  %v4580_v55 = vadd.f32 %v4579_v31, %v4578_v38  ;;  %v3825_v39 = vadd.f32 %v3824_v49, %v8418_v8  ;;  %v3835_v31 = vadd.f32 %v3834_v47, %v8422_v2 }
 0x504   : > { %v8472_v45 = vadd.f32 %v4397_v0, %v3805_v15  ;;  %v4679_v28 = vsel %vm661_vm1, %v4647_v41, 0.0  ;;  %v4650_v29 = vmul.f32 %v8485_v48, %v8485_v48  ;;  %v4583_v37 = vsel %vm661_vm1, %v8485_v48, 0.0  ;;  %v5590_v62 = vpop.f32.mrf.mxu0 }
 0x505   : > { %v5633_v56 = vpop.f32.mrf.mxu1  ;;  %v4681_v25 = vadd.f32 %v4680_v36, %v4679_v28 }
 0x506   : > { %v4649_v40 = vmul.f32 %v8472_v45, %v8472_v45  ;;  %v4581_v10 = vsel %vm661_vm1, %v8472_v45, 0.0  ;;  %v8501_v0 = vadd.f32 %v5633_v56, %v3820_v17  ;;  %v4684_v16 = vsel %vm661_vm1, %v4650_v29, 0.0 }
 0x507   : > { %v4407_v27 = vpop.f32.mrf.mxu1  ;;  %v4582_v6 = vadd.f32 %v4581_v10, %v4580_v55  ;;  %v3830_v56 = vadd.f32 %v5584_v58, %v8416_v44 }
 0x508   : > { %v8489_v50 = vadd.f32 %v4407_v27, %v3815_v12  ;;  %v4682_v22 = vsel %vm661_vm1, %v4649_v40, 0.0  ;;  %v4652_v40 = vmul.f32 %v8501_v0, %v8501_v0  ;;  %v4587_v55 = vsel %vm661_vm1, %v8501_v0, 0.0 }
 0x509   : > { %v5636_v23 = vpop.f32.mrf.mxu1  ;;  %v4683_v30 = vadd.f32 %v4682_v22, %v4681_v25  ;;  %v4584_v41 = vadd.f32 %v4583_v37, %v4582_v6  ;;  %v3844_v6 = vpop.f32.mrf.mxu0 }
 0x50a   : > { %v4651_v59 = vmul.f32 %v8489_v50, %v8489_v50  ;;  %v4585_v15 = vsel %vm661_vm1, %v8489_v50, 0.0  ;;  %v8517_v49 = vadd.f32 %v5636_v23, %v3830_v56  ;;  %v4688_v44 = vsel %vm661_vm1, %v4652_v40, 0.0 }
 0x50b   : > { %v4417_v19 = vpop.f32.mrf.mxu1  ;;  %v4586_v27 = vadd.f32 %v4585_v15, %v4584_v41  ;;  %v4685_v8 = vadd.f32 %v4684_v16, %v4683_v30  ;;  %v5593_v17 = vpop.f32.mrf.mxu0  ;;  %v3840_v23 = vadd.f32 %v5587_v63, %v8420_v51  ;;  %v3845_v30 = vadd.f32 %v3844_v6, %v8426_v34 }
 0x50c   : > { %v8505_v61 = vadd.f32 %v4417_v19, %v3825_v39  ;;  %v4686_v24 = vsel %vm661_vm1, %v4651_v59, 0.0  ;;  %v4654_v59 = vmul.f32 %v8517_v49, %v8517_v49  ;;  %v4591_v41 = vsel %vm661_vm1, %v8517_v49, 0.0 }
 0x50d   : > { %v5639_v43 = vpop.f32.mrf.mxu1  ;;  %v4687_v28 = vadd.f32 %v4686_v24, %v4685_v8  ;;  %v4588_v25 = vadd.f32 %v4587_v55, %v4586_v27  ;;  %v3854_v8 = vpop.f32.mrf.mxu0 }
 0x50e   : > { %v4653_v12 = vmul.f32 %v8505_v61, %v8505_v61  ;;  %v4589_v36 = vsel %vm661_vm1, %v8505_v61, 0.0  ;;  %v8533_v47 = vadd.f32 %v5639_v43, %v3840_v23  ;;  %v4692_v51 = vsel %vm661_vm1, %v4654_v59, 0.0 }
 0x50f   : > { %v4427_v38 = vpop.f32.mrf.mxu1  ;;  %v4590_v19 = vadd.f32 %v4589_v36, %v4588_v25  ;;  %v4689_v2 = vadd.f32 %v4688_v44, %v4687_v28  ;;  %v3850_v43 = vadd.f32 %v5590_v62, %v8424_v32  ;;  %v3855_v28 = vadd.f32 %v3854_v8, %v8430_v5 }
 0x510   : > { %v8521_v22 = vadd.f32 %v4427_v38, %v3835_v31  ;;  %v4690_v58 = vsel %vm661_vm1, %v4653_v12, 0.0  ;;  %v5596_v56 = vpop.f32.mrf.mxu0  ;;  %v4656_v12 = vmul.f32 %v8533_v47, %v8533_v47  ;;  %v4595_v25 = vsel %vm661_vm1, %v8533_v47, 0.0 }
 0x511   : > { %v5642_v10 = vpop.f32.mrf.mxu1  ;;  %v4691_v37 = vadd.f32 %v4690_v58, %v4689_v2  ;;  %v4592_v27 = vadd.f32 %v4591_v41, %v4590_v19 }
 0x512   : > { %v4655_v39 = vmul.f32 %v8521_v22, %v8521_v22  ;;  %v4593_v16 = vsel %vm661_vm1, %v8521_v22, 0.0  ;;  %v8549_v6 = vadd.f32 %v5642_v10, %v3850_v43  ;;  %v3864_v2 = vpop.f32.mrf.mxu0  ;;  %v4696_v32 = vsel %vm661_vm1, %v4656_v12, 0.0 }
 0x513   : > { %v4437_v29 = vpop.f32.mrf.mxu1  ;;  %v4594_v38 = vadd.f32 %v4593_v16, %v4592_v27  ;;  %v4693_v34 = vadd.f32 %v4692_v51, %v4691_v37  ;;  %v3860_v10 = vadd.f32 %v5593_v17, %v8428_v9  ;;  %v3865_v37 = vadd.f32 %v3864_v2, %v8434_v18 }
 0x514   : > { %v8537_v24 = vadd.f32 %v4437_v29, %v3845_v30  ;;  %v4694_v63 = vsel %vm661_vm1, %v4655_v39, 0.0  ;;  %v4658_v39 = vmul.f32 %v8549_v6, %v8549_v6  ;;  %v4599_v27 = vsel %vm661_vm1, %v8549_v6, 0.0 }
 0x515   : > { %v5645_v15 = vpop.f32.mrf.mxu1  ;;  %v4695_v55 = vadd.f32 %v4694_v63, %v4693_v34  ;;  %v4596_v19 = vadd.f32 %v4595_v25, %v4594_v38 }
 0x516   : > { %v4657_v31 = vmul.f32 %v8537_v24, %v8537_v24  ;;  %v4597_v44 = vsel %vm661_vm1, %v8537_v24, 0.0  ;;  %v8565_v8 = vadd.f32 %v5645_v15, %v3860_v10  ;;  %v4700_v9 = vsel %vm661_vm1, %v4658_v39, 0.0 }
 0x517   : > { %v4447_v40 = vpop.f32.mrf.mxu1  ;;  %v4598_v29 = vadd.f32 %v4597_v44, %v4596_v19  ;;  %v4697_v5 = vadd.f32 %v4696_v32, %v4695_v55  ;;  %v3870_v15 = vadd.f32 %v5596_v56, %v8432_v1 }
 0x518   : > { %v8553_v58 = vadd.f32 %v4447_v40, %v3855_v28  ;;  %v4698_v62 = vsel %vm661_vm1, %v4657_v31, 0.0  ;;  %v4660_v31 = vmul.f32 %v8565_v8, %v8565_v8  ;;  %v4603_v19 = vsel %vm661_vm1, %v8565_v8, 0.0 }
 0x519   : > { %v4699_v41 = vadd.f32 %v4698_v62, %v4697_v5  ;;  %v4600_v38 = vadd.f32 %v4599_v27, %v4598_v29 }
 0x51a   : > { %v4659_v30 = vmul.f32 %v8553_v58, %v8553_v58  ;;  %v4601_v51 = vsel %vm661_vm1, %v8553_v58, 0.0  ;;  %v4704_v1 = vsel %vm661_vm1, %v4660_v31, 0.0 }
 0x51b   : > { %v5648_v36 = vpop.f32.mrf.mxu1  ;;  %v4602_v40 = vadd.f32 %v4601_v51, %v4600_v38  ;;  %v4701_v18 = vadd.f32 %v4700_v9, %v4699_v41 }
 0x51c   : > { %v4702_v17 = vsel %vm661_vm1, %v4659_v30, 0.0  ;;  %v8581_v2 = vadd.f32 %v5648_v36, %v3870_v15 }
 0x51d   : > { %v4457_v59 = vpop.f32.mrf.mxu1  ;;  %v4703_v25 = vadd.f32 %v4702_v17, %v4701_v18  ;;  %v4604_v29 = vadd.f32 %v4603_v19, %v4602_v40 }
 0x51e   : > { %v8569_v63 = vadd.f32 %v4457_v59, %v3865_v37  ;;  %v4662_v30 = vmul.f32 %v8581_v2, %v8581_v2  ;;  %v4607_v38 = vsel %vm661_vm1, %v8581_v2, 0.0 }
 0x520   : > { %v5599_v23 = vpop.f32.mrf.mxu0  ;;  %v4661_v28 = vmul.f32 %v8569_v63, %v8569_v63  ;;  %v4605_v32 = vsel %vm661_vm1, %v8569_v63, 0.0 }
 0x521   : > { %v4606_v59 = vadd.f32 %v4605_v32, %v4604_v29  ;;  %v3880_v36 = vadd.f32 %v5599_v23, %v8436_v54  ;;  %v4708_v54 = vsel %vm661_vm1, %v4662_v30, 0.0 }
 0x522   : > { %v3874_v34 = vpop.f32.mrf.mxu0  ;;  %v4706_v56 = vsel %vm661_vm1, %v4661_v28, 0.0 }
 0x523   : > { %v3875_v55 = vadd.f32 %v3874_v34, %v8438_v53  ;;  %v4705_v53 = vadd.f32 %v4704_v1, %v4703_v25  ;;  %v4608_v40 = vadd.f32 %v4607_v38, %v4606_v59 }
 0x525   : > { %v4707_v27 = vadd.f32 %v4706_v56, %v4705_v53 }
 0x52b   : > { %v5651_v16 = vpop.f32.mrf.mxu1 }
 0x52c   : > { %v8597_v34 = vadd.f32 %v5651_v16, %v3880_v36 }
 0x52d   : > { %v4467_v12 = vpop.f32.mrf.mxu1 }
 0x52e   : > { %v8585_v62 = vadd.f32 %v4467_v12, %v3875_v55  ;;  %v4664_v28 = vmul.f32 %v8597_v34, %v8597_v34  ;;  %v4611_v29 = vsel %vm661_vm1, %v8597_v34, 0.0 }
 0x530   : > { %v5602_v43 = vpop.f32.mrf.mxu0  ;;  %v4663_v37 = vmul.f32 %v8585_v62, %v8585_v62  ;;  %v4609_v9 = vsel %vm661_vm1, %v8585_v62, 0.0 }
 0x531   : > { %v4610_v12 = vadd.f32 %v4609_v9, %v4608_v40  ;;  %v3890_v16 = vadd.f32 %v5602_v43, %v8440_v7  ;;  %v4712_v7 = vsel %vm661_vm1, %v4664_v28, 0.0 }
 0x532   : > { %v3884_v5 = vpop.f32.mrf.mxu0  ;;  %v4710_v23 = vsel %vm661_vm1, %v4663_v37, 0.0 }
 0x533   : > { %v3885_v41 = vadd.f32 %v3884_v5, %v8442_v42  ;;  %v4709_v42 = vadd.f32 %v4708_v54, %v4707_v27  ;;  %v4612_v59 = vadd.f32 %v4611_v29, %v4610_v12 }
 0x535   : > { %v4711_v19 = vadd.f32 %v4710_v23, %v4709_v42 }
 0x53b   : > { %v5654_v44 = vpop.f32.mrf.mxu1 }
 0x53c   : > { %v8613_v5 = vadd.f32 %v5654_v44, %v3890_v16 }
 0x53d   : > { %v4477_v39 = vpop.f32.mrf.mxu1 }
 0x53e   : > { %v8601_v17 = vadd.f32 %v4477_v39, %v3885_v41  ;;  %v4666_v37 = vmul.f32 %v8613_v5, %v8613_v5  ;;  %v4615_v40 = vsel %vm661_vm1, %v8613_v5, 0.0 }
 0x540   : > { %v5605_v10 = vpop.f32.mrf.mxu0  ;;  %v4665_v55 = vmul.f32 %v8601_v17, %v8601_v17  ;;  %v4613_v1 = vsel %vm661_vm1, %v8601_v17, 0.0 }
 0x541   : > { %v4614_v39 = vadd.f32 %v4613_v1, %v4612_v59  ;;  %v3900_v44 = vadd.f32 %v5605_v10, %v8444_v13  ;;  %v4716_v13 = vsel %vm661_vm1, %v4666_v37, 0.0 }
 0x542   : > { %v3894_v18 = vpop.f32.mrf.mxu0  ;;  %v4714_v43 = vsel %vm661_vm1, %v4665_v55, 0.0 }
 0x543   : > { %v3895_v25 = vadd.f32 %v3894_v18, %v8446_v60  ;;  %v4713_v60 = vadd.f32 %v4712_v7, %v4711_v19  ;;  %v4616_v12 = vadd.f32 %v4615_v40, %v4614_v39 }
 0x545   : > { %v4715_v38 = vadd.f32 %v4714_v43, %v4713_v60 }
 0x54b   : > { %v5657_v51 = vpop.f32.mrf.mxu1 }
 0x54c   : > { %v8629_v18 = vadd.f32 %v5657_v51, %v3900_v44 }
 0x54d   : > { %v4487_v31 = vpop.f32.mrf.mxu1 }
 0x54e   : > { %v8617_v56 = vadd.f32 %v4487_v31, %v3895_v25  ;;  %v4668_v55 = vmul.f32 %v8629_v18, %v8629_v18  ;;  %v4619_v59 = vsel %vm661_vm1, %v8629_v18, 0.0 }
 0x550   : > { %v5608_v15 = vpop.f32.mrf.mxu0  ;;  %v4667_v41 = vmul.f32 %v8617_v56, %v8617_v56  ;;  %v4617_v54 = vsel %vm661_vm1, %v8617_v56, 0.0 }
 0x551   : > { %v4618_v31 = vadd.f32 %v4617_v54, %v4616_v12  ;;  %v3910_v51 = vadd.f32 %v5608_v15, %v8448_v57  ;;  %v4720_v57 = vsel %vm661_vm1, %v4668_v55, 0.0 }
 0x552   : > { %v3904_v53 = vpop.f32.mrf.mxu0  ;;  %v4718_v10 = vsel %vm661_vm1, %v4667_v41, 0.0 }
 0x553   : > { %v3905_v27 = vadd.f32 %v3904_v53, %v8450_v14  ;;  %v4717_v14 = vadd.f32 %v4716_v13, %v4715_v38  ;;  %v4620_v39 = vadd.f32 %v4619_v59, %v4618_v31 }
 0x555   : > { %v4719_v29 = vadd.f32 %v4718_v10, %v4717_v14 }
 0x55b   : > { %v5660_v32 = vpop.f32.mrf.mxu1 }
 0x55c   : > { %v8645_v53 = vadd.f32 %v5660_v32, %v3910_v51 }
 0x55d   : > { %v4497_v30 = vpop.f32.mrf.mxu1 }
 0x55e   : > { %v8633_v23 = vadd.f32 %v4497_v30, %v3905_v27  ;;  %v4670_v44 = vmul.f32 %v8645_v53, %v8645_v53  ;;  %v4623_v40 = vsel %vm661_vm1, %v8645_v53, 0.0 }
 0x560   : > { %v5611_v36 = vpop.f32.mrf.mxu0  ;;  %v4669_v25 = vmul.f32 %v8633_v23, %v8633_v23  ;;  %v4621_v7 = vsel %vm661_vm1, %v8633_v23, 0.0  ;;  %v4724_v10 = vsel %vm661_vm1, %v4670_v44, 0.0 }
 0x561   : > { %v4622_v30 = vadd.f32 %v4621_v7, %v4620_v39  ;;  %v3920_v32 = vadd.f32 %v5611_v36, %v8452_v20 }
 0x562   : > { %v3914_v42 = vpop.f32.mrf.mxu0  ;;  %v4722_v15 = vsel %vm661_vm1, %v4669_v25, 0.0 }
 0x563   : > { %v3915_v19 = vadd.f32 %v3914_v42, %v8454_v46  ;;  %v4721_v46 = vadd.f32 %v4720_v57, %v4719_v29  ;;  %v4624_v13 = vadd.f32 %v4623_v40, %v4622_v30 }
 0x565   : > { %v4723_v38 = vadd.f32 %v4722_v15, %v4721_v46 }
 0x567   : > { %v4725_v31 = vadd.f32 %v4724_v10, %v4723_v38 }
 0x56b   : > { %v5663_v9 = vpop.f32.mrf.mxu1 }
 0x56c   : > { %v8661_v54 = vadd.f32 %v5663_v9, %v3920_v32 }
 0x56d   : > { %v4507_v28 = vpop.f32.mrf.mxu1 }
 0x56e   : > { %v8649_v43 = vadd.f32 %v4507_v28, %v3915_v19  ;;  %v4627_v51 = vsel %vm661_vm1, %v8661_v54, 0.0 }
 0x570   : > { %v5614_v16 = vpop.f32.mrf.mxu0  ;;  %v4671_v41 = vmul.f32 %v8649_v43, %v8649_v43  ;;  %v4625_v12 = vsel %vm661_vm1, %v8649_v43, 0.0 }
 0x571   : > { %v4626_v36 = vadd.f32 %v4625_v12, %v4624_v13  ;;  %v3930_v28 = vadd.f32 %v5614_v16, %v8456_v52 }
 0x572   : > { %v3924_v60 = vpop.f32.mrf.mxu0  ;;  %v4726_v20 = vsel %vm661_vm1, %v4671_v41, 0.0 }
 0x573   : > { %v3925_v27 = vadd.f32 %v3924_v60, %v8458_v3  ;;  %v4672_v3 = vmul.f32 %v8661_v54, %v8661_v54  ;;  %v4727_v55 = vadd.f32 %v4726_v20, %v4725_v31  ;;  %v4628_v29 = vadd.f32 %v4627_v51, %v4626_v36 }
 0x575   : > { %v4728_v7 = vsel %vm661_vm1, %v4672_v3, 0.0 }
 0x576   : > { %v4729_v52 = vadd.f32 %v4728_v7, %v4727_v55 }
 0x57b   : > { %v5666_v1 = vpop.f32.mrf.mxu1 }
 0x57c   : > { %v8676_v25 = vadd.f32 %v5666_v1, %v3930_v28 }
 0x57d   : > { %v4517_v37 = vpop.f32.mrf.mxu1 }
 0x57e   : > { %v8665_v42 = vadd.f32 %v4517_v37, %v3925_v27  ;;  %v4674_v15 = vmul.f32 %v8676_v25, %v8676_v25  ;;  %v4631_v44 = vsel %vm661_vm1, %v8676_v25, 0.0 }
 0x580   : > { %v5617_v14 = vpop.f32.mrf.mxu0  ;;  %v4673_v9 = vmul.f32 %v8665_v42, %v8665_v42  ;;  %v4629_v19 = vsel %vm661_vm1, %v8665_v42, 0.0  ;;  %v4732_v40 = vsel %vm661_vm1, %v4674_v15, 0.0 }
 0x581   : > { %v4630_v60 = vadd.f32 %v4629_v19, %v4628_v29  ;;  %v3940_v30 = vadd.f32 %v5617_v14, %v8460_v4 }
 0x582   : > { %v3934_v59 = vpop.f32.mrf.mxu0  ;;  %v4730_v39 = vsel %vm661_vm1, %v4673_v9, 0.0 }
 0x583   : > { %v3935_v1 = vadd.f32 %v3934_v59, %v8462_v11  ;;  %v4731_v46 = vadd.f32 %v4730_v39, %v4729_v52  ;;  %v4632_v27 = vadd.f32 %v4631_v44, %v4630_v60 }
 0x585   : > { %v4733_v10 = vadd.f32 %v4732_v40, %v4731_v46 }
 0x589   : > { %v5620_v57 = vpop.f32.mrf.mxu0 }
 0x58a   : > { %v3950_v12 = vadd.f32 %v5620_v57, %v8464_v26 }
 0x58b   : > { %v5669_v16 = vpop.f32.mrf.mxu1  ;;  %v3944_v38 = vpop.f32.mrf.mxu0 }
 0x58c   : > { %v8688_v32 = vadd.f32 %v5669_v16, %v3940_v30  ;;  %v3945_v14 = vadd.f32 %v3944_v38, %v8466_v35 }
 0x58d   : > { %v4527_v37 = vpop.f32.mrf.mxu1 }
 0x58e   : > { %v8690_v41 = vadd.f32 %v4527_v37, %v3935_v1  ;;  %v4676_v36 = vmul.f32 %v8688_v32, %v8688_v32  ;;  %v4635_v9 = vsel %vm661_vm1, %v8688_v32, 0.0 }
 0x590   : > { %v4633_v4 = vsel %vm661_vm1, %v8690_v41, 0.0  ;;  %v4675_v11 = vmul.f32 %v8690_v41, %v8690_v41  ;;  %v4736_v19 = vsel %vm661_vm1, %v4676_v36, 0.0 }
 0x591   : > { %v4634_v13 = vadd.f32 %v4633_v4, %v4632_v27  ;;  %v5672_v20 = vpop.f32.mrf.mxu1 }
 0x592   : > { %v4734_v31 = vsel %vm661_vm1, %v4675_v11, 0.0  ;;  %v8702_v3 = vadd.f32 %v5672_v20, %v3950_v12 }
 0x593   : > { %v4735_v28 = vadd.f32 %v4734_v31, %v4733_v10  ;;  %v4537_v26 = vpop.f32.mrf.mxu1  ;;  %v4636_v51 = vadd.f32 %v4635_v9, %v4634_v13 }
 0x594   : > { %v8706_v55 = vadd.f32 %v4537_v26, %v3945_v14  ;;  %v4678_v29 = vmul.f32 %v8702_v3, %v8702_v3  ;;  %v4639_v60 = vsel %vm661_vm1, %v8702_v3, 0.0 }
 0x595   : > { %v4737_v39 = vadd.f32 %v4736_v19, %v4735_v28 }
 0x596   : > { %v4637_v59 = vsel %vm661_vm1, %v8706_v55, 0.0  ;;  %v4677_v35 = vmul.f32 %v8706_v55, %v8706_v55  ;;  %v4740_v15 = vsel %vm661_vm1, %v4678_v29, 0.0 }
 0x597   : > { %v4638_v7 = vadd.f32 %v4637_v59, %v4636_v51 }
 0x598   : > { %v4738_v52 = vsel %vm661_vm1, %v4677_v35, 0.0 }
 0x599   : > { %v4640_v16 = vadd.f32 %v4639_v60, %v4638_v7  ;;  %v4739_v57 = vadd.f32 %v4738_v52, %v4737_v39 }
 0x59b   : > { %v4641_v30 = vrot.slane %v4640_v16, 4  ;;  %v4741_v1 = vadd.f32 %v4740_v15, %v4739_v57 }
 0x59d   : > { %v4642_v46 = vadd.f32 %v4641_v30, %v4640_v16  ;;  %v4742_v37 = vrot.slane %v4741_v1, 4 }
 0x59f   : > { %v4643_v44 = vrot.slane %v4642_v46, 2  ;;  %v4743_v27 = vadd.f32 %v4742_v37, %v4741_v1 }
 0x5a1   : > { %v4644_v38 = vadd.f32 %v4643_v44, %v4642_v46  ;;  %v4744_v40 = vrot.slane %v4743_v27, 2 }
 0x5a3   : > { %v4645_v12 = vrot.slane %v4644_v38, 1  ;;  %v4745_v4 = vadd.f32 %v4744_v40, %v4743_v27 }
 0x5a5   : > { %v4646_v11 = vadd.f32 %v4645_v12, %v4644_v38  ;;  %v4746_v13 = vrot.slane %v4745_v4, 1 }
 0x5a7   : > { %v4747_v10 = vadd.f32 %v4746_v13, %v4745_v4  ;;  %v8719_v20 = vmul.f32 0.00390625, %v4646_v11 }
 0x5a9   : > { %v4749_v36 = vmul.f32 0.00390625, %v4747_v10  ;;  %v4750_v31 = vmul.f32 %v8719_v20, %v8719_v20  ;;  %v4753_v9 = vsub.f32 %v8468_v21, %v8719_v20  ;;  %v4754_v51 = vsub.f32 %v8470_v33, %v8719_v20 }
 0x5aa   : > { %v4755_v19 = vsub.f32 %v8472_v45, %v8719_v20  ;;  %v4756_v29 = vsub.f32 %v8485_v48, %v8719_v20  ;;  %v4757_v59 = vsub.f32 %v8489_v50, %v8719_v20  ;;  %v4758_v35 = vsub.f32 %v8501_v0, %v8719_v20 }
 0x5ab   : > { %v4751_v14 = vsub.f32 %v4749_v36, %v4750_v31  ;;  %v4759_v7 = vsub.f32 %v8505_v61, %v8719_v20  ;;  %v4760_v21 = vsub.f32 %v8517_v49, %v8719_v20  ;;  %v4761_v33 = vsub.f32 %v8521_v22, %v8719_v20 }
 0x5ac   : > { %v4762_v45 = vsub.f32 %v8533_v47, %v8719_v20  ;;  %v4763_v48 = vsub.f32 %v8537_v24, %v8719_v20  ;;  %v4764_v50 = vsub.f32 %v8549_v6, %v8719_v20  ;;  %v4765_v0 = vsub.f32 %v8553_v58, %v8719_v20 }
 0x5ad   : > { %v4752_v28 = vmax.f32 %v4751_v14, 0.0  ;;  %v4766_v61 = vsub.f32 %v8565_v8, %v8719_v20  ;;  %v4767_v49 = vsub.f32 %v8569_v63, %v8719_v20  ;;  %v4768_v22 = vsub.f32 %v8581_v2, %v8719_v20 }
 0x5ae   : > { %v4769_v47 = vsub.f32 %v8585_v62, %v8719_v20  ;;  %v4770_v24 = vsub.f32 %v8597_v34, %v8719_v20  ;;  %v4771_v6 = vsub.f32 %v8601_v17, %v8719_v20  ;;  %v4772_v58 = vsub.f32 %v8613_v5, %v8719_v20 }
 0x5af   : > { %v4785_v26 = vadd.f32 1e-05, %v4752_v28  ;;  %v4773_v8 = vsub.f32 %v8617_v56, %v8719_v20  ;;  %v4774_v63 = vsub.f32 %v8629_v18, %v8719_v20  ;;  %v4775_v2 = vsub.f32 %v8633_v23, %v8719_v20 }
 0x5b0   : > { %v4776_v62 = vsub.f32 %v8645_v53, %v8719_v20  ;;  %v4777_v34 = vsub.f32 %v8649_v43, %v8719_v20  ;;  %v4778_v17 = vsub.f32 %v8661_v54, %v8719_v20  ;;  %v4779_v5 = vsub.f32 %v8665_v42, %v8719_v20 }
 0x5b1   : > { %5685 = vrsqrt.f32 %v4785_v26  ;;  %v4780_v56 = vsub.f32 %v8676_v25, %v8719_v20  ;;  %v4781_v18 = vsub.f32 %v8690_v41, %v8719_v20  ;;  %v4782_v23 = vsub.f32 %v8688_v32, %v8719_v20 }
 0x5b2   : > { %v4783_v53 = vsub.f32 %v8706_v55, %v8719_v20  ;;  %v4784_v43 = vsub.f32 %v8702_v3, %v8719_v20 }
 0x5be   : > { %v5686_v39 = vpop.eup %5685 }
 0x5bf   : > { %v4787_v54 = vmul.f32 %v5686_v39, %v4753_v9  ;;  %v4788_v60 = vmul.f32 %v5686_v39, %v4754_v51  ;;  %v4789_v52 = vmul.f32 %v5686_v39, %v4755_v19  ;;  %v4790_v42 = vmul.f32 %v5686_v39, %v4756_v29  ;;  %v5691_v51 = vld [vmem:[%s5777_s21] sm:$0xff]  ;;  %v5692_v29 = vld [vmem:[%s5777_s21 + $0x8] sm:$0xff] }
 0x5c0   : > { %v4791_v16 = vmul.f32 %v5686_v39, %v4757_v59  ;;  %v4792_v57 = vmul.f32 %v5686_v39, %v4758_v35  ;;  %v4793_v25 = vmul.f32 %v5686_v39, %v4759_v7  ;;  %v4794_v15 = vmul.f32 %v5686_v39, %v4760_v21  ;;  %v5693_v35 = vld [vmem:[%s5777_s21 + $0x10] sm:$0xff]  ;;  %v5694_v21 = vld [vmem:[%s5777_s21 + $0x18] sm:$0xff] }
 0x5c1   : > { %v4795_v30 = vmul.f32 %v5686_v39, %v4761_v33  ;;  %v4796_v1 = vmul.f32 %v5686_v39, %v4762_v45  ;;  %v4797_v41 = vmul.f32 %v5686_v39, %v4763_v48  ;;  %v4798_v46 = vmul.f32 %v5686_v39, %v4764_v50  ;;  %v5695_v45 = vld [vmem:[%s5777_s21 + $0x20] sm:$0xff]  ;;  %v5696_v50 = vld [vmem:[%s5777_s21 + $0x28] sm:$0xff] }
 0x5c2   : > { %v4799_v37 = vmul.f32 %v5686_v39, %v4765_v0  ;;  %v4800_v32 = vmul.f32 %v5686_v39, %v4766_v61  ;;  %v4801_v44 = vmul.f32 %v5686_v39, %v4767_v49  ;;  %v4802_v55 = vmul.f32 %v5686_v39, %v4768_v22  ;;  %v5697_v61 = vld [vmem:[%s5777_s21 + $0x30] sm:$0xff]  ;;  %v5698_v22 = vld [vmem:[%s5777_s21 + $0x38] sm:$0xff] }
 0x5c3   : > { %v4803_v27 = vmul.f32 %v5686_v39, %v4769_v47  ;;  %v4804_v38 = vmul.f32 %v5686_v39, %v4770_v24  ;;  %v4805_v3 = vmul.f32 %v5686_v39, %v4771_v6  ;;  %v4806_v40 = vmul.f32 %v5686_v39, %v4772_v58  ;;  %v5699_v24 = vld [vmem:[%s5777_s21 + $0x40] sm:$0xff]  ;;  %v5700_v58 = vld [vmem:[%s5777_s21 + $0x48] sm:$0xff] }
 0x5c4   : > { %v8787_v12 = vmul.f32 %v5686_v39, %v4773_v8  ;;  %v8789_v4 = vmul.f32 %v5686_v39, %v4774_v63  ;;  %v8791_v11 = vmul.f32 %v5686_v39, %v4775_v2  ;;  %v8793_v13 = vmul.f32 %v5686_v39, %v4776_v62  ;;  %v5701_v63 = vld [vmem:[%s5777_s21 + $0x50] sm:$0xff]  ;;  %v5702_v62 = vld [vmem:[%s5777_s21 + $0x58] sm:$0xff] }
 0x5c5   : > { %v8795_v10 = vmul.f32 %v5686_v39, %v4777_v34  ;;  %v8797_v20 = vmul.f32 %v5686_v39, %v4778_v17  ;;  %v8799_v36 = vmul.f32 %v5686_v39, %v4779_v5  ;;  %v8801_v31 = vmul.f32 %v5686_v39, %v4780_v56  ;;  %v5703_v17 = vld [vmem:[%s5777_s21 + $0x60] sm:$0xff]  ;;  %v5704_v56 = vld [vmem:[%s5777_s21 + $0x68] sm:$0xff] }
 0x5c6   : > { %v8810_v14 = vmul.f32 %v5686_v39, %v4781_v18  ;;  %v8812_v28 = vmul.f32 %v5686_v39, %v4782_v23  ;;  %v8814_v26 = vmul.f32 %v5686_v39, %v4783_v53  ;;  %v8816_v9 = vmul.f32 %v5686_v39, %v4784_v43  ;;  %v5705_v18 = vld [vmem:[%s5777_s21 + $0x70] sm:$0xff]  ;;  %v5706_v53 = vld [vmem:[%s5777_s21 + $0x78] sm:$0xff] }
 0x5c7   : > { %v4819_v19 = vadd.f32 %v5691_v51, %v4787_v54  ;;  %v4820_v59 = vadd.f32 %v5692_v29, %v4788_v60  ;;  %v4821_v7 = vadd.f32 %v5693_v35, %v4789_v52  ;;  %v4822_v33 = vadd.f32 %v5694_v21, %v4790_v42  ;;  %v5707_v54 = vld [vmem:[%s5777_s21 + $0x80] sm:$0xff]  ;;  %v5708_v52 = vld [vmem:[%s5777_s21 + $0x88] sm:$0xff]  ;;  %v5721_v51 = vld [vmem:[%s5777_s21 + $0xf0] sm:$0xff] }
 0x5c8   : > { %v4823_v48 = vadd.f32 %v5695_v45, %v4791_v16  ;;  %v4824_v0 = vadd.f32 %v5696_v50, %v4792_v57  ;;  %v4825_v49 = vadd.f32 %v5697_v61, %v4793_v25  ;;  %v4826_v47 = vadd.f32 %v5698_v22, %v4794_v15  ;;  %v5709_v16 = vld [vmem:[%s5777_s21 + $0x90] sm:$0xff]  ;;  %v5710_v25 = vld [vmem:[%s5777_s21 + $0x98] sm:$0xff] }
 0x5c9   : > { %v4827_v6 = vadd.f32 %v5699_v24, %v4795_v30  ;;  %v4828_v8 = vadd.f32 %v5700_v58, %v4796_v1  ;;  %v4829_v2 = vadd.f32 %v5701_v63, %v4797_v41  ;;  %v4830_v34 = vadd.f32 %v5702_v62, %v4798_v46  ;;  %4851 = vst.msk [vmem:[%s8808_s23] sm:$0xff] %vm661_vm1, %v4819_v19  ;;  %v5711_v30 = vld [vmem:[%s5777_s21 + $0xa0] sm:$0xff]  ;;  %v5712_v41 = vld [vmem:[%s5777_s21 + $0xa8] sm:$0xff]  ;;  %v5722_v29 = vld [vmem:[%s5777_s21 + $0xf8] sm:$0xff] }
 0x5ca   : > { %4852 = vst.msk [vmem:[%s8808_s23 + $0x8] sm:$0xff] %vm661_vm1, %v4820_v59  ;;  %4853 = vst.msk [vmem:[%s8808_s23 + $0x10] sm:$0xff] %vm661_vm1, %v4821_v7  ;;  %v4831_v5 = vadd.f32 %v5703_v17, %v4799_v37  ;;  %v4832_v39 = vadd.f32 %v5704_v56, %v4800_v32  ;;  %v4833_v23 = vadd.f32 %v5705_v18, %v4801_v44  ;;  %v5713_v37 = vld [vmem:[%s5777_s21 + $0xb0] sm:$0xff]  ;;  %v5714_v44 = vld [vmem:[%s5777_s21 + $0xb8] sm:$0xff] }
 0x5cb   : > { %4854 = vst.msk [vmem:[%s8808_s23 + $0x18] sm:$0xff] %vm661_vm1, %v4822_v33  ;;  %v4834_v43 = vadd.f32 %v5706_v53, %v4802_v55  ;;  %4855 = vst.msk [vmem:[%s8808_s23 + $0x20] sm:$0xff] %vm661_vm1, %v4823_v48  ;;  %v4835_v60 = vadd.f32 %v5707_v54, %v4803_v27  ;;  %v4836_v42 = vadd.f32 %v5708_v52, %v4804_v38  ;;  %v5715_v27 = vld [vmem:[%s5777_s21 + $0xc0] sm:$0xff] }
 0x5cc   : > { %4856 = vst.msk [vmem:[%s8808_s23 + $0x28] sm:$0xff] %vm661_vm1, %v4824_v0  ;;  %4857 = vst.msk [vmem:[%s8808_s23 + $0x30] sm:$0xff] %vm661_vm1, %v4825_v49  ;;  %v4837_v57 = vadd.f32 %v5709_v16, %v4805_v3  ;;  %v4838_v15 = vadd.f32 %v5710_v25, %v4806_v40  ;;  %v4839_v1 = vadd.f32 %v5711_v30, %v8787_v12  ;;  %v5716_v3 = vld [vmem:[%s5777_s21 + $0xc8] sm:$0xff]  ;;  %v5717_v12 = vld [vmem:[%s5777_s21 + $0xd0] sm:$0xff] }
 0x5cd   : > { %4858 = vst.msk [vmem:[%s8808_s23 + $0x38] sm:$0xff] %vm661_vm1, %v4826_v47  ;;  %4859 = vst.msk [vmem:[%s8808_s23 + $0x40] sm:$0xff] %vm661_vm1, %v4827_v6  ;;  %v4840_v46 = vadd.f32 %v5712_v41, %v8789_v4  ;;  %v4841_v32 = vadd.f32 %v5713_v37, %v8791_v11  ;;  %v4842_v55 = vadd.f32 %v5714_v44, %v8793_v13  ;;  %v5718_v11 = vld [vmem:[%s5777_s21 + $0xd8] sm:$0xff] }
 0x5ce   : > { %4860 = vst.msk [vmem:[%s8808_s23 + $0x48] sm:$0xff] %vm661_vm1, %v4828_v8  ;;  %4861 = vst.msk [vmem:[%s8808_s23 + $0x50] sm:$0xff] %vm661_vm1, %v4829_v2  ;;  %v4843_v38 = vadd.f32 %v5715_v27, %v8795_v10  ;;  %v4844_v40 = vadd.f32 %v5716_v3, %v8797_v20  ;;  %v4845_v4 = vadd.f32 %v5717_v12, %v8799_v36  ;;  %v5719_v10 = vld [vmem:[%s5777_s21 + $0xe0] sm:$0xff]  ;;  %v5720_v36 = vld [vmem:[%s5777_s21 + $0xe8] sm:$0xff] }
 0x5cf   : > { %4862 = vst.msk [vmem:[%s8808_s23 + $0x58] sm:$0xff] %vm661_vm1, %v4830_v34  ;;  %4863 = vst.msk [vmem:[%s8808_s23 + $0x60] sm:$0xff] %vm661_vm1, %v4831_v5  ;;  %v4846_v13 = vadd.f32 %v5718_v11, %v8801_v31  ;;  %v4847_v20 = vadd.f32 %v5719_v10, %v8810_v14  ;;  %v4848_v31 = vadd.f32 %v5720_v36, %v8812_v28 }
 0x5d0   : > { %4864 = vst.msk [vmem:[%s8808_s23 + $0x68] sm:$0xff] %vm661_vm1, %v4832_v39  ;;  %4865 = vst.msk [vmem:[%s8808_s23 + $0x70] sm:$0xff] %vm661_vm1, %v4833_v23  ;;  %v4849_v19 = vadd.f32 %v5721_v51, %v8814_v26  ;;  %v4850_v59 = vadd.f32 %v5722_v29, %v8816_v9 }
 0x5d1   : > { %4866 = vst.msk [vmem:[%s8808_s23 + $0x78] sm:$0xff] %vm661_vm1, %v4834_v43  ;;  %4867 = vst.msk [vmem:[%s8808_s23 + $0x80] sm:$0xff] %vm661_vm1, %v4835_v60 }
 0x5d2   : > { %4868 = vst.msk [vmem:[%s8808_s23 + $0x88] sm:$0xff] %vm661_vm1, %v4836_v42  ;;  %4869 = vst.msk [vmem:[%s8808_s23 + $0x90] sm:$0xff] %vm661_vm1, %v4837_v57 }
 0x5d3   : > { %4870 = vst.msk [vmem:[%s8808_s23 + $0x98] sm:$0xff] %vm661_vm1, %v4838_v15  ;;  %4871 = vst.msk [vmem:[%s8808_s23 + $0xa0] sm:$0xff] %vm661_vm1, %v4839_v1 }
 0x5d4   : > { %4872 = vst.msk [vmem:[%s8808_s23 + $0xa8] sm:$0xff] %vm661_vm1, %v4840_v46  ;;  %4873 = vst.msk [vmem:[%s8808_s23 + $0xb0] sm:$0xff] %vm661_vm1, %v4841_v32 }
 0x5d5   : > { %4874 = vst.msk [vmem:[%s8808_s23 + $0xb8] sm:$0xff] %vm661_vm1, %v4842_v55  ;;  %4875 = vst.msk [vmem:[%s8808_s23 + $0xc0] sm:$0xff] %vm661_vm1, %v4843_v38 }
 0x5d6   : > { %4876 = vst.msk [vmem:[%s8808_s23 + $0xc8] sm:$0xff] %vm661_vm1, %v4844_v40  ;;  %4877 = vst.msk [vmem:[%s8808_s23 + $0xd0] sm:$0xff] %vm661_vm1, %v4845_v4 }
 0x5d7   : > { %4878 = vst.msk [vmem:[%s8808_s23 + $0xd8] sm:$0xff] %vm661_vm1, %v4846_v13  ;;  %4879 = vst.msk [vmem:[%s8808_s23 + $0xe0] sm:$0xff] %vm661_vm1, %v4847_v20 }
 0x5d8   : > { %4880 = vst.msk [vmem:[%s8808_s23 + $0xe8] sm:$0xff] %vm661_vm1, %v4848_v31  ;;  %4881 = vst.msk [vmem:[%s8808_s23 + $0xf0] sm:$0xff] %vm661_vm1, %v4849_v19 }
 0x5d9   : > { %4882 = vst.msk [vmem:[%s8808_s23 + $0xf8] sm:$0xff] %vm661_vm1, %v4850_v59 }
 0x5da PF: > { %s13_s12 = sadd.s32 1, %s5729_s12  }
 0x5db   : > { %p10_p4 = scmp.ge.s32.totalorder %s13_s12, 4  }
 0x5dd   :  { %12 = sbr.rel (!%p10_p4) target bundleno = 1 (0x1), region = 66 }

</bundles_post_ra>
